<compile_context>
chip_gen: v6e
topology: v6e:2x2x1
jax: 0.10.0
libtpu: 0.0.40
codegen_flags: <defaults>
</compile_context>

<pallas_src>
import functools

import jax
import jax.numpy as jnp
from jax.experimental import pallas as pl
from jax.experimental.pallas import tpu as pltpu


# ----------------------------------------------------------------------------
# helpers
# ----------------------------------------------------------------------------
def _round_up(x, m):
    return ((x + m - 1) // m) * m


def _pick_seq_chunk(s):
    for d in (16, 8, 4, 2, 1):
        if s % d == 0:
            return d
    return 1


def _pick_row_block(n):
    for cand in (512, 256, 128, 64, 32, 16, 8):
        if n % cand == 0:
            return cand
    return n


# ----------------------------------------------------------------------------
# Fused multi-layer LSTM kernel (time-major, padded, sequence-chunked grid).
# Gate order follows PyTorch: i, f, g, o.  Each gate block is Hp (128-mult)
# wide so gate extraction is lane-aligned.
# ----------------------------------------------------------------------------
def _lstm_stack_kernel(x_ref, wih0_ref, wihr_ref, whh_ref, b_ref, y_ref,
                       h_sc, c_sc, act_sc, xw_sc, *, num_layers, hp, ts):
    # x_ref:    (TS, BB, Dp)      input chunk (time-major)
    # wih0_ref: (Dp, 4*Hp)        layer-0 input weights (transposed, gate-padded)
    # wihr_ref: (L-1|1, Hp, 4*Hp) input weights of layers >= 1
    # whh_ref:  (L, Hp, 4*Hp)     recurrent weights
    # b_ref:    (L, 1, 4*Hp)      fused bias (b_ih + b_hh), zero in padded lanes
    # y_ref:    (TS, BB, Hp)      last-layer hidden states for this chunk
    # h_sc/c_sc:(L, BB, Hp)       carried recurrent state (persists across grid)
    # act_sc:   (TS*BB, Hp)       inter-layer activations (VMEM resident)
    # xw_sc:    (TS*BB, 4*Hp)     hoisted input projection for current layer
    s_idx = pl.program_id(1)

    @pl.when(s_idx == 0)
    def _():
        h_sc[...] = jnp.zeros_like(h_sc)
        c_sc[...] = jnp.zeros_like(c_sc)

    TS = ts
    Hp = hp
    BB = h_sc.shape[1]

    for layer in range(num_layers):
        # ---- hoisted input projection: one big matmul for the whole chunk ----
        if layer == 0:
            d_in = x_ref.shape[2]
            xin2d = x_ref[...].reshape(TS * BB, d_in)        # (TS*BB, Dp)
            w_in = wih0_ref[...]                             # (Dp, 4Hp)
        else:
            xin2d = act_sc[...]                              # (TS*BB, Hp)
            w_in = wihr_ref[layer - 1]                       # (Hp, 4Hp)
        xw_sc[...] = (
            jnp.dot(xin2d, w_in, preferred_element_type=jnp.float32)
            + b_ref[layer]
        )

        whh = whh_ref[layer]                                 # (Hp, 4Hp)
        h = h_sc[layer]                                      # (BB, Hp)
        c = c_sc[layer]
        is_last = layer == num_layers - 1

        # ---- serial recurrence: only h @ W_hh + gate math per step ----
        for t in range(TS):                                  # static unroll
            rows = pl.ds(t * BB, BB)
            gates = xw_sc[rows, :] + jnp.dot(
                h, whh, preferred_element_type=jnp.float32)  # (BB, 4Hp)
            i_g = jax.nn.sigmoid(gates[:, 0 * Hp:1 * Hp])
            f_g = jax.nn.sigmoid(gates[:, 1 * Hp:2 * Hp])
            g_g = jnp.tanh(gates[:, 2 * Hp:3 * Hp])
            o_g = jax.nn.sigmoid(gates[:, 3 * Hp:4 * Hp])
            c = f_g * c + i_g * g_g
            h = o_g * jnp.tanh(c)
            if is_last:
                y_ref[t] = h.astype(y_ref.dtype)             # lane-dense store
            else:
                act_sc[rows, :] = h

        h_sc[layer] = h
        c_sc[layer] = c


def lstm_stack(x_p, wih0, wihr, whh, bias, *, num_layers, hp, ts):
    S, Bp, Dp = x_p.shape
    BB = Bp                      # full (padded) batch per block
    nb = Bp // BB
    ns = S // ts
    kernel = functools.partial(
        _lstm_stack_kernel, num_layers=num_layers, hp=hp, ts=ts)
    return pl.pallas_call(
        kernel,
        out_shape=jax.ShapeDtypeStruct((S, Bp, hp), jnp.float32),
        grid_spec=pltpu.PrefetchScalarGridSpec(
            num_scalar_prefetch=0,
            grid=(nb, ns),
            in_specs=[
                pl.BlockSpec((ts, BB, Dp), lambda b, s: (s, b, 0)),
                pl.BlockSpec(wih0.shape, lambda b, s: (0, 0)),
                pl.BlockSpec(wihr.shape, lambda b, s: (0, 0, 0)),
                pl.BlockSpec(whh.shape, lambda b, s: (0, 0, 0)),
                pl.BlockSpec(bias.shape, lambda b, s: (0, 0, 0)),
            ],
            out_specs=pl.BlockSpec((ts, BB, hp), lambda b, s: (s, b, 0)),
            scratch_shapes=[
                pltpu.VMEM((num_layers, BB, hp), jnp.float32),   # h carry
                pltpu.VMEM((num_layers, BB, hp), jnp.float32),   # c carry
                pltpu.VMEM((ts * BB, hp), jnp.float32),          # inter-layer act
                pltpu.VMEM((ts * BB, 4 * hp), jnp.float32),      # pre-projection
            ],
        ),
        compiler_params=pltpu.CompilerParams(
            dimension_semantics=("parallel", "arbitrary")),
    )(x_p, wih0, wihr, whh, bias)


# ----------------------------------------------------------------------------
# FC head kernel: (N, Hp) @ (Hp, Dop) + b, gridded over lane-dense row blocks.
# ----------------------------------------------------------------------------
def _fc_kernel(x_ref, w_ref, b_ref, o_ref):
    o_ref[...] = (
        jnp.dot(x_ref[...], w_ref[...], preferred_element_type=jnp.float32)
        + b_ref[...]
    ).astype(o_ref.dtype)


def fc_layer(x2d, w_t, b):
    N, Hp = x2d.shape
    Dop = w_t.shape[1]
    NB = _pick_row_block(N)
    return pl.pallas_call(
        _fc_kernel,
        out_shape=jax.ShapeDtypeStruct((N, Dop), jnp.float32),
        grid_spec=pltpu.PrefetchScalarGridSpec(
            num_scalar_prefetch=0,
            grid=(N // NB,),
            in_specs=[
                pl.BlockSpec((NB, Hp), lambda i: (i, 0)),
                pl.BlockSpec((Hp, Dop), lambda i: (0, 0)),
                pl.BlockSpec((1, Dop), lambda i: (0, 0)),
            ],
            out_specs=pl.BlockSpec((NB, Dop), lambda i: (i, 0)),
        ),
        compiler_params=pltpu.CompilerParams(
            dimension_semantics=("parallel",)),
    )(x2d, w_t, b)


# ----------------------------------------------------------------------------
# Parameter preparation: PyTorch layout -> padded / transposed kernel layout.
# ----------------------------------------------------------------------------
def init_params(key, matrix_size, hidden_size, num_layers):
    """PyTorch-layout params: U(-1/sqrt(H), 1/sqrt(H))."""
    bound = 1.0 / float(hidden_size) ** 0.5
    lstm = []
    for layer in range(num_layers):
        d_in = matrix_size if layer == 0 else hidden_size
        key, k1, k2, k3, k4 = jax.random.split(key, 5)
        w_ih = jax.random.uniform(k1, (4 * hidden_size, d_in), jnp.float32, -bound, bound)
        w_hh = jax.random.uniform(k2, (4 * hidden_size, hidden_size), jnp.float32, -bound, bound)
        b_ih = jax.random.uniform(k3, (4 * hidden_size,), jnp.float32, -bound, bound)
        b_hh = jax.random.uniform(k4, (4 * hidden_size,), jnp.float32, -bound, bound)
        lstm.append((w_ih, w_hh, b_ih, b_hh))
    key, k1, k2 = jax.random.split(key, 3)
    w_fc = jax.random.uniform(k1, (matrix_size, hidden_size), jnp.float32, -bound, bound)
    b_fc = jax.random.uniform(k2, (matrix_size,), jnp.float32, -bound, bound)
    return {"lstm": lstm, "fc": (w_fc, b_fc)}


def prepare_kernel_params(raw, matrix_size, hidden_size, num_layers):
    H, D = hidden_size, matrix_size
    Hp = _round_up(H, 128)
    Dp = _round_up(D, 128)
    Dop = _round_up(D, 128)

    def pad_gate_w(w, d_in, d_in_p):
        # (4H, d_in) -> (d_in_p, 4*Hp), each gate block padded to Hp with zeros.
        w4 = w.reshape(4, H, d_in)
        wt = jnp.transpose(w4, (2, 0, 1))                      # (d_in, 4, H)
        wp = jnp.zeros((d_in_p, 4, Hp), jnp.float32).at[:d_in, :, :H].set(wt)
        return wp.reshape(d_in_p, 4 * Hp)

    def pad_gate_b(b):
        b4 = b.reshape(4, H)
        bp = jnp.zeros((4, Hp), jnp.float32).at[:, :H].set(b4)
        return bp.reshape(1, 4 * Hp)

    wih0 = pad_gate_w(raw["lstm"][0][0], D, Dp)
    if num_layers > 1:
        wihr = jnp.stack(
            [pad_gate_w(raw["lstm"][k][0], H, Hp) for k in range(1, num_layers)])
    else:
        wihr = jnp.zeros((1, Hp, 4 * Hp), jnp.float32)
    whh = jnp.stack(
        [pad_gate_w(raw["lstm"][k][1], H, Hp) for k in range(num_layers)])
    bias = jnp.stack(
        [pad_gate_b(raw["lstm"][k][2] + raw["lstm"][k][3]) for k in range(num_layers)])

    w_fc, b_fc = raw["fc"]                                     # (D, H), (D,)
    w_fc_t = jnp.zeros((Hp, Dop), jnp.float32).at[:H, :D].set(w_fc.T)
    b_fc_p = jnp.zeros((1, Dop), jnp.float32).at[0, :D].set(b_fc)

    return dict(wih0=wih0, wihr=wihr, whh=whh, bias=bias,
                w_fc=w_fc_t, b_fc=b_fc_p, hp=Hp, dp=Dp, dop=Dop)


# ----------------------------------------------------------------------------
# CustomLSTM forward (glue / padding in plain JAX)
# ----------------------------------------------------------------------------
def custom_lstm_forward(x, kparams, *, matrix_size, hidden_size, num_layers):
    B, S, D = x.shape
    Hp, Dp, Dop = kparams["hp"], kparams["dp"], kparams["dop"]
    Bp = _round_up(max(B, 1), 8)
    ts = _pick_seq_chunk(S)

    # batch-first -> time-major, zero-pad batch (sublane) and feature (lane).
    x_tm = jnp.transpose(x, (1, 0, 2)).astype(jnp.float32)     # (S, B, D)
    x_p = jnp.zeros((S, Bp, Dp), jnp.float32).at[:, :B, :D].set(x_tm)

    y_p = lstm_stack(x_p, kparams["wih0"], kparams["wihr"], kparams["whh"],
                     kparams["bias"], num_layers=num_layers, hp=Hp, ts=ts)

    out2d = fc_layer(y_p.reshape(S * Bp, Hp), kparams["w_fc"], kparams["b_fc"])
    out = out2d.reshape(S, Bp, Dop)[:, :B, :D]                 # strip padding
    return jnp.transpose(out, (1, 0, 2))                       # (B, S, D)


# ----------------------------------------------------------------------------
# Pure-JAX reference (PyTorch semantics) for correctness check
# ----------------------------------------------------------------------------
def reference_forward(x, raw, *, hidden_size, num_layers):
    B, S, _ = x.shape
    H = hidden_size
    h_seq = x.astype(jnp.float32)
    for layer in range(num_layers):
        w_ih, w_hh, b_ih, b_hh = raw["lstm"][layer]
        wih_t, whh_t = w_ih.T, w_hh.T
        b = (b_ih + b_hh)[None, :]
        h = jnp.zeros((B, H), jnp.float32)
        c = jnp.zeros((B, H), jnp.float32)
        outs = []
        for t in range(S):
            gates = h_seq[:, t, :] @ wih_t + h @ whh_t + b
            i = jax.nn.sigmoid(gates[:, 0 * H:1 * H])
            f = jax.nn.sigmoid(gates[:, 1 * H:2 * H])
            g = jnp.tanh(gates[:, 2 * H:3 * H])
            o = jax.nn.sigmoid(gates[:, 3 * H:4 * H])
            c = f * c + i * g
            h = o * jnp.tanh(c)
            outs.append(h)
        h_seq = jnp.stack(outs, axis=1)
    w_fc, b_fc = raw["fc"]
    return h_seq @ w_fc.T + b_fc[None, None, :]


if __name__ == "__main__":
    matrix_size = 16
    hidden_size = 32
    num_layers = 2
    batch, seq = 2, 8

    key = jax.random.PRNGKey(0)
    key, pkey, xkey = jax.random.split(key, 3)
    raw_params = init_params(pkey, matrix_size, hidden_size, num_layers)
    kparams = prepare_kernel_params(raw_params, matrix_size, hidden_size, num_layers)
    x = jax.random.normal(xkey, (batch, seq, matrix_size), jnp.float32)

    out = custom_lstm_forward(
        x, kparams, matrix_size=matrix_size,
        hidden_size=hidden_size, num_layers=num_layers)
    out = jax.block_until_ready(out)

    ref = reference_forward(x, raw_params, hidden_size=hidden_size,
                            num_layers=num_layers)
    assert out.shape == (batch, seq, matrix_size)
    assert jnp.max(jnp.abs(out - ref)) < 5e-4

    print("KERNEL_OK")
</pallas_src>

<mosaic_0001>
module attributes {stable_mosaic.version = 11 : i64} {
  func.func @_lstm_stack_kernel(%arg0: i32, %arg1: i32, %arg2: memref<8x8x128xf32, #tpu.memory_space<vmem>>, %arg3: memref<128x512xf32, #tpu.memory_space<vmem>>, %arg4: memref<1x128x512xf32, #tpu.memory_space<vmem>>, %arg5: memref<2x128x512xf32, #tpu.memory_space<vmem>>, %arg6: memref<2x1x512xf32, #tpu.memory_space<vmem>>, %arg7: memref<8x8x128xf32, #tpu.memory_space<vmem>>, %arg8: memref<2x8x128xf32, #tpu.memory_space<vmem>>, %arg9: memref<2x8x128xf32, #tpu.memory_space<vmem>>, %arg10: memref<64x128xf32, #tpu.memory_space<vmem>>, %arg11: memref<64x512xf32, #tpu.memory_space<vmem>>) attributes {dimension_semantics = [#tpu.dimension_semantics<parallel>, #tpu.dimension_semantics<arbitrary>], iteration_bounds = array<i64: 1, 1>, scalar_prefetch = 0 : i64, scratch_operands = 4 : i64, tpu.core_type = #tpu.core_type<tc>, window_params = [{transform_indices = @transform_0, window_bounds = array<i64: 8, 8, 128>}, {pipeline_mode = #tpu.pipeline_mode<synchronous>, transform_indices = @transform_1, window_bounds = array<i64: 128, 512>}, {pipeline_mode = #tpu.pipeline_mode<synchronous>, transform_indices = @transform_2, window_bounds = array<i64: 1, 128, 512>}, {pipeline_mode = #tpu.pipeline_mode<synchronous>, transform_indices = @transform_3, window_bounds = array<i64: 2, 128, 512>}, {pipeline_mode = #tpu.pipeline_mode<synchronous>, transform_indices = @transform_4, window_bounds = array<i64: 2, 1, 512>}, {transform_indices = @transform_5, window_bounds = array<i64: 8, 8, 128>}]} {
    %c0_i32 = arith.constant 0 : i32
    %0 = arith.cmpi eq, %arg1, %c0_i32 : i32
    %1 = arith.extui %0 : i1 to i32
    %c0_i32_0 = arith.constant 0 : i32
    %2 = arith.cmpi ne, %1, %c0_i32_0 : i32
    scf.if %2 {
      %cst_173 = arith.constant 0.000000e+00 : f32
      %525 = vector.broadcast %cst_173 : f32 to vector<2x8x128xf32>
      %c0_174 = arith.constant 0 : index
      %c0_175 = arith.constant 0 : index
      %c0_176 = arith.constant 0 : index
      %526 = vector.load %arg8[%c0_174, %c0_175, %c0_176] : memref<2x8x128xf32, #tpu.memory_space<vmem>>, vector<2x8x128xf32>
      tpu.vector_store %arg8[%c0_174, %c0_175, %c0_176], %525 {strides = array<i32>} : memref<2x8x128xf32, #tpu.memory_space<vmem>>, vector<2x8x128xf32>,
      %cst_177 = arith.constant 0.000000e+00 : f32
      %527 = vector.broadcast %cst_177 : f32 to vector<2x8x128xf32>
      %c0_178 = arith.constant 0 : index
      %c0_179 = arith.constant 0 : index
      %c0_180 = arith.constant 0 : index
      %528 = vector.load %arg9[%c0_178, %c0_179, %c0_180] : memref<2x8x128xf32, #tpu.memory_space<vmem>>, vector<2x8x128xf32>
      tpu.vector_store %arg9[%c0_178, %c0_179, %c0_180], %527 {strides = array<i32>} : memref<2x8x128xf32, #tpu.memory_space<vmem>>, vector<2x8x128xf32>,
    } else {
    }
    %c0 = arith.constant 0 : index
    %c0_1 = arith.constant 0 : index
    %c0_2 = arith.constant 0 : index
    %3 = vector.load %arg2[%c0, %c0_1, %c0_2] : memref<8x8x128xf32, #tpu.memory_space<vmem>>, vector<8x8x128xf32>
    %4 = vector.shape_cast %3 : vector<8x8x128xf32> to vector<64x128xf32>
    %c0_3 = arith.constant 0 : index
    %c0_4 = arith.constant 0 : index
    %5 = vector.load %arg3[%c0_3, %c0_4] : memref<128x512xf32, #tpu.memory_space<vmem>>, vector<128x512xf32>
    %cst = arith.constant dense<0.000000e+00> : vector<64x512xf32>
    %6 = tpu.matmul %4, %5, %cst {dimension_numbers = #tpu.dot_dimension_numbers<[1], [0], [0], [1], [0, 0, 1, 1], [], []>} : vector<64x128xf32>, vector<128x512xf32>, vector<64x512xf32> -> vector<64x512xf32>
    %c0_5 = arith.constant 0 : index
    %c0_6 = arith.constant 0 : index
    %c0_7 = arith.constant 0 : index
    %7 = vector.load %arg6[%c0_5, %c0_6, %c0_7] : memref<2x1x512xf32, #tpu.memory_space<vmem>>, vector<1x1x512xf32>
    %8 = vector.shape_cast %7 : vector<1x1x512xf32> to vector<1x512xf32>
    %9 = vector.broadcast %8 : vector<1x512xf32> to vector<64x512xf32>
    %10 = arith.addf %6, %9 : vector<64x512xf32>
    %c0_8 = arith.constant 0 : index
    %c0_9 = arith.constant 0 : index
    %11 = vector.load %arg11[%c0_8, %c0_9] : memref<64x512xf32, #tpu.memory_space<vmem>>, vector<64x512xf32>
    tpu.vector_store %arg11[%c0_8, %c0_9], %10 {strides = array<i32>} : memref<64x512xf32, #tpu.memory_space<vmem>>, vector<64x512xf32>,
    %c0_10 = arith.constant 0 : index
    %c0_11 = arith.constant 0 : index
    %c0_12 = arith.constant 0 : index
    %12 = vector.load %arg5[%c0_10, %c0_11, %c0_12] : memref<2x128x512xf32, #tpu.memory_space<vmem>>, vector<1x128x512xf32>
    %13 = vector.shape_cast %12 : vector<1x128x512xf32> to vector<128x512xf32>
    %c0_13 = arith.constant 0 : index
    %c0_14 = arith.constant 0 : index
    %c0_15 = arith.constant 0 : index
    %14 = vector.load %arg8[%c0_13, %c0_14, %c0_15] : memref<2x8x128xf32, #tpu.memory_space<vmem>>, vector<1x8x128xf32>
    %15 = vector.shape_cast %14 : vector<1x8x128xf32> to vector<8x128xf32>
    %c0_16 = arith.constant 0 : index
    %c0_17 = arith.constant 0 : index
    %c0_18 = arith.constant 0 : index
    %16 = vector.load %arg9[%c0_16, %c0_17, %c0_18] : memref<2x8x128xf32, #tpu.memory_space<vmem>>, vector<1x8x128xf32>
    %17 = vector.shape_cast %16 : vector<1x8x128xf32> to vector<8x128xf32>
    %c0_19 = arith.constant 0 : index
    %c0_20 = arith.constant 0 : index
    %18 = vector.load %arg11[%c0_19, %c0_20] : memref<64x512xf32, #tpu.memory_space<vmem>>, vector<8x512xf32>
    %cst_21 = arith.constant dense<0.000000e+00> : vector<8x512xf32>
    %19 = tpu.matmul %15, %13, %cst_21 {dimension_numbers = #tpu.dot_dimension_numbers<[1], [0], [0], [1], [0, 0, 1, 1], [], []>} : vector<8x128xf32>, vector<128x512xf32>, vector<8x512xf32> -> vector<8x512xf32>
    %20 = arith.addf %18, %19 : vector<8x512xf32>
    %21 = vector.extract_strided_slice %20 {offsets = [0, 0], sizes = [8, 128], strides = [1, 1]} : vector<8x512xf32> to vector<8x128xf32>
    %22 = arith.negf %21 : vector<8x128xf32>
    %23 = math.exp %22 : vector<8x128xf32>
    %cst_22 = arith.constant 1.000000e+00 : f32
    %24 = vector.broadcast %cst_22 : f32 to vector<8x128xf32>
    %25 = arith.addf %24, %23 : vector<8x128xf32>
    %26 = arith.divf %24, %25 : vector<8x128xf32>
    %27 = vector.extract_strided_slice %20 {offsets = [0, 128], sizes = [8, 128], strides = [1, 1]} : vector<8x512xf32> to vector<8x128xf32>
    %28 = arith.negf %27 : vector<8x128xf32>
    %29 = math.exp %28 : vector<8x128xf32>
    %cst_23 = arith.constant 1.000000e+00 : f32
    %30 = vector.broadcast %cst_23 : f32 to vector<8x128xf32>
    %31 = arith.addf %30, %29 : vector<8x128xf32>
    %32 = arith.divf %30, %31 : vector<8x128xf32>
    %33 = vector.extract_strided_slice %20 {offsets = [0, 256], sizes = [8, 128], strides = [1, 1]} : vector<8x512xf32> to vector<8x128xf32>
    %34 = math.tanh %33 : vector<8x128xf32>
    %35 = vector.extract_strided_slice %20 {offsets = [0, 384], sizes = [8, 128], strides = [1, 1]} : vector<8x512xf32> to vector<8x128xf32>
    %36 = arith.negf %35 : vector<8x128xf32>
    %37 = math.exp %36 : vector<8x128xf32>
    %cst_24 = arith.constant 1.000000e+00 : f32
    %38 = vector.broadcast %cst_24 : f32 to vector<8x128xf32>
    %39 = arith.addf %38, %37 : vector<8x128xf32>
    %40 = arith.divf %38, %39 : vector<8x128xf32>
    %41 = arith.mulf %32, %17 : vector<8x128xf32>
    %42 = arith.mulf %26, %34 : vector<8x128xf32>
    %43 = arith.addf %41, %42 : vector<8x128xf32>
    %44 = math.tanh %43 : vector<8x128xf32>
    %45 = arith.mulf %40, %44 : vector<8x128xf32>
    %c0_25 = arith.constant 0 : index
    %c0_26 = arith.constant 0 : index
    %46 = vector.load %arg10[%c0_25, %c0_26] : memref<64x128xf32, #tpu.memory_space<vmem>>, vector<8x128xf32>
    tpu.vector_store %arg10[%c0_25, %c0_26], %45 {strides = array<i32>} : memref<64x128xf32, #tpu.memory_space<vmem>>, vector<8x128xf32>,
    %c8 = arith.constant 8 : index
    %c0_27 = arith.constant 0 : index
    %47 = vector.load %arg11[%c8, %c0_27] : memref<64x512xf32, #tpu.memory_space<vmem>>, vector<8x512xf32>
    %cst_28 = arith.constant dense<0.000000e+00> : vector<8x512xf32>
    %48 = tpu.matmul %45, %13, %cst_28 {dimension_numbers = #tpu.dot_dimension_numbers<[1], [0], [0], [1], [0, 0, 1, 1], [], []>} : vector<8x128xf32>, vector<128x512xf32>, vector<8x512xf32> -> vector<8x512xf32>
    %49 = arith.addf %47, %48 : vector<8x512xf32>
    %50 = vector.extract_strided_slice %49 {offsets = [0, 0], sizes = [8, 128], strides = [1, 1]} : vector<8x512xf32> to vector<8x128xf32>
    %51 = arith.negf %50 : vector<8x128xf32>
    %52 = math.exp %51 : vector<8x128xf32>
    %cst_29 = arith.constant 1.000000e+00 : f32
    %53 = vector.broadcast %cst_29 : f32 to vector<8x128xf32>
    %54 = arith.addf %53, %52 : vector<8x128xf32>
    %55 = arith.divf %53, %54 : vector<8x128xf32>
    %56 = vector.extract_strided_slice %49 {offsets = [0, 128], sizes = [8, 128], strides = [1, 1]} : vector<8x512xf32> to vector<8x128xf32>
    %57 = arith.negf %56 : vector<8x128xf32>
    %58 = math.exp %57 : vector<8x128xf32>
    %cst_30 = arith.constant 1.000000e+00 : f32
    %59 = vector.broadcast %cst_30 : f32 to vector<8x128xf32>
    %60 = arith.addf %59, %58 : vector<8x128xf32>
    %61 = arith.divf %59, %60 : vector<8x128xf32>
    %62 = vector.extract_strided_slice %49 {offsets = [0, 256], sizes = [8, 128], strides = [1, 1]} : vector<8x512xf32> to vector<8x128xf32>
    %63 = math.tanh %62 : vector<8x128xf32>
    %64 = vector.extract_strided_slice %49 {offsets = [0, 384], sizes = [8, 128], strides = [1, 1]} : vector<8x512xf32> to vector<8x128xf32>
    %65 = arith.negf %64 : vector<8x128xf32>
    %66 = math.exp %65 : vector<8x128xf32>
    %cst_31 = arith.constant 1.000000e+00 : f32
    %67 = vector.broadcast %cst_31 : f32 to vector<8x128xf32>
    %68 = arith.addf %67, %66 : vector<8x128xf32>
    %69 = arith.divf %67, %68 : vector<8x128xf32>
    %70 = arith.mulf %61, %43 : vector<8x128xf32>
    %71 = arith.mulf %55, %63 : vector<8x128xf32>
    %72 = arith.addf %70, %71 : vector<8x128xf32>
    %73 = math.tanh %72 : vector<8x128xf32>
    %74 = arith.mulf %69, %73 : vector<8x128xf32>
    %c8_32 = arith.constant 8 : index
    %c0_33 = arith.constant 0 : index
    %75 = vector.load %arg10[%c8_32, %c0_33] : memref<64x128xf32, #tpu.memory_space<vmem>>, vector<8x128xf32>
    tpu.vector_store %arg10[%c8_32, %c0_33], %74 {strides = array<i32>} : memref<64x128xf32, #tpu.memory_space<vmem>>, vector<8x128xf32>,
    %c16 = arith.constant 16 : index
    %c0_34 = arith.constant 0 : index
    %76 = vector.load %arg11[%c16, %c0_34] : memref<64x512xf32, #tpu.memory_space<vmem>>, vector<8x512xf32>
    %cst_35 = arith.constant dense<0.000000e+00> : vector<8x512xf32>
    %77 = tpu.matmul %74, %13, %cst_35 {dimension_numbers = #tpu.dot_dimension_numbers<[1], [0], [0], [1], [0, 0, 1, 1], [], []>} : vector<8x128xf32>, vector<128x512xf32>, vector<8x512xf32> -> vector<8x512xf32>
    %78 = arith.addf %76, %77 : vector<8x512xf32>
    %79 = vector.extract_strided_slice %78 {offsets = [0, 0], sizes = [8, 128], strides = [1, 1]} : vector<8x512xf32> to vector<8x128xf32>
    %80 = arith.negf %79 : vector<8x128xf32>
    %81 = math.exp %80 : vector<8x128xf32>
    %cst_36 = arith.constant 1.000000e+00 : f32
    %82 = vector.broadcast %cst_36 : f32 to vector<8x128xf32>
    %83 = arith.addf %82, %81 : vector<8x128xf32>
    %84 = arith.divf %82, %83 : vector<8x128xf32>
    %85 = vector.extract_strided_slice %78 {offsets = [0, 128], sizes = [8, 128], strides = [1, 1]} : vector<8x512xf32> to vector<8x128xf32>
    %86 = arith.negf %85 : vector<8x128xf32>
    %87 = math.exp %86 : vector<8x128xf32>
    %cst_37 = arith.constant 1.000000e+00 : f32
    %88 = vector.broadcast %cst_37 : f32 to vector<8x128xf32>
    %89 = arith.addf %88, %87 : vector<8x128xf32>
    %90 = arith.divf %88, %89 : vector<8x128xf32>
    %91 = vector.extract_strided_slice %78 {offsets = [0, 256], sizes = [8, 128], strides = [1, 1]} : vector<8x512xf32> to vector<8x128xf32>
    %92 = math.tanh %91 : vector<8x128xf32>
    %93 = vector.extract_strided_slice %78 {offsets = [0, 384], sizes = [8, 128], strides = [1, 1]} : vector<8x512xf32> to vector<8x128xf32>
    %94 = arith.negf %93 : vector<8x128xf32>
    %95 = math.exp %94 : vector<8x128xf32>
    %cst_38 = arith.constant 1.000000e+00 : f32
    %96 = vector.broadcast %cst_38 : f32 to vector<8x128xf32>
    %97 = arith.addf %96, %95 : vector<8x128xf32>
    %98 = arith.divf %96, %97 : vector<8x128xf32>
    %99 = arith.mulf %90, %72 : vector<8x128xf32>
    %100 = arith.mulf %84, %92 : vector<8x128xf32>
    %101 = arith.addf %99, %100 : vector<8x128xf32>
    %102 = math.tanh %101 : vector<8x128xf32>
    %103 = arith.mulf %98, %102 : vector<8x128xf32>
    %c16_39 = arith.constant 16 : index
    %c0_40 = arith.constant 0 : index
    %104 = vector.load %arg10[%c16_39, %c0_40] : memref<64x128xf32, #tpu.memory_space<vmem>>, vector<8x128xf32>
    tpu.vector_store %arg10[%c16_39, %c0_40], %103 {strides = array<i32>} : memref<64x128xf32, #tpu.memory_space<vmem>>, vector<8x128xf32>,
    %c24 = arith.constant 24 : index
    %c0_41 = arith.constant 0 : index
    %105 = vector.load %arg11[%c24, %c0_41] : memref<64x512xf32, #tpu.memory_space<vmem>>, vector<8x512xf32>
    %cst_42 = arith.constant dense<0.000000e+00> : vector<8x512xf32>
    %106 = tpu.matmul %103, %13, %cst_42 {dimension_numbers = #tpu.dot_dimension_numbers<[1], [0], [0], [1], [0, 0, 1, 1], [], []>} : vector<8x128xf32>, vector<128x512xf32>, vector<8x512xf32> -> vector<8x512xf32>
    %107 = arith.addf %105, %106 : vector<8x512xf32>
    %108 = vector.extract_strided_slice %107 {offsets = [0, 0], sizes = [8, 128], strides = [1, 1]} : vector<8x512xf32> to vector<8x128xf32>
    %109 = arith.negf %108 : vector<8x128xf32>
    %110 = math.exp %109 : vector<8x128xf32>
    %cst_43 = arith.constant 1.000000e+00 : f32
    %111 = vector.broadcast %cst_43 : f32 to vector<8x128xf32>
    %112 = arith.addf %111, %110 : vector<8x128xf32>
    %113 = arith.divf %111, %112 : vector<8x128xf32>
    %114 = vector.extract_strided_slice %107 {offsets = [0, 128], sizes = [8, 128], strides = [1, 1]} : vector<8x512xf32> to vector<8x128xf32>
    %115 = arith.negf %114 : vector<8x128xf32>
    %116 = math.exp %115 : vector<8x128xf32>
    %cst_44 = arith.constant 1.000000e+00 : f32
    %117 = vector.broadcast %cst_44 : f32 to vector<8x128xf32>
    %118 = arith.addf %117, %116 : vector<8x128xf32>
    %119 = arith.divf %117, %118 : vector<8x128xf32>
    %120 = vector.extract_strided_slice %107 {offsets = [0, 256], sizes = [8, 128], strides = [1, 1]} : vector<8x512xf32> to vector<8x128xf32>
    %121 = math.tanh %120 : vector<8x128xf32>
    %122 = vector.extract_strided_slice %107 {offsets = [0, 384], sizes = [8, 128], strides = [1, 1]} : vector<8x512xf32> to vector<8x128xf32>
    %123 = arith.negf %122 : vector<8x128xf32>
    %124 = math.exp %123 : vector<8x128xf32>
    %cst_45 = arith.constant 1.000000e+00 : f32
    %125 = vector.broadcast %cst_45 : f32 to vector<8x128xf32>
    %126 = arith.addf %125, %124 : vector<8x128xf32>
    %127 = arith.divf %125, %126 : vector<8x128xf32>
    %128 = arith.mulf %119, %101 : vector<8x128xf32>
    %129 = arith.mulf %113, %121 : vector<8x128xf32>
    %130 = arith.addf %128, %129 : vector<8x128xf32>
    %131 = math.tanh %130 : vector<8x128xf32>
    %132 = arith.mulf %127, %131 : vector<8x128xf32>
    %c24_46 = arith.constant 24 : index
    %c0_47 = arith.constant 0 : index
    %133 = vector.load %arg10[%c24_46, %c0_47] : memref<64x128xf32, #tpu.memory_space<vmem>>, vector<8x128xf32>
    tpu.vector_store %arg10[%c24_46, %c0_47], %132 {strides = array<i32>} : memref<64x128xf32, #tpu.memory_space<vmem>>, vector<8x128xf32>,
    %c32 = arith.constant 32 : index
    %c0_48 = arith.constant 0 : index
    %134 = vector.load %arg11[%c32, %c0_48] : memref<64x512xf32, #tpu.memory_space<vmem>>, vector<8x512xf32>
    %cst_49 = arith.constant dense<0.000000e+00> : vector<8x512xf32>
    %135 = tpu.matmul %132, %13, %cst_49 {dimension_numbers = #tpu.dot_dimension_numbers<[1], [0], [0], [1], [0, 0, 1, 1], [], []>} : vector<8x128xf32>, vector<128x512xf32>, vector<8x512xf32> -> vector<8x512xf32>
    %136 = arith.addf %134, %135 : vector<8x512xf32>
    %137 = vector.extract_strided_slice %136 {offsets = [0, 0], sizes = [8, 128], strides = [1, 1]} : vector<8x512xf32> to vector<8x128xf32>
    %138 = arith.negf %137 : vector<8x128xf32>
    %139 = math.exp %138 : vector<8x128xf32>
    %cst_50 = arith.constant 1.000000e+00 : f32
    %140 = vector.broadcast %cst_50 : f32 to vector<8x128xf32>
    %141 = arith.addf %140, %139 : vector<8x128xf32>
    %142 = arith.divf %140, %141 : vector<8x128xf32>
    %143 = vector.extract_strided_slice %136 {offsets = [0, 128], sizes = [8, 128], strides = [1, 1]} : vector<8x512xf32> to vector<8x128xf32>
    %144 = arith.negf %143 : vector<8x128xf32>
    %145 = math.exp %144 : vector<8x128xf32>
    %cst_51 = arith.constant 1.000000e+00 : f32
    %146 = vector.broadcast %cst_51 : f32 to vector<8x128xf32>
    %147 = arith.addf %146, %145 : vector<8x128xf32>
    %148 = arith.divf %146, %147 : vector<8x128xf32>
    %149 = vector.extract_strided_slice %136 {offsets = [0, 256], sizes = [8, 128], strides = [1, 1]} : vector<8x512xf32> to vector<8x128xf32>
    %150 = math.tanh %149 : vector<8x128xf32>
    %151 = vector.extract_strided_slice %136 {offsets = [0, 384], sizes = [8, 128], strides = [1, 1]} : vector<8x512xf32> to vector<8x128xf32>
    %152 = arith.negf %151 : vector<8x128xf32>
    %153 = math.exp %152 : vector<8x128xf32>
    %cst_52 = arith.constant 1.000000e+00 : f32
    %154 = vector.broadcast %cst_52 : f32 to vector<8x128xf32>
    %155 = arith.addf %154, %153 : vector<8x128xf32>
    %156 = arith.divf %154, %155 : vector<8x128xf32>
    %157 = arith.mulf %148, %130 : vector<8x128xf32>
    %158 = arith.mulf %142, %150 : vector<8x128xf32>
    %159 = arith.addf %157, %158 : vector<8x128xf32>
    %160 = math.tanh %159 : vector<8x128xf32>
    %161 = arith.mulf %156, %160 : vector<8x128xf32>
    %c32_53 = arith.constant 32 : index
    %c0_54 = arith.constant 0 : index
    %162 = vector.load %arg10[%c32_53, %c0_54] : memref<64x128xf32, #tpu.memory_space<vmem>>, vector<8x128xf32>
    tpu.vector_store %arg10[%c32_53, %c0_54], %161 {strides = array<i32>} : memref<64x128xf32, #tpu.memory_space<vmem>>, vector<8x128xf32>,
    %c40 = arith.constant 40 : index
    %c0_55 = arith.constant 0 : index
    %163 = vector.load %arg11[%c40, %c0_55] : memref<64x512xf32, #tpu.memory_space<vmem>>, vector<8x512xf32>
    %cst_56 = arith.constant dense<0.000000e+00> : vector<8x512xf32>
    %164 = tpu.matmul %161, %13, %cst_56 {dimension_numbers = #tpu.dot_dimension_numbers<[1], [0], [0], [1], [0, 0, 1, 1], [], []>} : vector<8x128xf32>, vector<128x512xf32>, vector<8x512xf32> -> vector<8x512xf32>
    %165 = arith.addf %163, %164 : vector<8x512xf32>
    %166 = vector.extract_strided_slice %165 {offsets = [0, 0], sizes = [8, 128], strides = [1, 1]} : vector<8x512xf32> to vector<8x128xf32>
    %167 = arith.negf %166 : vector<8x128xf32>
    %168 = math.exp %167 : vector<8x128xf32>
    %cst_57 = arith.constant 1.000000e+00 : f32
    %169 = vector.broadcast %cst_57 : f32 to vector<8x128xf32>
    %170 = arith.addf %169, %168 : vector<8x128xf32>
    %171 = arith.divf %169, %170 : vector<8x128xf32>
    %172 = vector.extract_strided_slice %165 {offsets = [0, 128], sizes = [8, 128], strides = [1, 1]} : vector<8x512xf32> to vector<8x128xf32>
    %173 = arith.negf %172 : vector<8x128xf32>
    %174 = math.exp %173 : vector<8x128xf32>
    %cst_58 = arith.constant 1.000000e+00 : f32
    %175 = vector.broadcast %cst_58 : f32 to vector<8x128xf32>
    %176 = arith.addf %175, %174 : vector<8x128xf32>
    %177 = arith.divf %175, %176 : vector<8x128xf32>
    %178 = vector.extract_strided_slice %165 {offsets = [0, 256], sizes = [8, 128], strides = [1, 1]} : vector<8x512xf32> to vector<8x128xf32>
    %179 = math.tanh %178 : vector<8x128xf32>
    %180 = vector.extract_strided_slice %165 {offsets = [0, 384], sizes = [8, 128], strides = [1, 1]} : vector<8x512xf32> to vector<8x128xf32>
    %181 = arith.negf %180 : vector<8x128xf32>
    %182 = math.exp %181 : vector<8x128xf32>
    %cst_59 = arith.constant 1.000000e+00 : f32
    %183 = vector.broadcast %cst_59 : f32 to vector<8x128xf32>
    %184 = arith.addf %183, %182 : vector<8x128xf32>
    %185 = arith.divf %183, %184 : vector<8x128xf32>
    %186 = arith.mulf %177, %159 : vector<8x128xf32>
    %187 = arith.mulf %171, %179 : vector<8x128xf32>
    %188 = arith.addf %186, %187 : vector<8x128xf32>
    %189 = math.tanh %188 : vector<8x128xf32>
    %190 = arith.mulf %185, %189 : vector<8x128xf32>
    %c40_60 = arith.constant 40 : index
    %c0_61 = arith.constant 0 : index
    %191 = vector.load %arg10[%c40_60, %c0_61] : memref<64x128xf32, #tpu.memory_space<vmem>>, vector<8x128xf32>
    tpu.vector_store %arg10[%c40_60, %c0_61], %190 {strides = array<i32>} : memref<64x128xf32, #tpu.memory_space<vmem>>, vector<8x128xf32>,
    %c48 = arith.constant 48 : index
    %c0_62 = arith.constant 0 : index
    %192 = vector.load %arg11[%c48, %c0_62] : memref<64x512xf32, #tpu.memory_space<vmem>>, vector<8x512xf32>
    %cst_63 = arith.constant dense<0.000000e+00> : vector<8x512xf32>
    %193 = tpu.matmul %190, %13, %cst_63 {dimension_numbers = #tpu.dot_dimension_numbers<[1], [0], [0], [1], [0, 0, 1, 1], [], []>} : vector<8x128xf32>, vector<128x512xf32>, vector<8x512xf32> -> vector<8x512xf32>
    %194 = arith.addf %192, %193 : vector<8x512xf32>
    %195 = vector.extract_strided_slice %194 {offsets = [0, 0], sizes = [8, 128], strides = [1, 1]} : vector<8x512xf32> to vector<8x128xf32>
    %196 = arith.negf %195 : vector<8x128xf32>
    %197 = math.exp %196 : vector<8x128xf32>
    %cst_64 = arith.constant 1.000000e+00 : f32
    %198 = vector.broadcast %cst_64 : f32 to vector<8x128xf32>
    %199 = arith.addf %198, %197 : vector<8x128xf32>
    %200 = arith.divf %198, %199 : vector<8x128xf32>
    %201 = vector.extract_strided_slice %194 {offsets = [0, 128], sizes = [8, 128], strides = [1, 1]} : vector<8x512xf32> to vector<8x128xf32>
    %202 = arith.negf %201 : vector<8x128xf32>
    %203 = math.exp %202 : vector<8x128xf32>
    %cst_65 = arith.constant 1.000000e+00 : f32
    %204 = vector.broadcast %cst_65 : f32 to vector<8x128xf32>
    %205 = arith.addf %204, %203 : vector<8x128xf32>
    %206 = arith.divf %204, %205 : vector<8x128xf32>
    %207 = vector.extract_strided_slice %194 {offsets = [0, 256], sizes = [8, 128], strides = [1, 1]} : vector<8x512xf32> to vector<8x128xf32>
    %208 = math.tanh %207 : vector<8x128xf32>
    %209 = vector.extract_strided_slice %194 {offsets = [0, 384], sizes = [8, 128], strides = [1, 1]} : vector<8x512xf32> to vector<8x128xf32>
    %210 = arith.negf %209 : vector<8x128xf32>
    %211 = math.exp %210 : vector<8x128xf32>
    %cst_66 = arith.constant 1.000000e+00 : f32
    %212 = vector.broadcast %cst_66 : f32 to vector<8x128xf32>
    %213 = arith.addf %212, %211 : vector<8x128xf32>
    %214 = arith.divf %212, %213 : vector<8x128xf32>
    %215 = arith.mulf %206, %188 : vector<8x128xf32>
    %216 = arith.mulf %200, %208 : vector<8x128xf32>
    %217 = arith.addf %215, %216 : vector<8x128xf32>
    %218 = math.tanh %217 : vector<8x128xf32>
    %219 = arith.mulf %214, %218 : vector<8x128xf32>
    %c48_67 = arith.constant 48 : index
    %c0_68 = arith.constant 0 : index
    %220 = vector.load %arg10[%c48_67, %c0_68] : memref<64x128xf32, #tpu.memory_space<vmem>>, vector<8x128xf32>
    tpu.vector_store %arg10[%c48_67, %c0_68], %219 {strides = array<i32>} : memref<64x128xf32, #tpu.memory_space<vmem>>, vector<8x128xf32>,
    %c56 = arith.constant 56 : index
    %c0_69 = arith.constant 0 : index
    %221 = vector.load %arg11[%c56, %c0_69] : memref<64x512xf32, #tpu.memory_space<vmem>>, vector<8x512xf32>
    %cst_70 = arith.constant dense<0.000000e+00> : vector<8x512xf32>
    %222 = tpu.matmul %219, %13, %cst_70 {dimension_numbers = #tpu.dot_dimension_numbers<[1], [0], [0], [1], [0, 0, 1, 1], [], []>} : vector<8x128xf32>, vector<128x512xf32>, vector<8x512xf32> -> vector<8x512xf32>
    %223 = arith.addf %221, %222 : vector<8x512xf32>
    %224 = vector.extract_strided_slice %223 {offsets = [0, 0], sizes = [8, 128], strides = [1, 1]} : vector<8x512xf32> to vector<8x128xf32>
    %225 = arith.negf %224 : vector<8x128xf32>
    %226 = math.exp %225 : vector<8x128xf32>
    %cst_71 = arith.constant 1.000000e+00 : f32
    %227 = vector.broadcast %cst_71 : f32 to vector<8x128xf32>
    %228 = arith.addf %227, %226 : vector<8x128xf32>
    %229 = arith.divf %227, %228 : vector<8x128xf32>
    %230 = vector.extract_strided_slice %223 {offsets = [0, 128], sizes = [8, 128], strides = [1, 1]} : vector<8x512xf32> to vector<8x128xf32>
    %231 = arith.negf %230 : vector<8x128xf32>
    %232 = math.exp %231 : vector<8x128xf32>
    %cst_72 = arith.constant 1.000000e+00 : f32
    %233 = vector.broadcast %cst_72 : f32 to vector<8x128xf32>
    %234 = arith.addf %233, %232 : vector<8x128xf32>
    %235 = arith.divf %233, %234 : vector<8x128xf32>
    %236 = vector.extract_strided_slice %223 {offsets = [0, 256], sizes = [8, 128], strides = [1, 1]} : vector<8x512xf32> to vector<8x128xf32>
    %237 = math.tanh %236 : vector<8x128xf32>
    %238 = vector.extract_strided_slice %223 {offsets = [0, 384], sizes = [8, 128], strides = [1, 1]} : vector<8x512xf32> to vector<8x128xf32>
    %239 = arith.negf %238 : vector<8x128xf32>
    %240 = math.exp %239 : vector<8x128xf32>
    %cst_73 = arith.constant 1.000000e+00 : f32
    %241 = vector.broadcast %cst_73 : f32 to vector<8x128xf32>
    %242 = arith.addf %241, %240 : vector<8x128xf32>
    %243 = arith.divf %241, %242 : vector<8x128xf32>
    %244 = arith.mulf %235, %217 : vector<8x128xf32>
    %245 = arith.mulf %229, %237 : vector<8x128xf32>
    %246 = arith.addf %244, %245 : vector<8x128xf32>
    %247 = math.tanh %246 : vector<8x128xf32>
    %248 = arith.mulf %243, %247 : vector<8x128xf32>
    %c56_74 = arith.constant 56 : index
    %c0_75 = arith.constant 0 : index
    %249 = vector.load %arg10[%c56_74, %c0_75] : memref<64x128xf32, #tpu.memory_space<vmem>>, vector<8x128xf32>
    tpu.vector_store %arg10[%c56_74, %c0_75], %248 {strides = array<i32>} : memref<64x128xf32, #tpu.memory_space<vmem>>, vector<8x128xf32>,
    %c0_76 = arith.constant 0 : index
    %c0_77 = arith.constant 0 : index
    %c0_78 = arith.constant 0 : index
    %250 = vector.load %arg8[%c0_76, %c0_77, %c0_78] : memref<2x8x128xf32, #tpu.memory_space<vmem>>, vector<1x8x128xf32>
    %251 = vector.shape_cast %250 : vector<1x8x128xf32> to vector<8x128xf32>
    %252 = vector.shape_cast %248 : vector<8x128xf32> to vector<1x8x128xf32>
    tpu.vector_store %arg8[%c0_76, %c0_77, %c0_78], %252 {strides = array<i32>} : memref<2x8x128xf32, #tpu.memory_space<vmem>>, vector<1x8x128xf32>,
    %c0_79 = arith.constant 0 : index
    %c0_80 = arith.constant 0 : index
    %c0_81 = arith.constant 0 : index
    %253 = vector.load %arg9[%c0_79, %c0_80, %c0_81] : memref<2x8x128xf32, #tpu.memory_space<vmem>>, vector<1x8x128xf32>
    %254 = vector.shape_cast %253 : vector<1x8x128xf32> to vector<8x128xf32>
    %255 = vector.shape_cast %246 : vector<8x128xf32> to vector<1x8x128xf32>
    tpu.vector_store %arg9[%c0_79, %c0_80, %c0_81], %255 {strides = array<i32>} : memref<2x8x128xf32, #tpu.memory_space<vmem>>, vector<1x8x128xf32>,
    %c0_82 = arith.constant 0 : index
    %c0_83 = arith.constant 0 : index
    %256 = vector.load %arg10[%c0_82, %c0_83] : memref<64x128xf32, #tpu.memory_space<vmem>>, vector<64x128xf32>
    %c0_84 = arith.constant 0 : index
    %c0_85 = arith.constant 0 : index
    %c0_86 = arith.constant 0 : index
    %257 = vector.load %arg4[%c0_84, %c0_85, %c0_86] : memref<1x128x512xf32, #tpu.memory_space<vmem>>, vector<1x128x512xf32>
    %258 = vector.shape_cast %257 : vector<1x128x512xf32> to vector<128x512xf32>
    %cst_87 = arith.constant dense<0.000000e+00> : vector<64x512xf32>
    %259 = tpu.matmul %256, %258, %cst_87 {dimension_numbers = #tpu.dot_dimension_numbers<[1], [0], [0], [1], [0, 0, 1, 1], [], []>} : vector<64x128xf32>, vector<128x512xf32>, vector<64x512xf32> -> vector<64x512xf32>
    %c1 = arith.constant 1 : index
    %c0_88 = arith.constant 0 : index
    %c0_89 = arith.constant 0 : index
    %260 = vector.load %arg6[%c1, %c0_88, %c0_89] : memref<2x1x512xf32, #tpu.memory_space<vmem>>, vector<1x1x512xf32>
    %261 = vector.shape_cast %260 : vector<1x1x512xf32> to vector<1x512xf32>
    %262 = vector.broadcast %261 : vector<1x512xf32> to vector<64x512xf32>
    %263 = arith.addf %259, %262 : vector<64x512xf32>
    %c0_90 = arith.constant 0 : index
    %c0_91 = arith.constant 0 : index
    %264 = vector.load %arg11[%c0_90, %c0_91] : memref<64x512xf32, #tpu.memory_space<vmem>>, vector<64x512xf32>
    tpu.vector_store %arg11[%c0_90, %c0_91], %263 {strides = array<i32>} : memref<64x512xf32, #tpu.memory_space<vmem>>, vector<64x512xf32>,
    %c1_92 = arith.constant 1 : index
    %c0_93 = arith.constant 0 : index
    %c0_94 = arith.constant 0 : index
    %265 = vector.load %arg5[%c1_92, %c0_93, %c0_94] : memref<2x128x512xf32, #tpu.memory_space<vmem>>, vector<1x128x512xf32>
    %266 = vector.shape_cast %265 : vector<1x128x512xf32> to vector<128x512xf32>
    %c1_95 = arith.constant 1 : index
    %c0_96 = arith.constant 0 : index
    %c0_97 = arith.constant 0 : index
    %267 = vector.load %arg8[%c1_95, %c0_96, %c0_97] : memref<2x8x128xf32, #tpu.memory_space<vmem>>, vector<1x8x128xf32>
    %268 = vector.shape_cast %267 : vector<1x8x128xf32> to vector<8x128xf32>
    %c1_98 = arith.constant 1 : index
    %c0_99 = arith.constant 0 : index
    %c0_100 = arith.constant 0 : index
    %269 = vector.load %arg9[%c1_98, %c0_99, %c0_100] : memref<2x8x128xf32, #tpu.memory_space<vmem>>, vector<1x8x128xf32>
    %270 = vector.shape_cast %269 : vector<1x8x128xf32> to vector<8x128xf32>
    %c0_101 = arith.constant 0 : index
    %c0_102 = arith.constant 0 : index
    %271 = vector.load %arg11[%c0_101, %c0_102] : memref<64x512xf32, #tpu.memory_space<vmem>>, vector<8x512xf32>
    %cst_103 = arith.constant dense<0.000000e+00> : vector<8x512xf32>
    %272 = tpu.matmul %268, %266, %cst_103 {dimension_numbers = #tpu.dot_dimension_numbers<[1], [0], [0], [1], [0, 0, 1, 1], [], []>} : vector<8x128xf32>, vector<128x512xf32>, vector<8x512xf32> -> vector<8x512xf32>
    %273 = arith.addf %271, %272 : vector<8x512xf32>
    %274 = vector.extract_strided_slice %273 {offsets = [0, 0], sizes = [8, 128], strides = [1, 1]} : vector<8x512xf32> to vector<8x128xf32>
    %275 = arith.negf %274 : vector<8x128xf32>
    %276 = math.exp %275 : vector<8x128xf32>
    %cst_104 = arith.constant 1.000000e+00 : f32
    %277 = vector.broadcast %cst_104 : f32 to vector<8x128xf32>
    %278 = arith.addf %277, %276 : vector<8x128xf32>
    %279 = arith.divf %277, %278 : vector<8x128xf32>
    %280 = vector.extract_strided_slice %273 {offsets = [0, 128], sizes = [8, 128], strides = [1, 1]} : vector<8x512xf32> to vector<8x128xf32>
    %281 = arith.negf %280 : vector<8x128xf32>
    %282 = math.exp %281 : vector<8x128xf32>
    %cst_105 = arith.constant 1.000000e+00 : f32
    %283 = vector.broadcast %cst_105 : f32 to vector<8x128xf32>
    %284 = arith.addf %283, %282 : vector<8x128xf32>
    %285 = arith.divf %283, %284 : vector<8x128xf32>
    %286 = vector.extract_strided_slice %273 {offsets = [0, 256], sizes = [8, 128], strides = [1, 1]} : vector<8x512xf32> to vector<8x128xf32>
    %287 = math.tanh %286 : vector<8x128xf32>
    %288 = vector.extract_strided_slice %273 {offsets = [0, 384], sizes = [8, 128], strides = [1, 1]} : vector<8x512xf32> to vector<8x128xf32>
    %289 = arith.negf %288 : vector<8x128xf32>
    %290 = math.exp %289 : vector<8x128xf32>
    %cst_106 = arith.constant 1.000000e+00 : f32
    %291 = vector.broadcast %cst_106 : f32 to vector<8x128xf32>
    %292 = arith.addf %291, %290 : vector<8x128xf32>
    %293 = arith.divf %291, %292 : vector<8x128xf32>
    %294 = arith.mulf %285, %270 : vector<8x128xf32>
    %295 = arith.mulf %279, %287 : vector<8x128xf32>
    %296 = arith.addf %294, %295 : vector<8x128xf32>
    %297 = math.tanh %296 : vector<8x128xf32>
    %298 = arith.mulf %293, %297 : vector<8x128xf32>
    %c0_107 = arith.constant 0 : index
    %c0_108 = arith.constant 0 : index
    %c0_109 = arith.constant 0 : index
    %299 = vector.load %arg7[%c0_107, %c0_108, %c0_109] : memref<8x8x128xf32, #tpu.memory_space<vmem>>, vector<1x8x128xf32>
    %300 = vector.shape_cast %299 : vector<1x8x128xf32> to vector<8x128xf32>
    %301 = vector.shape_cast %298 : vector<8x128xf32> to vector<1x8x128xf32>
    tpu.vector_store %arg7[%c0_107, %c0_108, %c0_109], %301 {strides = array<i32>} : memref<8x8x128xf32, #tpu.memory_space<vmem>>, vector<1x8x128xf32>,
    %c8_110 = arith.constant 8 : index
    %c0_111 = arith.constant 0 : index
    %302 = vector.load %arg11[%c8_110, %c0_111] : memref<64x512xf32, #tpu.memory_space<vmem>>, vector<8x512xf32>
    %cst_112 = arith.constant dense<0.000000e+00> : vector<8x512xf32>
    %303 = tpu.matmul %298, %266, %cst_112 {dimension_numbers = #tpu.dot_dimension_numbers<[1], [0], [0], [1], [0, 0, 1, 1], [], []>} : vector<8x128xf32>, vector<128x512xf32>, vector<8x512xf32> -> vector<8x512xf32>
    %304 = arith.addf %302, %303 : vector<8x512xf32>
    %305 = vector.extract_strided_slice %304 {offsets = [0, 0], sizes = [8, 128], strides = [1, 1]} : vector<8x512xf32> to vector<8x128xf32>
    %306 = arith.negf %305 : vector<8x128xf32>
    %307 = math.exp %306 : vector<8x128xf32>
    %cst_113 = arith.constant 1.000000e+00 : f32
    %308 = vector.broadcast %cst_113 : f32 to vector<8x128xf32>
    %309 = arith.addf %308, %307 : vector<8x128xf32>
    %310 = arith.divf %308, %309 : vector<8x128xf32>
    %311 = vector.extract_strided_slice %304 {offsets = [0, 128], sizes = [8, 128], strides = [1, 1]} : vector<8x512xf32> to vector<8x128xf32>
    %312 = arith.negf %311 : vector<8x128xf32>
    %313 = math.exp %312 : vector<8x128xf32>
    %cst_114 = arith.constant 1.000000e+00 : f32
    %314 = vector.broadcast %cst_114 : f32 to vector<8x128xf32>
    %315 = arith.addf %314, %313 : vector<8x128xf32>
    %316 = arith.divf %314, %315 : vector<8x128xf32>
    %317 = vector.extract_strided_slice %304 {offsets = [0, 256], sizes = [8, 128], strides = [1, 1]} : vector<8x512xf32> to vector<8x128xf32>
    %318 = math.tanh %317 : vector<8x128xf32>
    %319 = vector.extract_strided_slice %304 {offsets = [0, 384], sizes = [8, 128], strides = [1, 1]} : vector<8x512xf32> to vector<8x128xf32>
    %320 = arith.negf %319 : vector<8x128xf32>
    %321 = math.exp %320 : vector<8x128xf32>
    %cst_115 = arith.constant 1.000000e+00 : f32
    %322 = vector.broadcast %cst_115 : f32 to vector<8x128xf32>
    %323 = arith.addf %322, %321 : vector<8x128xf32>
    %324 = arith.divf %322, %323 : vector<8x128xf32>
    %325 = arith.mulf %316, %296 : vector<8x128xf32>
    %326 = arith.mulf %310, %318 : vector<8x128xf32>
    %327 = arith.addf %325, %326 : vector<8x128xf32>
    %328 = math.tanh %327 : vector<8x128xf32>
    %329 = arith.mulf %324, %328 : vector<8x128xf32>
    %c1_116 = arith.constant 1 : index
    %c0_117 = arith.constant 0 : index
    %c0_118 = arith.constant 0 : index
    %330 = vector.load %arg7[%c1_116, %c0_117, %c0_118] : memref<8x8x128xf32, #tpu.memory_space<vmem>>, vector<1x8x128xf32>
    %331 = vector.shape_cast %330 : vector<1x8x128xf32> to vector<8x128xf32>
    %332 = vector.shape_cast %329 : vector<8x128xf32> to vector<1x8x128xf32>
    tpu.vector_store %arg7[%c1_116, %c0_117, %c0_118], %332 {strides = array<i32>} : memref<8x8x128xf32, #tpu.memory_space<vmem>>, vector<1x8x128xf32>,
    %c16_119 = arith.constant 16 : index
    %c0_120 = arith.constant 0 : index
    %333 = vector.load %arg11[%c16_119, %c0_120] : memref<64x512xf32, #tpu.memory_space<vmem>>, vector<8x512xf32>
    %cst_121 = arith.constant dense<0.000000e+00> : vector<8x512xf32>
    %334 = tpu.matmul %329, %266, %cst_121 {dimension_numbers = #tpu.dot_dimension_numbers<[1], [0], [0], [1], [0, 0, 1, 1], [], []>} : vector<8x128xf32>, vector<128x512xf32>, vector<8x512xf32> -> vector<8x512xf32>
    %335 = arith.addf %333, %334 : vector<8x512xf32>
    %336 = vector.extract_strided_slice %335 {offsets = [0, 0], sizes = [8, 128], strides = [1, 1]} : vector<8x512xf32> to vector<8x128xf32>
    %337 = arith.negf %336 : vector<8x128xf32>
    %338 = math.exp %337 : vector<8x128xf32>
    %cst_122 = arith.constant 1.000000e+00 : f32
    %339 = vector.broadcast %cst_122 : f32 to vector<8x128xf32>
    %340 = arith.addf %339, %338 : vector<8x128xf32>
    %341 = arith.divf %339, %340 : vector<8x128xf32>
    %342 = vector.extract_strided_slice %335 {offsets = [0, 128], sizes = [8, 128], strides = [1, 1]} : vector<8x512xf32> to vector<8x128xf32>
    %343 = arith.negf %342 : vector<8x128xf32>
    %344 = math.exp %343 : vector<8x128xf32>
    %cst_123 = arith.constant 1.000000e+00 : f32
    %345 = vector.broadcast %cst_123 : f32 to vector<8x128xf32>
    %346 = arith.addf %345, %344 : vector<8x128xf32>
    %347 = arith.divf %345, %346 : vector<8x128xf32>
    %348 = vector.extract_strided_slice %335 {offsets = [0, 256], sizes = [8, 128], strides = [1, 1]} : vector<8x512xf32> to vector<8x128xf32>
    %349 = math.tanh %348 : vector<8x128xf32>
    %350 = vector.extract_strided_slice %335 {offsets = [0, 384], sizes = [8, 128], strides = [1, 1]} : vector<8x512xf32> to vector<8x128xf32>
    %351 = arith.negf %350 : vector<8x128xf32>
    %352 = math.exp %351 : vector<8x128xf32>
    %cst_124 = arith.constant 1.000000e+00 : f32
    %353 = vector.broadcast %cst_124 : f32 to vector<8x128xf32>
    %354 = arith.addf %353, %352 : vector<8x128xf32>
    %355 = arith.divf %353, %354 : vector<8x128xf32>
    %356 = arith.mulf %347, %327 : vector<8x128xf32>
    %357 = arith.mulf %341, %349 : vector<8x128xf32>
    %358 = arith.addf %356, %357 : vector<8x128xf32>
    %359 = math.tanh %358 : vector<8x128xf32>
    %360 = arith.mulf %355, %359 : vector<8x128xf32>
    %c2 = arith.constant 2 : index
    %c0_125 = arith.constant 0 : index
    %c0_126 = arith.constant 0 : index
    %361 = vector.load %arg7[%c2, %c0_125, %c0_126] : memref<8x8x128xf32, #tpu.memory_space<vmem>>, vector<1x8x128xf32>
    %362 = vector.shape_cast %361 : vector<1x8x128xf32> to vector<8x128xf32>
    %363 = vector.shape_cast %360 : vector<8x128xf32> to vector<1x8x128xf32>
    tpu.vector_store %arg7[%c2, %c0_125, %c0_126], %363 {strides = array<i32>} : memref<8x8x128xf32, #tpu.memory_space<vmem>>, vector<1x8x128xf32>,
    %c24_127 = arith.constant 24 : index
    %c0_128 = arith.constant 0 : index
    %364 = vector.load %arg11[%c24_127, %c0_128] : memref<64x512xf32, #tpu.memory_space<vmem>>, vector<8x512xf32>
    %cst_129 = arith.constant dense<0.000000e+00> : vector<8x512xf32>
    %365 = tpu.matmul %360, %266, %cst_129 {dimension_numbers = #tpu.dot_dimension_numbers<[1], [0], [0], [1], [0, 0, 1, 1], [], []>} : vector<8x128xf32>, vector<128x512xf32>, vector<8x512xf32> -> vector<8x512xf32>
    %366 = arith.addf %364, %365 : vector<8x512xf32>
    %367 = vector.extract_strided_slice %366 {offsets = [0, 0], sizes = [8, 128], strides = [1, 1]} : vector<8x512xf32> to vector<8x128xf32>
    %368 = arith.negf %367 : vector<8x128xf32>
    %369 = math.exp %368 : vector<8x128xf32>
    %cst_130 = arith.constant 1.000000e+00 : f32
    %370 = vector.broadcast %cst_130 : f32 to vector<8x128xf32>
    %371 = arith.addf %370, %369 : vector<8x128xf32>
    %372 = arith.divf %370, %371 : vector<8x128xf32>
    %373 = vector.extract_strided_slice %366 {offsets = [0, 128], sizes = [8, 128], strides = [1, 1]} : vector<8x512xf32> to vector<8x128xf32>
    %374 = arith.negf %373 : vector<8x128xf32>
    %375 = math.exp %374 : vector<8x128xf32>
    %cst_131 = arith.constant 1.000000e+00 : f32
    %376 = vector.broadcast %cst_131 : f32 to vector<8x128xf32>
    %377 = arith.addf %376, %375 : vector<8x128xf32>
    %378 = arith.divf %376, %377 : vector<8x128xf32>
    %379 = vector.extract_strided_slice %366 {offsets = [0, 256], sizes = [8, 128], strides = [1, 1]} : vector<8x512xf32> to vector<8x128xf32>
    %380 = math.tanh %379 : vector<8x128xf32>
    %381 = vector.extract_strided_slice %366 {offsets = [0, 384], sizes = [8, 128], strides = [1, 1]} : vector<8x512xf32> to vector<8x128xf32>
    %382 = arith.negf %381 : vector<8x128xf32>
    %383 = math.exp %382 : vector<8x128xf32>
    %cst_132 = arith.constant 1.000000e+00 : f32
    %384 = vector.broadcast %cst_132 : f32 to vector<8x128xf32>
    %385 = arith.addf %384, %383 : vector<8x128xf32>
    %386 = arith.divf %384, %385 : vector<8x128xf32>
    %387 = arith.mulf %378, %358 : vector<8x128xf32>
    %388 = arith.mulf %372, %380 : vector<8x128xf32>
    %389 = arith.addf %387, %388 : vector<8x128xf32>
    %390 = math.tanh %389 : vector<8x128xf32>
    %391 = arith.mulf %386, %390 : vector<8x128xf32>
    %c3 = arith.constant 3 : index
    %c0_133 = arith.constant 0 : index
    %c0_134 = arith.constant 0 : index
    %392 = vector.load %arg7[%c3, %c0_133, %c0_134] : memref<8x8x128xf32, #tpu.memory_space<vmem>>, vector<1x8x128xf32>
    %393 = vector.shape_cast %392 : vector<1x8x128xf32> to vector<8x128xf32>
    %394 = vector.shape_cast %391 : vector<8x128xf32> to vector<1x8x128xf32>
    tpu.vector_store %arg7[%c3, %c0_133, %c0_134], %394 {strides = array<i32>} : memref<8x8x128xf32, #tpu.memory_space<vmem>>, vector<1x8x128xf32>,
    %c32_135 = arith.constant 32 : index
    %c0_136 = arith.constant 0 : index
    %395 = vector.load %arg11[%c32_135, %c0_136] : memref<64x512xf32, #tpu.memory_space<vmem>>, vector<8x512xf32>
    %cst_137 = arith.constant dense<0.000000e+00> : vector<8x512xf32>
    %396 = tpu.matmul %391, %266, %cst_137 {dimension_numbers = #tpu.dot_dimension_numbers<[1], [0], [0], [1], [0, 0, 1, 1], [], []>} : vector<8x128xf32>, vector<128x512xf32>, vector<8x512xf32> -> vector<8x512xf32>
    %397 = arith.addf %395, %396 : vector<8x512xf32>
    %398 = vector.extract_strided_slice %397 {offsets = [0, 0], sizes = [8, 128], strides = [1, 1]} : vector<8x512xf32> to vector<8x128xf32>
    %399 = arith.negf %398 : vector<8x128xf32>
    %400 = math.exp %399 : vector<8x128xf32>
    %cst_138 = arith.constant 1.000000e+00 : f32
    %401 = vector.broadcast %cst_138 : f32 to vector<8x128xf32>
    %402 = arith.addf %401, %400 : vector<8x128xf32>
    %403 = arith.divf %401, %402 : vector<8x128xf32>
    %404 = vector.extract_strided_slice %397 {offsets = [0, 128], sizes = [8, 128], strides = [1, 1]} : vector<8x512xf32> to vector<8x128xf32>
    %405 = arith.negf %404 : vector<8x128xf32>
    %406 = math.exp %405 : vector<8x128xf32>
    %cst_139 = arith.constant 1.000000e+00 : f32
    %407 = vector.broadcast %cst_139 : f32 to vector<8x128xf32>
    %408 = arith.addf %407, %406 : vector<8x128xf32>
    %409 = arith.divf %407, %408 : vector<8x128xf32>
    %410 = vector.extract_strided_slice %397 {offsets = [0, 256], sizes = [8, 128], strides = [1, 1]} : vector<8x512xf32> to vector<8x128xf32>
    %411 = math.tanh %410 : vector<8x128xf32>
    %412 = vector.extract_strided_slice %397 {offsets = [0, 384], sizes = [8, 128], strides = [1, 1]} : vector<8x512xf32> to vector<8x128xf32>
    %413 = arith.negf %412 : vector<8x128xf32>
    %414 = math.exp %413 : vector<8x128xf32>
    %cst_140 = arith.constant 1.000000e+00 : f32
    %415 = vector.broadcast %cst_140 : f32 to vector<8x128xf32>
    %416 = arith.addf %415, %414 : vector<8x128xf32>
    %417 = arith.divf %415, %416 : vector<8x128xf32>
    %418 = arith.mulf %409, %389 : vector<8x128xf32>
    %419 = arith.mulf %403, %411 : vector<8x128xf32>
    %420 = arith.addf %418, %419 : vector<8x128xf32>
    %421 = math.tanh %420 : vector<8x128xf32>
    %422 = arith.mulf %417, %421 : vector<8x128xf32>
    %c4 = arith.constant 4 : index
    %c0_141 = arith.constant 0 : index
    %c0_142 = arith.constant 0 : index
    %423 = vector.load %arg7[%c4, %c0_141, %c0_142] : memref<8x8x128xf32, #tpu.memory_space<vmem>>, vector<1x8x128xf32>
    %424 = vector.shape_cast %423 : vector<1x8x128xf32> to vector<8x128xf32>
    %425 = vector.shape_cast %422 : vector<8x128xf32> to vector<1x8x128xf32>
    tpu.vector_store %arg7[%c4, %c0_141, %c0_142], %425 {strides = array<i32>} : memref<8x8x128xf32, #tpu.memory_space<vmem>>, vector<1x8x128xf32>,
    %c40_143 = arith.constant 40 : index
    %c0_144 = arith.constant 0 : index
    %426 = vector.load %arg11[%c40_143, %c0_144] : memref<64x512xf32, #tpu.memory_space<vmem>>, vector<8x512xf32>
    %cst_145 = arith.constant dense<0.000000e+00> : vector<8x512xf32>
    %427 = tpu.matmul %422, %266, %cst_145 {dimension_numbers = #tpu.dot_dimension_numbers<[1], [0], [0], [1], [0, 0, 1, 1], [], []>} : vector<8x128xf32>, vector<128x512xf32>, vector<8x512xf32> -> vector<8x512xf32>
    %428 = arith.addf %426, %427 : vector<8x512xf32>
    %429 = vector.extract_strided_slice %428 {offsets = [0, 0], sizes = [8, 128], strides = [1, 1]} : vector<8x512xf32> to vector<8x128xf32>
    %430 = arith.negf %429 : vector<8x128xf32>
    %431 = math.exp %430 : vector<8x128xf32>
    %cst_146 = arith.constant 1.000000e+00 : f32
    %432 = vector.broadcast %cst_146 : f32 to vector<8x128xf32>
    %433 = arith.addf %432, %431 : vector<8x128xf32>
    %434 = arith.divf %432, %433 : vector<8x128xf32>
    %435 = vector.extract_strided_slice %428 {offsets = [0, 128], sizes = [8, 128], strides = [1, 1]} : vector<8x512xf32> to vector<8x128xf32>
    %436 = arith.negf %435 : vector<8x128xf32>
    %437 = math.exp %436 : vector<8x128xf32>
    %cst_147 = arith.constant 1.000000e+00 : f32
    %438 = vector.broadcast %cst_147 : f32 to vector<8x128xf32>
    %439 = arith.addf %438, %437 : vector<8x128xf32>
    %440 = arith.divf %438, %439 : vector<8x128xf32>
    %441 = vector.extract_strided_slice %428 {offsets = [0, 256], sizes = [8, 128], strides = [1, 1]} : vector<8x512xf32> to vector<8x128xf32>
    %442 = math.tanh %441 : vector<8x128xf32>
    %443 = vector.extract_strided_slice %428 {offsets = [0, 384], sizes = [8, 128], strides = [1, 1]} : vector<8x512xf32> to vector<8x128xf32>
    %444 = arith.negf %443 : vector<8x128xf32>
    %445 = math.exp %444 : vector<8x128xf32>
    %cst_148 = arith.constant 1.000000e+00 : f32
    %446 = vector.broadcast %cst_148 : f32 to vector<8x128xf32>
    %447 = arith.addf %446, %445 : vector<8x128xf32>
    %448 = arith.divf %446, %447 : vector<8x128xf32>
    %449 = arith.mulf %440, %420 : vector<8x128xf32>
    %450 = arith.mulf %434, %442 : vector<8x128xf32>
    %451 = arith.addf %449, %450 : vector<8x128xf32>
    %452 = math.tanh %451 : vector<8x128xf32>
    %453 = arith.mulf %448, %452 : vector<8x128xf32>
    %c5 = arith.constant 5 : index
    %c0_149 = arith.constant 0 : index
    %c0_150 = arith.constant 0 : index
    %454 = vector.load %arg7[%c5, %c0_149, %c0_150] : memref<8x8x128xf32, #tpu.memory_space<vmem>>, vector<1x8x128xf32>
    %455 = vector.shape_cast %454 : vector<1x8x128xf32> to vector<8x128xf32>
    %456 = vector.shape_cast %453 : vector<8x128xf32> to vector<1x8x128xf32>
    tpu.vector_store %arg7[%c5, %c0_149, %c0_150], %456 {strides = array<i32>} : memref<8x8x128xf32, #tpu.memory_space<vmem>>, vector<1x8x128xf32>,
    %c48_151 = arith.constant 48 : index
    %c0_152 = arith.constant 0 : index
    %457 = vector.load %arg11[%c48_151, %c0_152] : memref<64x512xf32, #tpu.memory_space<vmem>>, vector<8x512xf32>
    %cst_153 = arith.constant dense<0.000000e+00> : vector<8x512xf32>
    %458 = tpu.matmul %453, %266, %cst_153 {dimension_numbers = #tpu.dot_dimension_numbers<[1], [0], [0], [1], [0, 0, 1, 1], [], []>} : vector<8x128xf32>, vector<128x512xf32>, vector<8x512xf32> -> vector<8x512xf32>
    %459 = arith.addf %457, %458 : vector<8x512xf32>
    %460 = vector.extract_strided_slice %459 {offsets = [0, 0], sizes = [8, 128], strides = [1, 1]} : vector<8x512xf32> to vector<8x128xf32>
    %461 = arith.negf %460 : vector<8x128xf32>
    %462 = math.exp %461 : vector<8x128xf32>
    %cst_154 = arith.constant 1.000000e+00 : f32
    %463 = vector.broadcast %cst_154 : f32 to vector<8x128xf32>
    %464 = arith.addf %463, %462 : vector<8x128xf32>
    %465 = arith.divf %463, %464 : vector<8x128xf32>
    %466 = vector.extract_strided_slice %459 {offsets = [0, 128], sizes = [8, 128], strides = [1, 1]} : vector<8x512xf32> to vector<8x128xf32>
    %467 = arith.negf %466 : vector<8x128xf32>
    %468 = math.exp %467 : vector<8x128xf32>
    %cst_155 = arith.constant 1.000000e+00 : f32
    %469 = vector.broadcast %cst_155 : f32 to vector<8x128xf32>
    %470 = arith.addf %469, %468 : vector<8x128xf32>
    %471 = arith.divf %469, %470 : vector<8x128xf32>
    %472 = vector.extract_strided_slice %459 {offsets = [0, 256], sizes = [8, 128], strides = [1, 1]} : vector<8x512xf32> to vector<8x128xf32>
    %473 = math.tanh %472 : vector<8x128xf32>
    %474 = vector.extract_strided_slice %459 {offsets = [0, 384], sizes = [8, 128], strides = [1, 1]} : vector<8x512xf32> to vector<8x128xf32>
    %475 = arith.negf %474 : vector<8x128xf32>
    %476 = math.exp %475 : vector<8x128xf32>
    %cst_156 = arith.constant 1.000000e+00 : f32
    %477 = vector.broadcast %cst_156 : f32 to vector<8x128xf32>
    %478 = arith.addf %477, %476 : vector<8x128xf32>
    %479 = arith.divf %477, %478 : vector<8x128xf32>
    %480 = arith.mulf %471, %451 : vector<8x128xf32>
    %481 = arith.mulf %465, %473 : vector<8x128xf32>
    %482 = arith.addf %480, %481 : vector<8x128xf32>
    %483 = math.tanh %482 : vector<8x128xf32>
    %484 = arith.mulf %479, %483 : vector<8x128xf32>
    %c6 = arith.constant 6 : index
    %c0_157 = arith.constant 0 : index
    %c0_158 = arith.constant 0 : index
    %485 = vector.load %arg7[%c6, %c0_157, %c0_158] : memref<8x8x128xf32, #tpu.memory_space<vmem>>, vector<1x8x128xf32>
    %486 = vector.shape_cast %485 : vector<1x8x128xf32> to vector<8x128xf32>
    %487 = vector.shape_cast %484 : vector<8x128xf32> to vector<1x8x128xf32>
    tpu.vector_store %arg7[%c6, %c0_157, %c0_158], %487 {strides = array<i32>} : memref<8x8x128xf32, #tpu.memory_space<vmem>>, vector<1x8x128xf32>,
    %c56_159 = arith.constant 56 : index
    %c0_160 = arith.constant 0 : index
    %488 = vector.load %arg11[%c56_159, %c0_160] : memref<64x512xf32, #tpu.memory_space<vmem>>, vector<8x512xf32>
    %cst_161 = arith.constant dense<0.000000e+00> : vector<8x512xf32>
    %489 = tpu.matmul %484, %266, %cst_161 {dimension_numbers = #tpu.dot_dimension_numbers<[1], [0], [0], [1], [0, 0, 1, 1], [], []>} : vector<8x128xf32>, vector<128x512xf32>, vector<8x512xf32> -> vector<8x512xf32>
    %490 = arith.addf %488, %489 : vector<8x512xf32>
    %491 = vector.extract_strided_slice %490 {offsets = [0, 0], sizes = [8, 128], strides = [1, 1]} : vector<8x512xf32> to vector<8x128xf32>
    %492 = arith.negf %491 : vector<8x128xf32>
    %493 = math.exp %492 : vector<8x128xf32>
    %cst_162 = arith.constant 1.000000e+00 : f32
    %494 = vector.broadcast %cst_162 : f32 to vector<8x128xf32>
    %495 = arith.addf %494, %493 : vector<8x128xf32>
    %496 = arith.divf %494, %495 : vector<8x128xf32>
    %497 = vector.extract_strided_slice %490 {offsets = [0, 128], sizes = [8, 128], strides = [1, 1]} : vector<8x512xf32> to vector<8x128xf32>
    %498 = arith.negf %497 : vector<8x128xf32>
    %499 = math.exp %498 : vector<8x128xf32>
    %cst_163 = arith.constant 1.000000e+00 : f32
    %500 = vector.broadcast %cst_163 : f32 to vector<8x128xf32>
    %501 = arith.addf %500, %499 : vector<8x128xf32>
    %502 = arith.divf %500, %501 : vector<8x128xf32>
    %503 = vector.extract_strided_slice %490 {offsets = [0, 256], sizes = [8, 128], strides = [1, 1]} : vector<8x512xf32> to vector<8x128xf32>
    %504 = math.tanh %503 : vector<8x128xf32>
    %505 = vector.extract_strided_slice %490 {offsets = [0, 384], sizes = [8, 128], strides = [1, 1]} : vector<8x512xf32> to vector<8x128xf32>
    %506 = arith.negf %505 : vector<8x128xf32>
    %507 = math.exp %506 : vector<8x128xf32>
    %cst_164 = arith.constant 1.000000e+00 : f32
    %508 = vector.broadcast %cst_164 : f32 to vector<8x128xf32>
    %509 = arith.addf %508, %507 : vector<8x128xf32>
    %510 = arith.divf %508, %509 : vector<8x128xf32>
    %511 = arith.mulf %502, %482 : vector<8x128xf32>
    %512 = arith.mulf %496, %504 : vector<8x128xf32>
    %513 = arith.addf %511, %512 : vector<8x128xf32>
    %514 = math.tanh %513 : vector<8x128xf32>
    %515 = arith.mulf %510, %514 : vector<8x128xf32>
    %c7 = arith.constant 7 : index
    %c0_165 = arith.constant 0 : index
    %c0_166 = arith.constant 0 : index
    %516 = vector.load %arg7[%c7, %c0_165, %c0_166] : memref<8x8x128xf32, #tpu.memory_space<vmem>>, vector<1x8x128xf32>
    %517 = vector.shape_cast %516 : vector<1x8x128xf32> to vector<8x128xf32>
    %518 = vector.shape_cast %515 : vector<8x128xf32> to vector<1x8x128xf32>
    tpu.vector_store %arg7[%c7, %c0_165, %c0_166], %518 {strides = array<i32>} : memref<8x8x128xf32, #tpu.memory_space<vmem>>, vector<1x8x128xf32>,
    %c1_167 = arith.constant 1 : index
    %c0_168 = arith.constant 0 : index
    %c0_169 = arith.constant 0 : index
    %519 = vector.load %arg8[%c1_167, %c0_168, %c0_169] : memref<2x8x128xf32, #tpu.memory_space<vmem>>, vector<1x8x128xf32>
    %520 = vector.shape_cast %519 : vector<1x8x128xf32> to vector<8x128xf32>
    %521 = vector.shape_cast %515 : vector<8x128xf32> to vector<1x8x128xf32>
    tpu.vector_store %arg8[%c1_167, %c0_168, %c0_169], %521 {strides = array<i32>} : memref<2x8x128xf32, #tpu.memory_space<vmem>>, vector<1x8x128xf32>,
    %c1_170 = arith.constant 1 : index
    %c0_171 = arith.constant 0 : index
    %c0_172 = arith.constant 0 : index
    %522 = vector.load %arg9[%c1_170, %c0_171, %c0_172] : memref<2x8x128xf32, #tpu.memory_space<vmem>>, vector<1x8x128xf32>
    %523 = vector.shape_cast %522 : vector<1x8x128xf32> to vector<8x128xf32>
    %524 = vector.shape_cast %513 : vector<8x128xf32> to vector<1x8x128xf32>
    tpu.vector_store %arg9[%c1_170, %c0_171, %c0_172], %524 {strides = array<i32>} : memref<2x8x128xf32, #tpu.memory_space<vmem>>, vector<1x8x128xf32>,
    return
  }
  func.func @transform_0(%arg0: i32, %arg1: i32) -> (i32, i32, i32) {
    %c0_i32 = arith.constant 0 : i32
    %c0_i32_0 = arith.constant 0 : i32
    return %arg1, %arg0, %c0_i32 : i32, i32, i32
  }
  func.func @transform_1(%arg0: i32, %arg1: i32) -> (i32, i32) {
    %c0_i32 = arith.constant 0 : i32
    %c0_i32_0 = arith.constant 0 : i32
    %c0_i32_1 = arith.constant 0 : i32
    return %c0_i32, %c0_i32_0 : i32, i32
  }
  func.func @transform_2(%arg0: i32, %arg1: i32) -> (i32, i32, i32) {
    %c0_i32 = arith.constant 0 : i32
    %c0_i32_0 = arith.constant 0 : i32
    %c0_i32_1 = arith.constant 0 : i32
    %c0_i32_2 = arith.constant 0 : i32
    return %c0_i32, %c0_i32_0, %c0_i32_1 : i32, i32, i32
  }
  func.func @transform_3(%arg0: i32, %arg1: i32) -> (i32, i32, i32) {
    %c0_i32 = arith.constant 0 : i32
    %c0_i32_0 = arith.constant 0 : i32
    %c0_i32_1 = arith.constant 0 : i32
    %c0_i32_2 = arith.constant 0 : i32
    return %c0_i32, %c0_i32_0, %c0_i32_1 : i32, i32, i32
  }
  func.func @transform_4(%arg0: i32, %arg1: i32) -> (i32, i32, i32) {
    %c0_i32 = arith.constant 0 : i32
    %c0_i32_0 = arith.constant 0 : i32
    %c0_i32_1 = arith.constant 0 : i32
    %c0_i32_2 = arith.constant 0 : i32
    return %c0_i32, %c0_i32_0, %c0_i32_1 : i32, i32, i32
  }
  func.func @transform_5(%arg0: i32, %arg1: i32) -> (i32, i32, i32) {
    %c0_i32 = arith.constant 0 : i32
    %c0_i32_0 = arith.constant 0 : i32
    return %arg1, %arg0, %c0_i32 : i32, i32, i32
  }
}

</mosaic_0001>

<bundles_post_ra>
// kernel: tpu_custom_call.1
= control target key start
LH: loop header
LB: loop body
LE: loop exit
PB: predicated region body
PF: predicated region fallthrough
CT: control target
= control target key end

     0   :  { %10 = vsyncpa [#allocation7], 0  ;;  %s6376_s0 = inlined_call_operand.hbm [shape: f32[8,8,128], index: 0, kind: input, shape index: {}]   ;;  %s6377_s1 = inlined_call_operand.hbm [shape: f32[128,512], index: 1, kind: input, shape index: {}]   ;;  %s6378_s2 = inlined_call_operand.hbm [shape: f32[1,128,512], index: 2, kind: input, shape index: {}]   ;;  %s6379_s3 = inlined_call_operand.hbm [shape: f32[2,128,512], index: 3, kind: input, shape index: {}]   ;;  %s6380_s4 = inlined_call_operand.hbm [shape: f32[2,1,512], index: 4, kind: input, shape index: {}]   ;;  %s6381_s5 = inlined_call_operand.hbm [shape: f32[8,8,128], index: 5, kind: output, shape index: {}]  }
   0x1   :  { %11 = vsyncpa [#allocation10], 0 }
   0x2   :  { %12 = vsyncpa [#allocation13], 0 }
   0x3   :  { %13 = vsyncpa [#allocation8], 0  ;;  %s4340_s18 = smov [#allocation9]  }
   0x4   :  { %s31_s19 = sshll.u32 %s4340_s18, 4  ;;  %s32_s19 = int_to_ptr.vmem [resolvable:$true] %s31_s19 }
   0x5   :  { %s4220_s20 = scalar_lea.vmem %s32_s19, 8192  ;;  %p4225_p1 = scmp.lt.s32.totalorder %s32_s19, %s32_s19 }
   0x6   :  { %p4221_p0 = scmp.ne.s32.totalorder %s32_s19, %s4220_s20  ;;  %p4226_p2 = scmp.lt.s32.totalorder %s4220_s20, %s4220_s20 }
   0x8   :  { %p4227_p3 = por %p4226_p2, %p4225_p1 }
   0xa   :  { %p4228_p4 = pnand %p4227_p3, %p4221_p0 }
   0xc   :  { %4231 = shalt.err (!%p4228_p4)
}
   0xd   :  { %s4341_s21 = smov 512   ;;  %s4342_s22 = smov 32  }
   0xe   :  { %37 = dma.hbm_to_vmem [thread:$0]  %s6377_s1, 8192, %s32_s19, [#allocation10], %s4341_s21, %s4341_s21, %s4342_s22  }
   0xf   :  { %s4343_s25 = smov [#allocation12]   ;;  %s4344_s27 = smov [#allocation6]  }
  0x10   :  { %s55_s26 = sshll.u32 %s4343_s25, 4  ;;  %s19_s28 = sshll.u32 %s4344_s27, 4  ;;  %s56_s26 = int_to_ptr.vmem [resolvable:$true] %s55_s26  ;;  %s20_s28 = int_to_ptr.vmem [resolvable:$true] %s19_s28 }
  0x11   :  { %s4240_s29 = scalar_lea.vmem %s56_s26, 16384  ;;  %p4245_p6 = scmp.lt.s32.totalorder %s56_s26, %s56_s26 }
  0x12   :  { %p4241_p5 = scmp.ne.s32.totalorder %s56_s26, %s4240_s29  ;;  %p4246_p7 = scmp.lt.s32.totalorder %s4240_s29, %s4240_s29 }
  0x14   :  { %p4247_p8 = por %p4246_p7, %p4245_p6 }
  0x16   :  { %p4248_p9 = pnand %p4247_p8, %p4241_p5 }
  0x18   :  { %4251 = shalt.err (!%p4248_p9)
}
  0x19   :  { %61 = dma.hbm_to_vmem [thread:$0]  %s6379_s3, 16384, %s56_s26, [#allocation13], %s4341_s21, %s4341_s21, %s4342_s22  }
  0x1a   :  { %s4260_s1 = scalar_lea.vmem %s20_s28, 1024  ;;  %p4265_p11 = scmp.lt.s32.totalorder %s20_s28, %s20_s28 }
  0x1b   :  { %p4261_p10 = scmp.ne.s32.totalorder %s20_s28, %s4260_s1  ;;  %p4266_p12 = scmp.lt.s32.totalorder %s4260_s1, %s4260_s1 }
  0x1d   :  { %p4267_p13 = por %p4266_p12, %p4265_p11 }
  0x1f   :  { %p4268_p0 = pnand %p4267_p13, %p4261_p10 }
  0x21   :  { %4271 = shalt.err (!%p4268_p0)
}
  0x22   :  { %s4345_s7 = smov 128   ;;  %s4346_s8 = smov 8  }
  0x23   :  { %25 = dma.hbm_to_vmem [thread:$0]  %s6376_s0, 1024, %s20_s28, [#allocation7], %s4345_s7, %s4345_s7, %s4346_s8  }
  0x24   :  { %s4347_s11 = smov [#allocation11]   ;;  %s4348_s3 = smov [#allocation14]  }
  0x25   :  { %s43_s12 = sshll.u32 %s4347_s11, 4  ;;  %s67_s13 = sshll.u32 %s4348_s3, 4  ;;  %s44_s12 = int_to_ptr.vmem [resolvable:$true] %s43_s12  ;;  %s68_s13 = int_to_ptr.vmem [resolvable:$true] %s67_s13 }
  0x26   :  { %s4280_s14 = scalar_lea.vmem %s44_s12, 8192  ;;  %p4285_p2 = scmp.lt.s32.totalorder %s44_s12, %s44_s12 }
  0x27   :  { %p4281_p1 = scmp.ne.s32.totalorder %s44_s12, %s4280_s14  ;;  %p4286_p3 = scmp.lt.s32.totalorder %s4280_s14, %s4280_s14 }
  0x29   :  { %p4287_p4 = por %p4286_p3, %p4285_p2 }
  0x2b   :  { %p4288_p5 = pnand %p4287_p4, %p4281_p1 }
  0x2d   :  { %4291 = shalt.err (!%p4288_p5)
}
  0x2e   :  { %49 = dma.hbm_to_vmem [thread:$0]  %s6378_s2, 8192, %s44_s12, [#allocation10], %s4341_s21, %s4341_s21, %s4342_s22  }
  0x2f   :  { %s4300_s0 = scalar_lea.vmem %s68_s13, 128  ;;  %p4305_p7 = scmp.lt.s32.totalorder %s68_s13, %s68_s13 }
  0x30   :  { %p4301_p6 = scmp.ne.s32.totalorder %s68_s13, %s4300_s0  ;;  %p4306_p8 = scmp.lt.s32.totalorder %s4300_s0, %s4300_s0 }
  0x32   :  { %p4307_p9 = por %p4306_p8, %p4305_p7 }
  0x34   :  { %p4308_p10 = pnand %p4307_p9, %p4301_p6 }
  0x36   :  { %4311 = shalt.err (!%p4308_p10)
}
  0x37   :  { %s4349_s17 = smov 64   ;;  %s4350_s18 = smov 4  }
  0x38   :  { %73 = dma.hbm_to_vmem [thread:$0]  %s6380_s4, 128, %s68_s13, [#allocation13], %s4349_s17, %s4349_s17, %s4350_s18  }
  0x39   :  { %4332 = dma.done.wait [#allocation7], 1024  }
  0x3a   :  { %4333 = vsyncadd [#allocation7], 4294966272 }
  0x3b   :  { %4334 = dma.done.wait [#allocation10], 16384  }
  0x3c   :  { %4335 = vsyncadd [#allocation10], 4294950912 }
  0x3d   :  { %4336 = dma.done.wait [#allocation13], 16512  }
  0x3e   :  { %4337 = vsyncadd [#allocation13], 4294950784  ;;  %v6382_v0 = vmov 0.0   ;;  %v166_v1 = vld [vmem:[#allocation9 + $0x1e8] sm:$0xff]  ;;  %v168_v2 = vld [vmem:[#allocation9 + $0x1f8] sm:$0xff]  ;;  %s4352_s2 = smov [#allocation15]  }
  0x3f   :  { %255 = vmatprep.mubr.f32.mxu0 %v6382_v0  ;;  %368 = vmatprep.mubr.f32.mxu1 %v6382_v0  ;;  %v165_v3 = vld [vmem:[#allocation9 + $0x1e0] sm:$0xff]  ;;  %v167_v4 = vld [vmem:[#allocation9 + $0x1f0] sm:$0xff]  ;;  %v162_v5 = vld [vmem:[#allocation9 + $0x1c8] sm:$0xff]  ;;  %s3753_s4 = sshll.u32 %s4352_s2, 4  ;;  %s3754_s4 = int_to_ptr.vmem [resolvable:$true] %s3753_s4 }
  0x40   :  { %191 = vmatprep.subr.mxu0 %v166_v1  ;;  %304 = vmatprep.subr.mxu1 %v168_v2  ;;  %v164_v6 = vld [vmem:[#allocation9 + $0x1d8] sm:$0xff]  ;;  %v161_v7 = vld [vmem:[#allocation9 + $0x1c0] sm:$0xff]  ;;  %v163_v8 = vld [vmem:[#allocation9 + $0x1d0] sm:$0xff]  ;;  %s4312_s21 = scalar_lea.vmem %s3754_s4, 1024  ;;  %p4317_p12 = scmp.lt.s32.totalorder %s3754_s4, %s3754_s4 }
  0x41   :  { %192 = vmatpush1.msra.mxu0 %v165_v3  ;;  %305 = vmatpush1.msra.mxu1 %v167_v4  ;;  %v158_v9 = vld [vmem:[#allocation9 + $0x1a8] sm:$0xff]  ;;  %v160_v10 = vld [vmem:[#allocation9 + $0x1b8] sm:$0xff]  ;;  %v157_v11 = vld [vmem:[#allocation9 + $0x1a0] sm:$0xff]  ;;  %p4313_p11 = scmp.ne.s32.totalorder %s3754_s4, %s4312_s21  ;;  %p4318_p13 = scmp.lt.s32.totalorder %s4312_s21, %s4312_s21 }
  0x42   :  { %193 = vmatprep.subr.mxu0 %v162_v5  ;;  %306 = vmatprep.subr.mxu1 %v164_v6  ;;  %v159_v12 = vld [vmem:[#allocation9 + $0x1b0] sm:$0xff]  ;;  %v154_v13 = vld [vmem:[#allocation9 + $0x188] sm:$0xff]  ;;  %v156_v14 = vld [vmem:[#allocation9 + $0x198] sm:$0xff] }
  0x43   :  { %194 = vmatpush1.msra.mxu0 %v161_v7  ;;  %307 = vmatpush1.msra.mxu1 %v163_v8  ;;  %v153_v15 = vld [vmem:[#allocation9 + $0x180] sm:$0xff]  ;;  %v155_v16 = vld [vmem:[#allocation9 + $0x190] sm:$0xff]  ;;  %v150_v17 = vld [vmem:[#allocation9 + $0x168] sm:$0xff]  ;;  %p4319_p0 = por %p4318_p13, %p4317_p12 }
  0x44   :  { %195 = vmatprep.subr.mxu0 %v158_v9  ;;  %308 = vmatprep.subr.mxu1 %v160_v10  ;;  %v152_v18 = vld [vmem:[#allocation9 + $0x178] sm:$0xff]  ;;  %v149_v19 = vld [vmem:[#allocation9 + $0x160] sm:$0xff]  ;;  %v151_v20 = vld [vmem:[#allocation9 + $0x170] sm:$0xff] }
  0x45   :  { %196 = vmatpush1.msra.mxu0 %v157_v11  ;;  %309 = vmatpush1.msra.mxu1 %v159_v12  ;;  %v146_v21 = vld [vmem:[#allocation9 + $0x148] sm:$0xff]  ;;  %v148_v22 = vld [vmem:[#allocation9 + $0x158] sm:$0xff]  ;;  %v145_v23 = vld [vmem:[#allocation9 + $0x140] sm:$0xff]  ;;  %p4320_p1 = pnand %p4319_p0, %p4313_p11 }
  0x46   :  { %197 = vmatprep.subr.mxu0 %v154_v13  ;;  %310 = vmatprep.subr.mxu1 %v156_v14  ;;  %v147_v24 = vld [vmem:[#allocation9 + $0x150] sm:$0xff]  ;;  %v142_v25 = vld [vmem:[#allocation9 + $0x128] sm:$0xff]  ;;  %v144_v26 = vld [vmem:[#allocation9 + $0x138] sm:$0xff] }
  0x47   :  { %198 = vmatpush1.msra.mxu0 %v153_v15  ;;  %311 = vmatpush1.msra.mxu1 %v155_v16  ;;  %v141_v27 = vld [vmem:[#allocation9 + $0x120] sm:$0xff]  ;;  %v143_v28 = vld [vmem:[#allocation9 + $0x130] sm:$0xff]  ;;  %v138_v29 = vld [vmem:[#allocation9 + $0x108] sm:$0xff] }
  0x48   :  { %199 = vmatprep.subr.mxu0 %v150_v17  ;;  %312 = vmatprep.subr.mxu1 %v152_v18  ;;  %v140_v30 = vld [vmem:[#allocation9 + $0x118] sm:$0xff]  ;;  %v137_v31 = vld [vmem:[#allocation9 + $0x100] sm:$0xff]  ;;  %v139_v32 = vld [vmem:[#allocation9 + $0x110] sm:$0xff] }
  0x49   :  { %200 = vmatpush1.msra.mxu0 %v149_v19  ;;  %313 = vmatpush1.msra.mxu1 %v151_v20  ;;  %v134_v33 = vld [vmem:[#allocation9 + $0xe8] sm:$0xff]  ;;  %v136_v34 = vld [vmem:[#allocation9 + $0xf8] sm:$0xff]  ;;  %v133_v35 = vld [vmem:[#allocation9 + $0xe0] sm:$0xff] }
  0x4a   :  { %201 = vmatprep.subr.mxu0 %v146_v21  ;;  %314 = vmatprep.subr.mxu1 %v148_v22  ;;  %v135_v36 = vld [vmem:[#allocation9 + $0xf0] sm:$0xff]  ;;  %v130_v37 = vld [vmem:[#allocation9 + $0xc8] sm:$0xff]  ;;  %v132_v38 = vld [vmem:[#allocation9 + $0xd8] sm:$0xff] }
  0x4b   :  { %202 = vmatpush1.msra.mxu0 %v145_v23  ;;  %315 = vmatpush1.msra.mxu1 %v147_v24  ;;  %v129_v39 = vld [vmem:[#allocation9 + $0xc0] sm:$0xff]  ;;  %v131_v40 = vld [vmem:[#allocation9 + $0xd0] sm:$0xff]  ;;  %v126_v41 = vld [vmem:[#allocation9 + $0xa8] sm:$0xff] }
  0x4c   :  { %203 = vmatprep.subr.mxu0 %v142_v25  ;;  %316 = vmatprep.subr.mxu1 %v144_v26  ;;  %v128_v42 = vld [vmem:[#allocation9 + $0xb8] sm:$0xff]  ;;  %v125_v43 = vld [vmem:[#allocation9 + $0xa0] sm:$0xff]  ;;  %v127_v44 = vld [vmem:[#allocation9 + $0xb0] sm:$0xff] }
  0x4d   :  { %204 = vmatpush1.msra.mxu0 %v141_v27  ;;  %317 = vmatpush1.msra.mxu1 %v143_v28  ;;  %v122_v45 = vld [vmem:[#allocation9 + $0x88] sm:$0xff]  ;;  %v124_v46 = vld [vmem:[#allocation9 + $0x98] sm:$0xff]  ;;  %v121_v47 = vld [vmem:[#allocation9 + $0x80] sm:$0xff] }
  0x4e   :  { %205 = vmatprep.subr.mxu0 %v138_v29  ;;  %318 = vmatprep.subr.mxu1 %v140_v30  ;;  %v123_v48 = vld [vmem:[#allocation9 + $0x90] sm:$0xff]  ;;  %v118_v49 = vld [vmem:[#allocation9 + $0x68] sm:$0xff]  ;;  %v120_v50 = vld [vmem:[#allocation9 + $0x78] sm:$0xff] }
  0x4f   :  { %206 = vmatpush1.msra.mxu0 %v137_v31  ;;  %319 = vmatpush1.msra.mxu1 %v139_v32  ;;  %v117_v51 = vld [vmem:[#allocation9 + $0x60] sm:$0xff]  ;;  %v119_v52 = vld [vmem:[#allocation9 + $0x70] sm:$0xff]  ;;  %v114_v53 = vld [vmem:[#allocation9 + $0x48] sm:$0xff] }
  0x50   :  { %207 = vmatprep.subr.mxu0 %v134_v33  ;;  %320 = vmatprep.subr.mxu1 %v136_v34  ;;  %v116_v54 = vld [vmem:[#allocation9 + $0x58] sm:$0xff]  ;;  %v113_v55 = vld [vmem:[#allocation9 + $0x40] sm:$0xff]  ;;  %v115_v56 = vld [vmem:[#allocation9 + $0x50] sm:$0xff] }
  0x51   :  { %208 = vmatpush1.msra.mxu0 %v133_v35  ;;  %321 = vmatpush1.msra.mxu1 %v135_v36  ;;  %v110_v57 = vld [vmem:[#allocation9 + $0x28] sm:$0xff]  ;;  %v112_v58 = vld [vmem:[#allocation9 + $0x38] sm:$0xff]  ;;  %v109_v59 = vld [vmem:[#allocation9 + $0x20] sm:$0xff] }
  0x52   :  { %209 = vmatprep.subr.mxu0 %v130_v37  ;;  %322 = vmatprep.subr.mxu1 %v132_v38  ;;  %v111_v60 = vld [vmem:[#allocation9 + $0x30] sm:$0xff]  ;;  %v106_v61 = vld [vmem:[#allocation9 + $0x8] sm:$0xff]  ;;  %v108_v62 = vld [vmem:[#allocation9 + $0x18] sm:$0xff] }
  0x53   :  { %210 = vmatpush1.msra.mxu0 %v129_v39  ;;  %323 = vmatpush1.msra.mxu1 %v131_v40  ;;  %v105_v63 = vld [vmem:[#allocation9] sm:$0xff]  ;;  %v107_v1 = vld [vmem:[#allocation9 + $0x10] sm:$0xff]  ;;  %v4412_v3 = vld [vmem:[#allocation12 + $0x1e8] sm:$0xff] }
  0x54   :  { %211 = vmatprep.subr.mxu0 %v126_v41  ;;  %324 = vmatprep.subr.mxu1 %v128_v42  ;;  %v97_v2 = vld [vmem:[#allocation6] sm:$0xff]  ;;  %6588 = vst [vmem:[#allocation20_spill] sm:$0xff] %v4412_v3  ;;  %v4414_v4 = vld [vmem:[#allocation12 + $0x1f8] sm:$0xff]  ;;  %v4418_v6 = vld [vmem:[#allocation12 + $0x1f0] sm:$0xff] }
  0x55   :  { %212 = vmatpush1.msra.mxu0 %v125_v43  ;;  %325 = vmatpush1.msra.mxu1 %v127_v44  ;;  %6589 = vst [vmem:[#allocation21_spill] sm:$0xff] %v4414_v4  ;;  %v4416_v5 = vld [vmem:[#allocation12 + $0x1e0] sm:$0xff]  ;;  %v4420_v7 = vld [vmem:[#allocation12 + $0x1c8] sm:$0xff]  ;;  %v4422_v8 = vld [vmem:[#allocation12 + $0x1d8] sm:$0xff] }
  0x56   :  { %213 = vmatprep.subr.mxu0 %v122_v45  ;;  %326 = vmatprep.subr.mxu1 %v124_v46  ;;  %v4428_v9 = vld [vmem:[#allocation12 + $0x1c0] sm:$0xff]  ;;  %v4430_v10 = vld [vmem:[#allocation12 + $0x1d0] sm:$0xff]  ;;  %v98_v11 = vld [vmem:[#allocation6 + $0x8] sm:$0xff] }
  0x57   :  { %214 = vmatpush1.msra.mxu0 %v121_v47  ;;  %327 = vmatpush1.msra.mxu1 %v123_v48  ;;  %v4436_v12 = vld [vmem:[#allocation12 + $0x1a8] sm:$0xff]  ;;  %v4438_v13 = vld [vmem:[#allocation12 + $0x1b8] sm:$0xff]  ;;  %v4442_v14 = vld [vmem:[#allocation12 + $0x1a0] sm:$0xff] }
  0x58   :  { %215 = vmatprep.subr.mxu0 %v118_v49  ;;  %328 = vmatprep.subr.mxu1 %v120_v50  ;;  %v4444_v15 = vld [vmem:[#allocation12 + $0x1b0] sm:$0xff]  ;;  %v4446_v16 = vld [vmem:[#allocation12 + $0x188] sm:$0xff]  ;;  %v4448_v17 = vld [vmem:[#allocation12 + $0x198] sm:$0xff] }
  0x59   :  { %216 = vmatpush1.msra.mxu0 %v117_v51  ;;  %329 = vmatpush1.msra.mxu1 %v119_v52  ;;  %v4454_v18 = vld [vmem:[#allocation12 + $0x180] sm:$0xff]  ;;  %v4456_v19 = vld [vmem:[#allocation12 + $0x190] sm:$0xff]  ;;  %v4462_v21 = vld [vmem:[#allocation12 + $0x168] sm:$0xff] }
  0x5a   :  { %217 = vmatprep.subr.mxu0 %v114_v53  ;;  %330 = vmatprep.subr.mxu1 %v116_v54  ;;  %v99_v20 = vld [vmem:[#allocation6 + $0x10] sm:$0xff]  ;;  %v4464_v22 = vld [vmem:[#allocation12 + $0x178] sm:$0xff]  ;;  %v4468_v23 = vld [vmem:[#allocation12 + $0x160] sm:$0xff] }
  0x5b   :  { %218 = vmatpush1.msra.mxu0 %v113_v55  ;;  %331 = vmatpush1.msra.mxu1 %v115_v56  ;;  %v4470_v24 = vld [vmem:[#allocation12 + $0x170] sm:$0xff]  ;;  %v4472_v25 = vld [vmem:[#allocation12 + $0x148] sm:$0xff]  ;;  %v4474_v26 = vld [vmem:[#allocation12 + $0x158] sm:$0xff] }
  0x5c   :  { %219 = vmatprep.subr.mxu0 %v110_v57  ;;  %332 = vmatprep.subr.mxu1 %v112_v58  ;;  %v4480_v27 = vld [vmem:[#allocation12 + $0x140] sm:$0xff]  ;;  %v4482_v28 = vld [vmem:[#allocation12 + $0x150] sm:$0xff]  ;;  %v100_v29 = vld [vmem:[#allocation6 + $0x18] sm:$0xff] }
  0x5d   :  { %220 = vmatpush1.msra.mxu0 %v109_v59  ;;  %333 = vmatpush1.msra.mxu1 %v111_v60  ;;  %v4488_v30 = vld [vmem:[#allocation12 + $0x128] sm:$0xff]  ;;  %v4490_v31 = vld [vmem:[#allocation12 + $0x138] sm:$0xff]  ;;  %v4494_v32 = vld [vmem:[#allocation12 + $0x120] sm:$0xff] }
  0x5e   :  { %221 = vmatprep.subr.mxu0 %v106_v61  ;;  %334 = vmatprep.subr.mxu1 %v108_v62  ;;  %v4496_v33 = vld [vmem:[#allocation12 + $0x130] sm:$0xff]  ;;  %v4498_v34 = vld [vmem:[#allocation12 + $0x108] sm:$0xff]  ;;  %v4500_v35 = vld [vmem:[#allocation12 + $0x118] sm:$0xff] }
  0x5f   :  { %222 = vmatpush1.msra.mxu0 %v105_v63  ;;  %335 = vmatpush1.msra.mxu1 %v107_v1  ;;  %v4506_v36 = vld [vmem:[#allocation12 + $0x100] sm:$0xff]  ;;  %v4508_v37 = vld [vmem:[#allocation12 + $0x110] sm:$0xff]  ;;  %v4514_v39 = vld [vmem:[#allocation12 + $0xe8] sm:$0xff] }
  0x60   :  { %256 = vmatmul.mubr.f32.vlgmr.msra.gmra.mxu0 %v97_v2  ;;  %369 = vmatmul.mubr.f32.vlgmr.msra.gmra.mxu1 %v97_v2  ;;  %v101_v38 = vld [vmem:[#allocation6 + $0x20] sm:$0xff]  ;;  %v4516_v40 = vld [vmem:[#allocation12 + $0xf8] sm:$0xff]  ;;  %v4522_v42 = vld [vmem:[#allocation12 + $0xf0] sm:$0xff] }
  0x61   :  { %519 = vmatprep.subr.mxu0 %v4412_v3  ;;  %590 = vmatprep.subr.mxu1 %v4414_v4  ;;  %v4520_v41 = vld [vmem:[#allocation12 + $0xe0] sm:$0xff]  ;;  %v4524_v43 = vld [vmem:[#allocation12 + $0xc8] sm:$0xff]  ;;  %v4526_v44 = vld [vmem:[#allocation12 + $0xd8] sm:$0xff] }
  0x62   :  { %520 = vmatpush1.msra.mxu0 %v4416_v5  ;;  %591 = vmatpush1.msra.mxu1 %v4418_v6  ;;  %v4532_v45 = vld [vmem:[#allocation12 + $0xc0] sm:$0xff]  ;;  %v4534_v46 = vld [vmem:[#allocation12 + $0xd0] sm:$0xff]  ;;  %v102_v47 = vld [vmem:[#allocation6 + $0x28] sm:$0xff] }
  0x63   :  { %521 = vmatprep.subr.mxu0 %v4420_v7  ;;  %592 = vmatprep.subr.mxu1 %v4422_v8  ;;  %v4540_v48 = vld [vmem:[#allocation12 + $0xa8] sm:$0xff]  ;;  %v4542_v49 = vld [vmem:[#allocation12 + $0xb8] sm:$0xff]  ;;  %v4546_v50 = vld [vmem:[#allocation12 + $0xa0] sm:$0xff] }
  0x64   :  { %261 = vmatprep.mubr.f32.mxu0 %v6382_v0  ;;  %374 = vmatprep.mubr.f32.mxu1 %v6382_v0  ;;  %v4548_v51 = vld [vmem:[#allocation12 + $0xb0] sm:$0xff]  ;;  %v4550_v52 = vld [vmem:[#allocation12 + $0x88] sm:$0xff]  ;;  %v4552_v53 = vld [vmem:[#allocation12 + $0x98] sm:$0xff] }
  0x65   :  { %522 = vmatpush1.msra.mxu0 %v4428_v9  ;;  %593 = vmatpush1.msra.mxu1 %v4430_v10  ;;  %6590 = vst [vmem:[#allocation22_spill] sm:$0xff] %v4548_v51  ;;  %6591 = vst [vmem:[#allocation23_spill] sm:$0xff] %v4550_v52  ;;  %v4558_v54 = vld [vmem:[#allocation12 + $0x80] sm:$0xff]  ;;  %v4560_v55 = vld [vmem:[#allocation12 + $0x90] sm:$0xff] }
  0x66   :  { %262 = vmatmul.mubr.f32.gmra.mxu0 %v98_v11  ;;  %375 = vmatmul.mubr.f32.gmra.mxu1 %v98_v11  ;;  %6592 = vst [vmem:[#allocation24_spill] sm:$0xff] %v4552_v53  ;;  %6593 = vst [vmem:[#allocation25_spill] sm:$0xff] %v4558_v54  ;;  %v103_v56 = vld [vmem:[#allocation6 + $0x30] sm:$0xff]  ;;  %v4566_v57 = vld [vmem:[#allocation12 + $0x68] sm:$0xff] }
  0x67   :  { %523 = vmatprep.subr.mxu0 %v4436_v12  ;;  %594 = vmatprep.subr.mxu1 %v4438_v13  ;;  %6594 = vst [vmem:[#allocation26_spill] sm:$0xff] %v4560_v55  ;;  %6595 = vst [vmem:[#allocation27_spill] sm:$0xff] %v4566_v57  ;;  %v4568_v58 = vld [vmem:[#allocation12 + $0x78] sm:$0xff]  ;;  %v4572_v59 = vld [vmem:[#allocation12 + $0x60] sm:$0xff] }
  0x68   :  { %524 = vmatpush1.msra.mxu0 %v4442_v14  ;;  %595 = vmatpush1.msra.mxu1 %v4444_v15  ;;  %6596 = vst [vmem:[#allocation28_spill] sm:$0xff] %v4568_v58  ;;  %6597 = vst [vmem:[#allocation29_spill] sm:$0xff] %v4572_v59  ;;  %v4574_v60 = vld [vmem:[#allocation12 + $0x70] sm:$0xff]  ;;  %v4576_v61 = vld [vmem:[#allocation12 + $0x48] sm:$0xff] }
  0x69   :  { %525 = vmatprep.subr.mxu0 %v4446_v16  ;;  %596 = vmatprep.subr.mxu1 %v4448_v17  ;;  %6598 = vst [vmem:[#allocation30_spill] sm:$0xff] %v4574_v60  ;;  %6599 = vst [vmem:[#allocation31_spill] sm:$0xff] %v4576_v61  ;;  %v4578_v62 = vld [vmem:[#allocation12 + $0x58] sm:$0xff]  ;;  %v4584_v63 = vld [vmem:[#allocation12 + $0x40] sm:$0xff] }
  0x6a   :  { %267 = vmatprep.mubr.f32.mxu0 %v6382_v0  ;;  %380 = vmatprep.mubr.f32.mxu1 %v6382_v0  ;;  %6600 = vst [vmem:[#allocation32_spill] sm:$0xff] %v4578_v62  ;;  %6601 = vst [vmem:[#allocation33_spill] sm:$0xff] %v4584_v63  ;;  %v4586_v1 = vld [vmem:[#allocation12 + $0x50] sm:$0xff]  ;;  %v104_v2 = vld [vmem:[#allocation6 + $0x38] sm:$0xff] }
  0x6b   :  { %526 = vmatpush1.msra.mxu0 %v4454_v18  ;;  %597 = vmatpush1.msra.mxu1 %v4456_v19  ;;  %6602 = vst [vmem:[#allocation34_spill] sm:$0xff] %v4586_v1  ;;  %v4592_v11 = vld [vmem:[#allocation12 + $0x28] sm:$0xff] }
  0x6c   :  { %268 = vmatmul.mubr.f32.gmra.mxu0 %v99_v20  ;;  %381 = vmatmul.mubr.f32.gmra.mxu1 %v99_v20  ;;  %6603 = vst [vmem:[#allocation35_spill] sm:$0xff] %v4592_v11  ;;  %v4594_v20 = vld [vmem:[#allocation12 + $0x38] sm:$0xff] }
  0x6d   :  { %527 = vmatprep.subr.mxu0 %v4462_v21  ;;  %598 = vmatprep.subr.mxu1 %v4464_v22  ;;  %6604 = vst [vmem:[#allocation36_spill] sm:$0xff] %v4594_v20 }
  0x6e   :  { %528 = vmatpush1.msra.mxu0 %v4468_v23  ;;  %599 = vmatpush1.msra.mxu1 %v4470_v24 }
  0x6f   :  { %529 = vmatprep.subr.mxu0 %v4472_v25  ;;  %600 = vmatprep.subr.mxu1 %v4474_v26 }
  0x70   :  { %273 = vmatprep.mubr.f32.mxu0 %v6382_v0  ;;  %386 = vmatprep.mubr.f32.mxu1 %v6382_v0 }
  0x71   :  { %530 = vmatpush1.msra.mxu0 %v4480_v27  ;;  %601 = vmatpush1.msra.mxu1 %v4482_v28 }
  0x72   :  { %274 = vmatmul.mubr.f32.gmra.mxu0 %v100_v29  ;;  %387 = vmatmul.mubr.f32.gmra.mxu1 %v100_v29  ;;  %v4598_v29 = vld [vmem:[#allocation12 + $0x20] sm:$0xff] }
  0x73   :  { %531 = vmatprep.subr.mxu0 %v4488_v30  ;;  %602 = vmatprep.subr.mxu1 %v4490_v31  ;;  %6605 = vst [vmem:[#allocation37_spill] sm:$0xff] %v4598_v29 }
  0x74   :  { %532 = vmatpush1.msra.mxu0 %v4494_v32  ;;  %603 = vmatpush1.msra.mxu1 %v4496_v33 }
  0x75   :  { %533 = vmatprep.subr.mxu0 %v4498_v34  ;;  %604 = vmatprep.subr.mxu1 %v4500_v35 }
  0x76   :  { %279 = vmatprep.mubr.f32.mxu0 %v6382_v0  ;;  %392 = vmatprep.mubr.f32.mxu1 %v6382_v0 }
  0x77   :  { %534 = vmatpush1.msra.mxu0 %v4506_v36  ;;  %605 = vmatpush1.msra.mxu1 %v4508_v37 }
  0x78   :  { %280 = vmatmul.mubr.f32.gmra.mxu0 %v101_v38  ;;  %393 = vmatmul.mubr.f32.gmra.mxu1 %v101_v38  ;;  %v4600_v38 = vld [vmem:[#allocation12 + $0x30] sm:$0xff] }
  0x79   :  { %535 = vmatprep.subr.mxu0 %v4514_v39  ;;  %606 = vmatprep.subr.mxu1 %v4516_v40  ;;  %6606 = vst [vmem:[#allocation38_spill] sm:$0xff] %v4600_v38 }
  0x7a   :  { %536 = vmatpush1.msra.mxu0 %v4520_v41  ;;  %607 = vmatpush1.msra.mxu1 %v4522_v42 }
  0x7b   :  { %537 = vmatprep.subr.mxu0 %v4524_v43  ;;  %608 = vmatprep.subr.mxu1 %v4526_v44 }
  0x7c   :  { %285 = vmatprep.mubr.f32.mxu0 %v6382_v0  ;;  %398 = vmatprep.mubr.f32.mxu1 %v6382_v0 }
  0x7d   :  { %538 = vmatpush1.msra.mxu0 %v4532_v45  ;;  %609 = vmatpush1.msra.mxu1 %v4534_v46 }
  0x7e   :  { %286 = vmatmul.mubr.f32.gmra.mxu0 %v102_v47  ;;  %399 = vmatmul.mubr.f32.gmra.mxu1 %v102_v47  ;;  %v4602_v47 = vld [vmem:[#allocation12 + $0x8] sm:$0xff] }
  0x7f   :  { %539 = vmatprep.subr.mxu0 %v4540_v48  ;;  %610 = vmatprep.subr.mxu1 %v4542_v49  ;;  %6607 = vst [vmem:[#allocation39_spill] sm:$0xff] %v4602_v47 }
  0x80   :  { %540 = vmatpush1.msra.mxu0 %v4546_v50  ;;  %611 = vmatpush1.msra.mxu1 %v4548_v51 }
  0x81   :  { %541 = vmatprep.subr.mxu0 %v4550_v52  ;;  %612 = vmatprep.subr.mxu1 %v4552_v53 }
  0x82   :  { %291 = vmatprep.mubr.f32.mxu0 %v6382_v0  ;;  %404 = vmatprep.mubr.f32.mxu1 %v6382_v0 }
  0x83   :  { %542 = vmatpush1.msra.mxu0 %v4558_v54  ;;  %613 = vmatpush1.msra.mxu1 %v4560_v55 }
  0x84   :  { %292 = vmatmul.mubr.f32.gmra.mxu0 %v103_v56  ;;  %405 = vmatmul.mubr.f32.gmra.mxu1 %v103_v56  ;;  %v4604_v56 = vld [vmem:[#allocation12 + $0x18] sm:$0xff] }
  0x85   :  { %543 = vmatprep.subr.mxu0 %v4566_v57  ;;  %614 = vmatprep.subr.mxu1 %v4568_v58  ;;  %6608 = vst [vmem:[#allocation40_spill] sm:$0xff] %v4604_v56 }
  0x86   :  { %544 = vmatpush1.msra.mxu0 %v4572_v59  ;;  %615 = vmatpush1.msra.mxu1 %v4574_v60 }
  0x87   :  { %545 = vmatprep.subr.mxu0 %v4576_v61  ;;  %616 = vmatprep.subr.mxu1 %v4578_v62 }
  0x88   :  { %297 = vmatprep.mubr.f32.mxu0 %v6382_v0  ;;  %410 = vmatprep.mubr.f32.mxu1 %v6382_v0  ;;  %v4608_v0 = vld [vmem:[#allocation12] sm:$0xff] }
  0x89   :  { %546 = vmatpush1.msra.mxu0 %v4584_v63  ;;  %617 = vmatpush1.msra.mxu1 %v4586_v1  ;;  %6609 = vst [vmem:[#allocation41_spill] sm:$0xff] %v4608_v0  ;;  %v4612_v1 = vld [vmem:[#allocation12 + $0x10] sm:$0xff] }
  0x8a   :  { %298 = vmatmul.mubr.f32.gmra.mxu0 %v104_v2  ;;  %411 = vmatmul.mubr.f32.gmra.mxu1 %v104_v2  ;;  %6610 = vst [vmem:[#allocation42_spill] sm:$0xff] %v4612_v1  ;;  %v6611_v2 = vmov 0.0  }
  0x8b   :  { %547 = vmatprep.subr.mxu0 %v4592_v11  ;;  %618 = vmatprep.subr.mxu1 %v4594_v20 }
  0x8c   :  { %548 = vmatpush1.msra.mxu0 %v4598_v29  ;;  %619 = vmatpush1.msra.mxu1 %v4600_v38 }
  0x8d   :  { %549 = vmatprep.subr.mxu0 %v4602_v47  ;;  %620 = vmatprep.subr.mxu1 %v4604_v56 }
  0x8e   :  { %550 = vmatpush1.msra.mxu0 %v4608_v0  ;;  %583 = vmatprep.mubr.f32.mxu0 %v6611_v2 }
  0x8f   :  { %621 = vmatpush1.msra.mxu1 %v4612_v1  ;;  %654 = vmatprep.mubr.f32.mxu1 %v6611_v2 }
  0x90   :  { %584 = vmatmul.mubr.f32.vlgmr.msra.gmra.mxu0 %v6611_v2  ;;  %655 = vmatmul.mubr.f32.vlgmr.msra.gmra.mxu1 %v6611_v2 }
  0x91   :  { %694 = vmatprep.subr.mxu0 %v4412_v3  ;;  %765 = vmatprep.subr.mxu1 %v4414_v4 }
  0x92   :  { %695 = vmatpush1.msra.mxu0 %v4416_v5  ;;  %766 = vmatpush1.msra.mxu1 %v4418_v6 }
  0x93   :  { %696 = vmatprep.subr.mxu0 %v4420_v7  ;;  %767 = vmatprep.subr.mxu1 %v4422_v8 }
  0x94   :  { %697 = vmatpush1.msra.mxu0 %v4428_v9  ;;  %768 = vmatpush1.msra.mxu1 %v4430_v10 }
  0x95   :  { %698 = vmatprep.subr.mxu0 %v4436_v12  ;;  %769 = vmatprep.subr.mxu1 %v4438_v13 }
  0x96   :  { %699 = vmatpush1.msra.mxu0 %v4442_v14  ;;  %770 = vmatpush1.msra.mxu1 %v4444_v15 }
  0x97   :  { %700 = vmatprep.subr.mxu0 %v4446_v16  ;;  %771 = vmatprep.subr.mxu1 %v4448_v17 }
  0x98   :  { %701 = vmatpush1.msra.mxu0 %v4454_v18  ;;  %772 = vmatpush1.msra.mxu1 %v4456_v19 }
  0x99   :  { %702 = vmatprep.subr.mxu0 %v4462_v21  ;;  %773 = vmatprep.subr.mxu1 %v4464_v22 }
  0x9a   :  { %703 = vmatpush1.msra.mxu0 %v4468_v23  ;;  %774 = vmatpush1.msra.mxu1 %v4470_v24 }
  0x9b   :  { %704 = vmatprep.subr.mxu0 %v4472_v25  ;;  %775 = vmatprep.subr.mxu1 %v4474_v26 }
  0x9c   :  { %705 = vmatpush1.msra.mxu0 %v4480_v27  ;;  %776 = vmatpush1.msra.mxu1 %v4482_v28 }
  0x9d   :  { %706 = vmatprep.subr.mxu0 %v4488_v30  ;;  %777 = vmatprep.subr.mxu1 %v4490_v31 }
  0x9e   :  { %707 = vmatpush1.msra.mxu0 %v4494_v32  ;;  %778 = vmatpush1.msra.mxu1 %v4496_v33 }
  0x9f   :  { %708 = vmatprep.subr.mxu0 %v4498_v34  ;;  %779 = vmatprep.subr.mxu1 %v4500_v35 }
  0xa0   :  { %709 = vmatpush1.msra.mxu0 %v4506_v36  ;;  %780 = vmatpush1.msra.mxu1 %v4508_v37 }
  0xa1   :  { %710 = vmatprep.subr.mxu0 %v4514_v39  ;;  %781 = vmatprep.subr.mxu1 %v4516_v40 }
  0xa2   :  { %711 = vmatpush1.msra.mxu0 %v4520_v41  ;;  %782 = vmatpush1.msra.mxu1 %v4522_v42 }
  0xa3   :  { %712 = vmatprep.subr.mxu0 %v4524_v43  ;;  %783 = vmatprep.subr.mxu1 %v4526_v44 }
  0xa4   :  { %713 = vmatpush1.msra.mxu0 %v4532_v45  ;;  %784 = vmatpush1.msra.mxu1 %v4534_v46 }
  0xa5   :  { %714 = vmatprep.subr.mxu0 %v4540_v48  ;;  %785 = vmatprep.subr.mxu1 %v4542_v49 }
  0xa6   :  { %715 = vmatpush1.msra.mxu0 %v4546_v50  ;;  %786 = vmatpush1.msra.mxu1 %v4548_v51 }
  0xa7   :  { %716 = vmatprep.subr.mxu0 %v4550_v52  ;;  %787 = vmatprep.subr.mxu1 %v4552_v53  ;;  %v6612_v52 = vld [vmem:[#allocation34_spill] sm:$0xff] }
  0xa8   :  { %717 = vmatpush1.msra.mxu0 %v4558_v54  ;;  %788 = vmatpush1.msra.mxu1 %v4560_v55 }
  0xa9   :  { %718 = vmatprep.subr.mxu0 %v4566_v57  ;;  %789 = vmatprep.subr.mxu1 %v4568_v58 }
  0xaa   :  { %719 = vmatpush1.msra.mxu0 %v4572_v59  ;;  %790 = vmatpush1.msra.mxu1 %v4574_v60 }
  0xab   :  { %720 = vmatprep.subr.mxu0 %v4576_v61  ;;  %791 = vmatprep.subr.mxu1 %v4578_v62 }
  0xac   :  { %721 = vmatpush1.msra.mxu0 %v4584_v63  ;;  %792 = vmatpush1.msra.mxu1 %v6612_v52 }
  0xad   :  { %722 = vmatprep.subr.mxu0 %v4592_v11  ;;  %793 = vmatprep.subr.mxu1 %v4594_v20  ;;  %v171_v20 = vlaneseq  ;;  %v169_v11 = vld [vmem:[#allocation14] sm:$0xf] }
  0xae   :  { %723 = vmatpush1.msra.mxu0 %v4598_v29  ;;  %794 = vmatpush1.msra.mxu1 %v4600_v38 }
  0xaf   :  { %724 = vmatprep.subr.mxu0 %v4602_v47  ;;  %795 = vmatprep.subr.mxu1 %v4604_v56  ;;  %v4690_v29 = vshrl.u32 %v171_v20, 7 }
  0xb0   :  { %725 = vmatpush1.msra.mxu0 %v4608_v0  ;;  %758 = vmatprep.mubr.f32.mxu0 %v6611_v2 }
  0xb1   :  { %796 = vmatpush1.msra.mxu1 %v4612_v1  ;;  %829 = vmatprep.mubr.f32.mxu1 %v6611_v2  ;;  %6613 = vst [vmem:[#allocation43_spill] sm:$0xff] %v4690_v29  ;;  %v6421_v56 = vsub.s32 0, %v4690_v29  ;;  %v6424_v0 = vsub.s32 2, %v4690_v29 }
  0xb2   :  { %869 = vmatprep.subr.mxu0 %v4412_v3  ;;  %940 = vmatprep.subr.mxu1 %v4414_v4  ;;  %v6431_v3 = vsub.s32 1, %v4690_v29  ;;  %v6432_v4 = vsub.s32 3, %v4690_v29 }
  0xb3   :  { %v174_v20 = vrot.slane %v169_v11, %v6421_v56  ;;  %v4708_v2 = vrot.slane %v169_v11, %v6424_v0 }
  0xb4   :  { %v178_v61 = vrot.slane %v169_v11, %v6431_v3  ;;  %v4714_v60 = vrot.slane %v169_v11, %v6432_v4 }
 0x120   :  { %v4692_v38 = vpop.f32.mrf.mxu0  ;;  %v4694_v47 = vpop.f32.mrf.mxu1 }
 0x122   :  { %v4698_v52 = vpop.f32.mrf.mxu0  ;;  %v4700_v1 = vpop.f32.mrf.mxu1 }
 0x126   :  { %v263_v63 = vpop.f32.mrf.mxu0  ;;  %v376_v62 = vpop.f32.mrf.mxu1 }
 0x127   :  { %v4716_v59 = vadd.f32 %v263_v63, %v174_v20  ;;  %v4719_v58 = vadd.f32 %v376_v62, %v4708_v2 }
 0x128   :  { %v265_v57 = vpop.f32.mrf.mxu0  ;;  %v378_v56 = vpop.f32.mrf.mxu1 }
 0x129   :  { %6614 = vst [vmem:[#allocation44_spill] sm:$0xff] %v4719_v58  ;;  %v4721_v55 = vadd.f32 %v265_v57, %v178_v61  ;;  %v4724_v0 = vadd.f32 %v378_v56, %v4714_v60 }
 0x12b   :  { %6615 = vst [vmem:[#allocation45_spill] sm:$0xff] %v4721_v55  ;;  %6616 = vst [vmem:[#allocation46_spill] sm:$0xff] %v4724_v0 }
 0x12c   :  { %v269_v54 = vpop.f32.mrf.mxu0  ;;  %v382_v53 = vpop.f32.mrf.mxu1 }
 0x12d   :  { %v4726_v51 = vadd.f32 %v269_v54, %v174_v20  ;;  %v4729_v3 = vadd.f32 %v382_v53, %v4708_v2 }
 0x12e   :  { %v271_v11 = vpop.f32.mrf.mxu0  ;;  %v384_v63 = vpop.f32.mrf.mxu1 }
 0x12f   :  { %6617 = vst [vmem:[#allocation47_spill] sm:$0xff] %v4726_v51  ;;  %6618 = vst [vmem:[#allocation48_spill] sm:$0xff] %v4729_v3  ;;  %v4731_v4 = vadd.f32 %v271_v11, %v178_v61  ;;  %v4734_v62 = vadd.f32 %v384_v63, %v4714_v60 }
 0x131   :  { %6619 = vst [vmem:[#allocation49_spill] sm:$0xff] %v4731_v4  ;;  %6620 = vst [vmem:[#allocation50_spill] sm:$0xff] %v4734_v62 }
 0x132   :  { %v275_v29 = vpop.f32.mrf.mxu0  ;;  %v388_v57 = vpop.f32.mrf.mxu1 }
 0x133   :  { %v4736_v58 = vadd.f32 %v275_v29, %v174_v20  ;;  %v4739_v56 = vadd.f32 %v388_v57, %v4708_v2 }
 0x134   :  { %v277_v0 = vpop.f32.mrf.mxu0  ;;  %v390_v54 = vpop.f32.mrf.mxu1 }
 0x135   :  { %6621 = vst [vmem:[#allocation51_spill] sm:$0xff] %v4736_v58  ;;  %6622 = vst [vmem:[#allocation52_spill] sm:$0xff] %v4739_v56  ;;  %v4741_v51 = vadd.f32 %v277_v0, %v178_v61  ;;  %v4744_v53 = vadd.f32 %v390_v54, %v4714_v60 }
 0x137   :  { %6623 = vst [vmem:[#allocation53_spill] sm:$0xff] %v4741_v51  ;;  %6624 = vst [vmem:[#allocation54_spill] sm:$0xff] %v4744_v53 }
 0x138   :  { %v281_v3 = vpop.f32.mrf.mxu0  ;;  %v394_v11 = vpop.f32.mrf.mxu1 }
 0x139   :  { %v4746_v4 = vadd.f32 %v281_v3, %v174_v20  ;;  %v4749_v63 = vadd.f32 %v394_v11, %v4708_v2 }
 0x13a   :  { %v283_v62 = vpop.f32.mrf.mxu0  ;;  %v396_v29 = vpop.f32.mrf.mxu1 }
 0x13b   :  { %6625 = vst [vmem:[#allocation55_spill] sm:$0xff] %v4746_v4  ;;  %6626 = vst [vmem:[#allocation56_spill] sm:$0xff] %v4749_v63  ;;  %v4751_v58 = vadd.f32 %v283_v62, %v178_v61  ;;  %v4754_v57 = vadd.f32 %v396_v29, %v4714_v60 }
 0x13d   :  { %6627 = vst [vmem:[#allocation57_spill] sm:$0xff] %v4751_v58  ;;  %6628 = vst [vmem:[#allocation58_spill] sm:$0xff] %v4754_v57 }
 0x13e   :  { %v287_v56 = vpop.f32.mrf.mxu0  ;;  %v400_v0 = vpop.f32.mrf.mxu1 }
 0x13f   :  { %v4756_v51 = vadd.f32 %v287_v56, %v174_v20  ;;  %v4759_v54 = vadd.f32 %v400_v0, %v4708_v2 }
 0x140   :  { %v289_v53 = vpop.f32.mrf.mxu0  ;;  %v402_v3 = vpop.f32.mrf.mxu1 }
 0x141   :  { %6629 = vst [vmem:[#allocation59_spill] sm:$0xff] %v4756_v51  ;;  %6630 = vst [vmem:[#allocation60_spill] sm:$0xff] %v4759_v54  ;;  %v4761_v4 = vadd.f32 %v289_v53, %v178_v61  ;;  %v4764_v11 = vadd.f32 %v402_v3, %v4714_v60 }
 0x143   :  { %6631 = vst [vmem:[#allocation61_spill] sm:$0xff] %v4761_v4  ;;  %6632 = vst [vmem:[#allocation62_spill] sm:$0xff] %v4764_v11 }
 0x144   :  { %v293_v63 = vpop.f32.mrf.mxu0  ;;  %v406_v62 = vpop.f32.mrf.mxu1 }
 0x145   :  { %v4766_v58 = vadd.f32 %v293_v63, %v174_v20  ;;  %v4769_v29 = vadd.f32 %v406_v62, %v4708_v2 }
 0x146   :  { %v295_v57 = vpop.f32.mrf.mxu0  ;;  %v408_v56 = vpop.f32.mrf.mxu1 }
 0x147   :  { %6633 = vst [vmem:[#allocation63_spill] sm:$0xff] %v4766_v58  ;;  %6634 = vst [vmem:[#allocation64_spill] sm:$0xff] %v4769_v29  ;;  %v4771_v51 = vadd.f32 %v295_v57, %v178_v61  ;;  %v4774_v0 = vadd.f32 %v408_v56, %v4714_v60  ;;  %v258_v57 = vadd.f32 %v4692_v38, %v174_v20 }
 0x148   :  { %v260_v56 = vadd.f32 %v4698_v52, %v178_v61 }
 0x149   :  { %6635 = vst [vmem:[#allocation65_spill] sm:$0xff] %v4771_v51  ;;  %6636 = vst [vmem:[#allocation66_spill] sm:$0xff] %v4774_v0 }
 0x14a   :  { %v299_v54 = vpop.f32.mrf.mxu0  ;;  %v412_v53 = vpop.f32.mrf.mxu1 }
 0x14b   :  { %v4776_v4 = vadd.f32 %v299_v54, %v174_v20  ;;  %v4779_v3 = vadd.f32 %v412_v53, %v4708_v2 }
 0x14c   :  { %v301_v11 = vpop.f32.mrf.mxu0  ;;  %v414_v63 = vpop.f32.mrf.mxu1 }
 0x14d   :  { %6637 = vst [vmem:[#allocation67_spill] sm:$0xff] %v4776_v4  ;;  %6638 = vst [vmem:[#allocation68_spill] sm:$0xff] %v4779_v3  ;;  %v4781_v58 = vadd.f32 %v301_v11, %v178_v61  ;;  %v4784_v62 = vadd.f32 %v414_v63, %v4714_v60  ;;  %v373_v11 = vadd.f32 %v4700_v1, %v4714_v60 }
 0x14e   :  { %v371_v63 = vadd.f32 %v4694_v47, %v4708_v2  ;;  %v6642_v2 = vld [vmem:[#allocation22_spill] sm:$0xff] }
 0x14f   :  { %6639 = vst [vmem:[#allocation69_spill] sm:$0xff] %v4781_v58  ;;  %6640 = vst [vmem:[#allocation70_spill] sm:$0xff] %v4784_v62 }
 0x150   :  { %v585_v29 = vpop.f32.mrf.mxu0  ;;  %v656_v4 = vpop.f32.mrf.mxu1 }
 0x151   :  { %v661_v0 = vadd.f32 %v585_v29, %v258_v57  ;;  %v663_v62 = vadd.f32 %v656_v4, %v371_v63  ;;  %v6647_v63 = vld [vmem:[#allocation27_spill] sm:$0xff] }
 0x152   :  { %v587_v51 = vpop.f32.mrf.mxu0  ;;  %v658_v3 = vpop.f32.mrf.mxu1 }
 0x153   :  { %v3767_v55 = vmul.f32 -1.442695, %v661_v0  ;;  %v662_v54 = vadd.f32 %v587_v51, %v260_v56  ;;  %v664_v58 = vadd.f32 %v658_v3, %v373_v11  ;;  %v6646_v11 = vld [vmem:[#allocation26_spill] sm:$0xff] }
 0x155   :  { %3828 = vpow2.f32 %v3767_v55  ;;  %v3768_v53 = vmul.f32 -1.442695, %v662_v54  ;;  %v3769_v38 = vmul.f32 -1.442695, %v664_v58  ;;  %v6644_v54 = vld [vmem:[#allocation24_spill] sm:$0xff] }
 0x157   :  { %3830 = vpow2.f32 %v3768_v53  ;;  %v6645_v53 = vld [vmem:[#allocation25_spill] sm:$0xff] }
 0x158   :  { %3832 = vpow2.f32 %v3769_v38  ;;  %v6648_v38 = vld [vmem:[#allocation28_spill] sm:$0xff] }
 0x162   :  { %v3829_v20 = vpop.eup %3828 }
 0x163   :  { %v668_v52 = vadd.f32 1.0, %v3829_v20  ;;  %v6649_v20 = vld [vmem:[#allocation29_spill] sm:$0xff] }
 0x164   :  { %v3831_v61 = vpop.eup %3830 }
 0x165   :  { %3834 = vrcp.f32 %v668_v52  ;;  %v674_v51 = vadd.f32 1.0, %v3831_v61  ;;  %v3833_v55 = vpop.eup %3832  ;;  %v6650_v52 = vld [vmem:[#allocation30_spill] sm:$0xff]  ;;  %v6651_v61 = vld [vmem:[#allocation31_spill] sm:$0xff] }
 0x166   :  { %3836 = vtanh.f32 %v663_v62  ;;  %v681_v56 = vadd.f32 1.0, %v3833_v55  ;;  %v6643_v62 = vld [vmem:[#allocation23_spill] sm:$0xff]  ;;  %v6653_v55 = vld [vmem:[#allocation33_spill] sm:$0xff] }
 0x167   :  { %3838 = vrcp.f32 %v674_v51  ;;  %v6652_v51 = vld [vmem:[#allocation32_spill] sm:$0xff] }
 0x168   :  { %3840 = vrcp.f32 %v681_v56  ;;  %v6657_v56 = vld [vmem:[#allocation37_spill] sm:$0xff] }
 0x172   :  { %v3835_v29 = vpop.eup %3834 }
 0x173   :  { %v3837_v0 = vpop.eup %3836 }
 0x174   :  { %v3839_v57 = vpop.eup %3838  ;;  %v685_v1 = vmul.f32 %v3837_v0, %v3835_v29  ;;  %v6654_v29 = vld [vmem:[#allocation34_spill] sm:$0xff]  ;;  %v6655_v0 = vld [vmem:[#allocation35_spill] sm:$0xff] }
 0x175   :  { %v684_v60 = vmul.f32 0.0, %v3839_v57  ;;  %v3841_v4 = vpop.eup %3840  ;;  %v6656_v57 = vld [vmem:[#allocation36_spill] sm:$0xff] }
 0x177   :  { %v4792_v3 = vadd.f32 %v685_v1, %v684_v60  ;;  %v6658_v60 = vld [vmem:[#allocation38_spill] sm:$0xff]  ;;  %v6659_v1 = vld [vmem:[#allocation39_spill] sm:$0xff] }
 0x179   :  { %3842 = vtanh.f32 %v4792_v3 }
 0x186   :  { %v3843_v58 = vpop.eup %3842 }
 0x187   :  { %v4795_v47 = vmul.f32 %v3843_v58, %v3841_v4  ;;  %v6660_v4 = vld [vmem:[#allocation40_spill] sm:$0xff]  ;;  %v6661_v58 = vld [vmem:[#allocation41_spill] sm:$0xff] }
 0x189   :  { %6641 = vst [vmem:[#allocation71_spill] sm:$0xff] %v4795_v47  ;;  %759 = vmatmul.mubr.f32.vlgmr.msra.gmra.mxu0 %v4795_v47  ;;  %830 = vmatmul.mubr.f32.vlgmr.msra.gmra.mxu1 %v4795_v47  ;;  %v6662_v47 = vmov 0.0  }
 0x18a   :  { %870 = vmatpush1.msra.mxu0 %v4416_v5  ;;  %941 = vmatpush1.msra.mxu1 %v4418_v6 }
 0x18b   :  { %871 = vmatprep.subr.mxu0 %v4420_v7  ;;  %942 = vmatprep.subr.mxu1 %v4422_v8 }
 0x18c   :  { %872 = vmatpush1.msra.mxu0 %v4428_v9  ;;  %943 = vmatpush1.msra.mxu1 %v4430_v10 }
 0x18d   :  { %873 = vmatprep.subr.mxu0 %v4436_v12  ;;  %944 = vmatprep.subr.mxu1 %v4438_v13 }
 0x18e   :  { %874 = vmatpush1.msra.mxu0 %v4442_v14  ;;  %945 = vmatpush1.msra.mxu1 %v4444_v15 }
 0x18f   :  { %875 = vmatprep.subr.mxu0 %v4446_v16  ;;  %946 = vmatprep.subr.mxu1 %v4448_v17 }
 0x190   :  { %876 = vmatpush1.msra.mxu0 %v4454_v18  ;;  %947 = vmatpush1.msra.mxu1 %v4456_v19 }
 0x191   :  { %877 = vmatprep.subr.mxu0 %v4462_v21  ;;  %948 = vmatprep.subr.mxu1 %v4464_v22 }
 0x192   :  { %878 = vmatpush1.msra.mxu0 %v4468_v23  ;;  %949 = vmatpush1.msra.mxu1 %v4470_v24 }
 0x193   :  { %879 = vmatprep.subr.mxu0 %v4472_v25  ;;  %950 = vmatprep.subr.mxu1 %v4474_v26 }
 0x194   :  { %880 = vmatpush1.msra.mxu0 %v4480_v27  ;;  %951 = vmatpush1.msra.mxu1 %v4482_v28 }
 0x195   :  { %881 = vmatprep.subr.mxu0 %v4488_v30  ;;  %952 = vmatprep.subr.mxu1 %v4490_v31 }
 0x196   :  { %882 = vmatpush1.msra.mxu0 %v4494_v32  ;;  %953 = vmatpush1.msra.mxu1 %v4496_v33 }
 0x197   :  { %883 = vmatprep.subr.mxu0 %v4498_v34  ;;  %954 = vmatprep.subr.mxu1 %v4500_v35 }
 0x198   :  { %884 = vmatpush1.msra.mxu0 %v4506_v36  ;;  %955 = vmatpush1.msra.mxu1 %v4508_v37 }
 0x199   :  { %885 = vmatprep.subr.mxu0 %v4514_v39  ;;  %956 = vmatprep.subr.mxu1 %v4516_v40 }
 0x19a   :  { %886 = vmatpush1.msra.mxu0 %v4520_v41  ;;  %957 = vmatpush1.msra.mxu1 %v4522_v42 }
 0x19b   :  { %887 = vmatprep.subr.mxu0 %v4524_v43  ;;  %958 = vmatprep.subr.mxu1 %v4526_v44 }
 0x19c   :  { %888 = vmatpush1.msra.mxu0 %v4532_v45  ;;  %959 = vmatpush1.msra.mxu1 %v4534_v46 }
 0x19d   :  { %889 = vmatprep.subr.mxu0 %v4540_v48  ;;  %960 = vmatprep.subr.mxu1 %v4542_v49 }
 0x19e   :  { %890 = vmatpush1.msra.mxu0 %v4546_v50  ;;  %961 = vmatpush1.msra.mxu1 %v6642_v2 }
 0x19f   :  { %891 = vmatprep.subr.mxu0 %v6643_v62  ;;  %962 = vmatprep.subr.mxu1 %v6644_v54 }
 0x1a0   :  { %892 = vmatpush1.msra.mxu0 %v6645_v53  ;;  %963 = vmatpush1.msra.mxu1 %v6646_v11 }
 0x1a1   :  { %893 = vmatprep.subr.mxu0 %v6647_v63  ;;  %964 = vmatprep.subr.mxu1 %v6648_v38  ;;  %v6668_v38 = vld [vmem:[#allocation44_spill] sm:$0xff] }
 0x1a2   :  { %894 = vmatpush1.msra.mxu0 %v6649_v20  ;;  %965 = vmatpush1.msra.mxu1 %v6650_v52  ;;  %v6667_v20 = vld [vmem:[#allocation46_spill] sm:$0xff] }
 0x1a3   :  { %895 = vmatprep.subr.mxu0 %v6651_v61  ;;  %966 = vmatprep.subr.mxu1 %v6652_v51  ;;  %v6663_v51 = vld [vmem:[#allocation42_spill] sm:$0xff] }
 0x1a4   :  { %896 = vmatpush1.msra.mxu0 %v6653_v55  ;;  %967 = vmatpush1.msra.mxu1 %v6654_v29  ;;  %v6664_v29 = vld [vmem:[#allocation20_spill] sm:$0xff] }
 0x1a5   :  { %897 = vmatprep.subr.mxu0 %v6655_v0  ;;  %968 = vmatprep.subr.mxu1 %v6656_v57  ;;  %v6665_v0 = vld [vmem:[#allocation21_spill] sm:$0xff] }
 0x1a6   :  { %898 = vmatpush1.msra.mxu0 %v6657_v56  ;;  %969 = vmatpush1.msra.mxu1 %v6658_v60 }
 0x1a7   :  { %899 = vmatprep.subr.mxu0 %v6659_v1  ;;  %970 = vmatprep.subr.mxu1 %v6660_v4  ;;  %v6666_v1 = vld [vmem:[#allocation45_spill] sm:$0xff] }
 0x1a8   :  { %900 = vmatpush1.msra.mxu0 %v6661_v58  ;;  %933 = vmatprep.mubr.f32.mxu0 %v6662_v47 }
 0x1a9   :  { %971 = vmatpush1.msra.mxu1 %v6663_v51  ;;  %1004 = vmatprep.mubr.f32.mxu1 %v6662_v47 }
 0x1aa   :  { %1044 = vmatprep.subr.mxu0 %v6664_v29  ;;  %1115 = vmatprep.subr.mxu1 %v6665_v0 }
 0x249   :  { %v760_v57 = vpop.f32.mrf.mxu0  ;;  %v831_v4 = vpop.f32.mrf.mxu1 }
 0x24a   :  { %v836_v56 = vadd.f32 %v760_v57, %v4716_v59  ;;  %v838_v47 = vadd.f32 %v831_v4, %v6668_v38 }
 0x24b   :  { %v762_v60 = vpop.f32.mrf.mxu0  ;;  %v833_v52 = vpop.f32.mrf.mxu1 }
 0x24c   :  { %v3770_v55 = vmul.f32 -1.442695, %v836_v56  ;;  %v837_v61 = vadd.f32 %v762_v60, %v6666_v1  ;;  %v839_v51 = vadd.f32 %v833_v52, %v6667_v20 }
 0x24e   :  { %3844 = vpow2.f32 %v3770_v55  ;;  %v3771_v58 = vmul.f32 -1.442695, %v837_v61  ;;  %v3772_v63 = vmul.f32 -1.442695, %v839_v51 }
 0x250   :  { %3846 = vpow2.f32 %v3771_v58 }
 0x251   :  { %3848 = vtanh.f32 %v838_v47 }
 0x252   :  { %3850 = vpow2.f32 %v3772_v63 }
 0x25b   :  { %v3845_v29 = vpop.eup %3844 }
 0x25c   :  { %v843_v11 = vadd.f32 1.0, %v3845_v29 }
 0x25d   :  { %v3847_v0 = vpop.eup %3846 }
 0x25e   :  { %3852 = vrcp.f32 %v843_v11  ;;  %v849_v59 = vadd.f32 1.0, %v3847_v0  ;;  %v3849_v57 = vpop.eup %3848  ;;  %v6691_v11 = vld [vmem:[#allocation49_spill] sm:$0xff]  ;;  %v6692_v0 = vld [vmem:[#allocation50_spill] sm:$0xff] }
 0x25f   :  { %v3851_v56 = vpop.eup %3850 }
 0x260   :  { %3854 = vrcp.f32 %v849_v59  ;;  %v856_v1 = vadd.f32 1.0, %v3851_v56 }
 0x262   :  { %3856 = vrcp.f32 %v856_v1 }
 0x26b   :  { %v3853_v55 = vpop.eup %3852 }
 0x26c   :  { %v860_v60 = vmul.f32 %v3853_v55, %v3849_v57  ;;  %v6693_v57 = vld [vmem:[#allocation48_spill] sm:$0xff] }
 0x26d   :  { %v3855_v61 = vpop.eup %3854 }
 0x26e   :  { %v859_v58 = vmul.f32 %v3855_v61, %v4792_v3 }
 0x26f   :  { %v3857_v38 = vpop.eup %3856 }
 0x270   :  { %v4870_v20 = vadd.f32 %v860_v60, %v859_v58 }
 0x272   :  { %3858 = vtanh.f32 %v4870_v20 }
 0x27f   :  { %v3859_v47 = vpop.eup %3858 }
 0x280   :  { %v4873_v52 = vmul.f32 %v3859_v47, %v3857_v38 }
 0x282   :  { %6669 = vst [vmem:[#allocation22_spill] sm:$0xff] %v4873_v52  ;;  %934 = vmatmul.mubr.f32.vlgmr.msra.gmra.mxu0 %v4873_v52  ;;  %1005 = vmatmul.mubr.f32.vlgmr.msra.gmra.mxu1 %v4873_v52  ;;  %v5022_v52 = vld [vmem:[#allocation12 + $0x150] sm:$0xff] }
 0x283   :  { %1045 = vmatpush1.msra.mxu0 %v4416_v5  ;;  %1116 = vmatpush1.msra.mxu1 %v4418_v6  ;;  %v6670_v5 = vld [vmem:[#allocation26_spill] sm:$0xff]  ;;  %v6671_v6 = vld [vmem:[#allocation27_spill] sm:$0xff] }
 0x284   :  { %1046 = vmatprep.subr.mxu0 %v4420_v7  ;;  %1117 = vmatprep.subr.mxu1 %v4422_v8  ;;  %v6672_v7 = vld [vmem:[#allocation28_spill] sm:$0xff]  ;;  %v6673_v8 = vld [vmem:[#allocation29_spill] sm:$0xff] }
 0x285   :  { %1047 = vmatpush1.msra.mxu0 %v4428_v9  ;;  %1118 = vmatpush1.msra.mxu1 %v4430_v10  ;;  %v6674_v9 = vld [vmem:[#allocation30_spill] sm:$0xff]  ;;  %v6675_v10 = vld [vmem:[#allocation31_spill] sm:$0xff] }
 0x286   :  { %1048 = vmatprep.subr.mxu0 %v4436_v12  ;;  %1119 = vmatprep.subr.mxu1 %v4438_v13  ;;  %v6676_v12 = vld [vmem:[#allocation32_spill] sm:$0xff]  ;;  %v6677_v13 = vld [vmem:[#allocation33_spill] sm:$0xff] }
 0x287   :  { %1049 = vmatpush1.msra.mxu0 %v4442_v14  ;;  %1120 = vmatpush1.msra.mxu1 %v4444_v15  ;;  %v6678_v14 = vld [vmem:[#allocation34_spill] sm:$0xff]  ;;  %v6679_v15 = vld [vmem:[#allocation35_spill] sm:$0xff] }
 0x288   :  { %1050 = vmatprep.subr.mxu0 %v4446_v16  ;;  %1121 = vmatprep.subr.mxu1 %v4448_v17  ;;  %v6680_v16 = vld [vmem:[#allocation36_spill] sm:$0xff]  ;;  %v6681_v17 = vld [vmem:[#allocation37_spill] sm:$0xff] }
 0x289   :  { %1051 = vmatpush1.msra.mxu0 %v4454_v18  ;;  %1122 = vmatpush1.msra.mxu1 %v4456_v19  ;;  %v6682_v18 = vld [vmem:[#allocation38_spill] sm:$0xff]  ;;  %v6683_v19 = vld [vmem:[#allocation39_spill] sm:$0xff] }
 0x28a   :  { %1052 = vmatprep.subr.mxu0 %v4462_v21  ;;  %1123 = vmatprep.subr.mxu1 %v4464_v22  ;;  %v6684_v21 = vld [vmem:[#allocation40_spill] sm:$0xff]  ;;  %v6685_v22 = vld [vmem:[#allocation41_spill] sm:$0xff] }
 0x28b   :  { %1053 = vmatpush1.msra.mxu0 %v4468_v23  ;;  %1124 = vmatpush1.msra.mxu1 %v4470_v24  ;;  %v6686_v23 = vmov 0.0   ;;  %v6687_v24 = vld [vmem:[#allocation42_spill] sm:$0xff] }
 0x28c   :  { %1054 = vmatprep.subr.mxu0 %v4472_v25  ;;  %1125 = vmatprep.subr.mxu1 %v4474_v26  ;;  %v4941_v25 = vld [vmem:[#allocation12 + $0x1e8] sm:$0xff]  ;;  %v4944_v26 = vld [vmem:[#allocation12 + $0x1f8] sm:$0xff] }
 0x28d   :  { %1055 = vmatpush1.msra.mxu0 %v4480_v27  ;;  %1126 = vmatpush1.msra.mxu1 %v4482_v28  ;;  %6688 = vst [vmem:[#allocation23_spill] sm:$0xff] %v4941_v25  ;;  %6689 = vst [vmem:[#allocation24_spill] sm:$0xff] %v4944_v26  ;;  %v6690_v28 = vld [vmem:[#allocation47_spill] sm:$0xff] }
 0x28e   :  { %1056 = vmatprep.subr.mxu0 %v4488_v30  ;;  %1127 = vmatprep.subr.mxu1 %v4490_v31 }
 0x28f   :  { %1057 = vmatpush1.msra.mxu0 %v4494_v32  ;;  %1128 = vmatpush1.msra.mxu1 %v4496_v33 }
 0x290   :  { %1058 = vmatprep.subr.mxu0 %v4498_v34  ;;  %1129 = vmatprep.subr.mxu1 %v4500_v35 }
 0x291   :  { %1059 = vmatpush1.msra.mxu0 %v4506_v36  ;;  %1130 = vmatpush1.msra.mxu1 %v4508_v37 }
 0x292   :  { %1060 = vmatprep.subr.mxu0 %v4514_v39  ;;  %1131 = vmatprep.subr.mxu1 %v4516_v40 }
 0x293   :  { %1061 = vmatpush1.msra.mxu0 %v4520_v41  ;;  %1132 = vmatpush1.msra.mxu1 %v4522_v42 }
 0x294   :  { %1062 = vmatprep.subr.mxu0 %v4524_v43  ;;  %1133 = vmatprep.subr.mxu1 %v4526_v44 }
 0x295   :  { %1063 = vmatpush1.msra.mxu0 %v4532_v45  ;;  %1134 = vmatpush1.msra.mxu1 %v4534_v46 }
 0x296   :  { %1064 = vmatprep.subr.mxu0 %v4540_v48  ;;  %1135 = vmatprep.subr.mxu1 %v4542_v49 }
 0x297   :  { %1065 = vmatpush1.msra.mxu0 %v4546_v50  ;;  %1136 = vmatpush1.msra.mxu1 %v6642_v2 }
 0x298   :  { %1066 = vmatprep.subr.mxu0 %v6643_v62  ;;  %1137 = vmatprep.subr.mxu1 %v6644_v54 }
 0x299   :  { %1067 = vmatpush1.msra.mxu0 %v6645_v53  ;;  %1138 = vmatpush1.msra.mxu1 %v6670_v5 }
 0x29a   :  { %1068 = vmatprep.subr.mxu0 %v6671_v6  ;;  %1139 = vmatprep.subr.mxu1 %v6672_v7 }
 0x29b   :  { %1069 = vmatpush1.msra.mxu0 %v6673_v8  ;;  %1140 = vmatpush1.msra.mxu1 %v6674_v9 }
 0x29c   :  { %1070 = vmatprep.subr.mxu0 %v6675_v10  ;;  %1141 = vmatprep.subr.mxu1 %v6676_v12 }
 0x29d   :  { %1071 = vmatpush1.msra.mxu0 %v6677_v13  ;;  %1142 = vmatpush1.msra.mxu1 %v6678_v14 }
 0x29e   :  { %1072 = vmatprep.subr.mxu0 %v6679_v15  ;;  %1143 = vmatprep.subr.mxu1 %v6680_v16 }
 0x29f   :  { %1073 = vmatpush1.msra.mxu0 %v6681_v17  ;;  %1144 = vmatpush1.msra.mxu1 %v6682_v18 }
 0x2a0   :  { %1074 = vmatprep.subr.mxu0 %v6683_v19  ;;  %1145 = vmatprep.subr.mxu1 %v6684_v21 }
 0x2a1   :  { %1075 = vmatpush1.msra.mxu0 %v6685_v22  ;;  %1108 = vmatprep.mubr.f32.mxu0 %v6686_v23 }
 0x2a2   :  { %1146 = vmatpush1.msra.mxu1 %v6687_v24  ;;  %1179 = vmatprep.mubr.f32.mxu1 %v6686_v23 }
 0x2a3   :  { %1219 = vmatprep.subr.mxu0 %v4941_v25  ;;  %1290 = vmatprep.subr.mxu1 %v4944_v26 }
 0x342   :  { %v935_v27 = vpop.f32.mrf.mxu0  ;;  %v1006_v51 = vpop.f32.mrf.mxu1 }
 0x343   :  { %v1011_v30 = vadd.f32 %v935_v27, %v6690_v28  ;;  %v1013_v56 = vadd.f32 %v1006_v51, %v6693_v57  ;;  %v4971_v57 = vld [vmem:[#allocation12 + $0x1c0] sm:$0xff] }
 0x344   :  { %v937_v31 = vpop.f32.mrf.mxu0  ;;  %v1008_v29 = vpop.f32.mrf.mxu1 }
 0x345   :  { %v3773_v3 = vmul.f32 -1.442695, %v1011_v30  ;;  %v1012_v63 = vadd.f32 %v937_v31, %v6691_v11  ;;  %v1014_v59 = vadd.f32 %v1008_v29, %v6692_v0  ;;  %v4959_v29 = vld [vmem:[#allocation12 + $0x1e0] sm:$0xff]  ;;  %v4962_v0 = vld [vmem:[#allocation12 + $0x1f0] sm:$0xff] }
 0x347   :  { %3860 = vpow2.f32 %v3773_v3  ;;  %v3774_v4 = vmul.f32 -1.442695, %v1012_v63  ;;  %v3775_v55 = vmul.f32 -1.442695, %v1014_v59  ;;  %v4968_v59 = vld [vmem:[#allocation12 + $0x1d8] sm:$0xff] }
 0x349   :  { %3862 = vpow2.f32 %v3774_v4 }
 0x34a   :  { %3864 = vtanh.f32 %v1013_v56  ;;  %v4974_v56 = vld [vmem:[#allocation12 + $0x1d0] sm:$0xff] }
 0x34b   :  { %3866 = vpow2.f32 %v3775_v55  ;;  %v4977_v55 = vld [vmem:[#allocation12 + $0x1a8] sm:$0xff] }
 0x354   :  { %v3861_v60 = vpop.eup %3860 }
 0x355   :  { %v1018_v61 = vadd.f32 1.0, %v3861_v60  ;;  %v4980_v60 = vld [vmem:[#allocation12 + $0x1b8] sm:$0xff] }
 0x356   :  { %v3863_v1 = vpop.eup %3862 }
 0x357   :  { %3868 = vrcp.f32 %v1018_v61  ;;  %v1024_v58 = vadd.f32 1.0, %v3863_v1  ;;  %v3865_v38 = vpop.eup %3864  ;;  %v4983_v61 = vld [vmem:[#allocation12 + $0x1a0] sm:$0xff]  ;;  %v4986_v1 = vld [vmem:[#allocation12 + $0x1b0] sm:$0xff] }
 0x358   :  { %v3867_v47 = vpop.eup %3866 }
 0x359   :  { %3870 = vrcp.f32 %v1024_v58  ;;  %v1031_v31 = vadd.f32 1.0, %v3867_v47  ;;  %v4989_v58 = vld [vmem:[#allocation12 + $0x188] sm:$0xff]  ;;  %v4995_v47 = vld [vmem:[#allocation12 + $0x180] sm:$0xff] }
 0x35b   :  { %3872 = vrcp.f32 %v1031_v31  ;;  %v5007_v31 = vld [vmem:[#allocation12 + $0x160] sm:$0xff] }
 0x35c   :  { %6695 = vst [vmem:[#allocation20_spill] sm:$0xff] %v5007_v31 }
 0x364   :  { %v3869_v27 = vpop.eup %3868 }
 0x365   :  { %v1035_v28 = vmul.f32 %v3869_v27, %v3865_v38  ;;  %v4992_v38 = vld [vmem:[#allocation12 + $0x198] sm:$0xff]  ;;  %v4998_v27 = vld [vmem:[#allocation12 + $0x190] sm:$0xff] }
 0x366   :  { %v3871_v30 = vpop.eup %3870 }
 0x367   :  { %v1034_v3 = vmul.f32 %v3871_v30, %v4870_v20  ;;  %v4965_v20 = vld [vmem:[#allocation12 + $0x1c8] sm:$0xff]  ;;  %v5004_v30 = vld [vmem:[#allocation12 + $0x178] sm:$0xff] }
 0x368   :  { %v3873_v63 = vpop.eup %3872 }
 0x369   :  { %v4952_v11 = vadd.f32 %v1035_v28, %v1034_v3  ;;  %v5001_v28 = vld [vmem:[#allocation12 + $0x168] sm:$0xff]  ;;  %v5010_v3 = vld [vmem:[#allocation12 + $0x170] sm:$0xff] }
 0x36a   :  { %6696 = vst [vmem:[#allocation21_spill] sm:$0xff] %v5010_v3 }
 0x36b   :  { %3874 = vtanh.f32 %v4952_v11 }
 0x378   :  { %v3875_v51 = vpop.eup %3874 }
 0x379   :  { %v4955_v4 = vmul.f32 %v3875_v51, %v3873_v63  ;;  %v5013_v63 = vld [vmem:[#allocation12 + $0x148] sm:$0xff]  ;;  %v5016_v51 = vld [vmem:[#allocation12 + $0x158] sm:$0xff] }
 0x37b   :  { %6694 = vst [vmem:[#allocation25_spill] sm:$0xff] %v4955_v4  ;;  %1109 = vmatmul.mubr.f32.vlgmr.msra.gmra.mxu0 %v4955_v4  ;;  %1180 = vmatmul.mubr.f32.vlgmr.msra.gmra.mxu1 %v4955_v4  ;;  %v5019_v4 = vld [vmem:[#allocation12 + $0x140] sm:$0xff] }
 0x37c   :  { %1220 = vmatpush1.msra.mxu0 %v4959_v29  ;;  %1291 = vmatpush1.msra.mxu1 %v4962_v0 }
 0x37d   :  { %1221 = vmatprep.subr.mxu0 %v4965_v20  ;;  %1292 = vmatprep.subr.mxu1 %v4968_v59 }
 0x37e   :  { %1222 = vmatpush1.msra.mxu0 %v4971_v57  ;;  %1293 = vmatpush1.msra.mxu1 %v4974_v56 }
 0x37f   :  { %1223 = vmatprep.subr.mxu0 %v4977_v55  ;;  %1294 = vmatprep.subr.mxu1 %v4980_v60 }
 0x380   :  { %1224 = vmatpush1.msra.mxu0 %v4983_v61  ;;  %1295 = vmatpush1.msra.mxu1 %v4986_v1 }
 0x381   :  { %1225 = vmatprep.subr.mxu0 %v4989_v58  ;;  %1296 = vmatprep.subr.mxu1 %v4992_v38 }
 0x382   :  { %1226 = vmatpush1.msra.mxu0 %v4995_v47  ;;  %1297 = vmatpush1.msra.mxu1 %v4998_v27 }
 0x383   :  { %1227 = vmatprep.subr.mxu0 %v5001_v28  ;;  %1298 = vmatprep.subr.mxu1 %v5004_v30 }
 0x384   :  { %1228 = vmatpush1.msra.mxu0 %v5007_v31  ;;  %1299 = vmatpush1.msra.mxu1 %v5010_v3  ;;  %v5025_v31 = vld [vmem:[#allocation12 + $0x128] sm:$0xff]  ;;  %v5028_v3 = vld [vmem:[#allocation12 + $0x138] sm:$0xff] }
 0x385   :  { %1229 = vmatprep.subr.mxu0 %v5013_v63  ;;  %1300 = vmatprep.subr.mxu1 %v5016_v51 }
 0x386   :  { %1230 = vmatpush1.msra.mxu0 %v5019_v4  ;;  %1301 = vmatpush1.msra.mxu1 %v5022_v52 }
 0x387   :  { %1231 = vmatprep.subr.mxu0 %v5025_v31  ;;  %1302 = vmatprep.subr.mxu1 %v5028_v3 }
 0x388   :  { %1232 = vmatpush1.msra.mxu0 %v4494_v32  ;;  %1303 = vmatpush1.msra.mxu1 %v4496_v33  ;;  %v6697_v33 = vld [vmem:[#allocation51_spill] sm:$0xff] }
 0x389   :  { %1233 = vmatprep.subr.mxu0 %v4498_v34  ;;  %1304 = vmatprep.subr.mxu1 %v4500_v35 }
 0x38a   :  { %1234 = vmatpush1.msra.mxu0 %v4506_v36  ;;  %1305 = vmatpush1.msra.mxu1 %v4508_v37  ;;  %v6698_v37 = vld [vmem:[#allocation53_spill] sm:$0xff] }
 0x38b   :  { %1235 = vmatprep.subr.mxu0 %v4514_v39  ;;  %1306 = vmatprep.subr.mxu1 %v4516_v40 }
 0x38c   :  { %1236 = vmatpush1.msra.mxu0 %v4520_v41  ;;  %1307 = vmatpush1.msra.mxu1 %v4522_v42 }
 0x38d   :  { %1237 = vmatprep.subr.mxu0 %v4524_v43  ;;  %1308 = vmatprep.subr.mxu1 %v4526_v44  ;;  %v6699_v43 = vld [vmem:[#allocation54_spill] sm:$0xff] }
 0x38e   :  { %1238 = vmatpush1.msra.mxu0 %v4532_v45  ;;  %1309 = vmatpush1.msra.mxu1 %v4534_v46  ;;  %v6700_v45 = vld [vmem:[#allocation52_spill] sm:$0xff] }
 0x38f   :  { %1239 = vmatprep.subr.mxu0 %v4540_v48  ;;  %1310 = vmatprep.subr.mxu1 %v4542_v49 }
 0x390   :  { %1240 = vmatpush1.msra.mxu0 %v4546_v50  ;;  %1311 = vmatpush1.msra.mxu1 %v6642_v2 }
 0x391   :  { %1241 = vmatprep.subr.mxu0 %v6643_v62  ;;  %1312 = vmatprep.subr.mxu1 %v6644_v54 }
 0x392   :  { %1242 = vmatpush1.msra.mxu0 %v6645_v53  ;;  %1313 = vmatpush1.msra.mxu1 %v6670_v5 }
 0x393   :  { %1243 = vmatprep.subr.mxu0 %v6671_v6  ;;  %1314 = vmatprep.subr.mxu1 %v6672_v7 }
 0x394   :  { %1244 = vmatpush1.msra.mxu0 %v6673_v8  ;;  %1315 = vmatpush1.msra.mxu1 %v6674_v9 }
 0x395   :  { %1245 = vmatprep.subr.mxu0 %v6675_v10  ;;  %1316 = vmatprep.subr.mxu1 %v6676_v12 }
 0x396   :  { %1246 = vmatpush1.msra.mxu0 %v6677_v13  ;;  %1317 = vmatpush1.msra.mxu1 %v6678_v14 }
 0x397   :  { %1247 = vmatprep.subr.mxu0 %v6679_v15  ;;  %1318 = vmatprep.subr.mxu1 %v6680_v16  ;;  %v6702_v15 = vld [vmem:[#allocation20_spill] sm:$0xff]  ;;  %v6703_v16 = vld [vmem:[#allocation21_spill] sm:$0xff] }
 0x398   :  { %1248 = vmatpush1.msra.mxu0 %v6681_v17  ;;  %1319 = vmatpush1.msra.mxu1 %v6682_v18  ;;  %v5109_v17 = vld [vmem:[#allocation12 + $0x120] sm:$0xff]  ;;  %v5112_v18 = vld [vmem:[#allocation12 + $0x130] sm:$0xff] }
 0x399   :  { %1249 = vmatprep.subr.mxu0 %v6683_v19  ;;  %1320 = vmatprep.subr.mxu1 %v6684_v21  ;;  %v5115_v19 = vld [vmem:[#allocation12 + $0x108] sm:$0xff]  ;;  %v5118_v21 = vld [vmem:[#allocation12 + $0x118] sm:$0xff] }
 0x39a   :  { %1250 = vmatpush1.msra.mxu0 %v6685_v22  ;;  %1283 = vmatprep.mubr.f32.mxu0 %v6686_v23  ;;  %v5121_v22 = vld [vmem:[#allocation12 + $0x100] sm:$0xff] }
 0x39b   :  { %1321 = vmatpush1.msra.mxu1 %v6687_v24  ;;  %1354 = vmatprep.mubr.f32.mxu1 %v6686_v23  ;;  %v5124_v24 = vld [vmem:[#allocation12 + $0x110] sm:$0xff] }
 0x39c   :  { %1394 = vmatprep.subr.mxu0 %v4941_v25  ;;  %1465 = vmatprep.subr.mxu1 %v4944_v26 }
 0x43b   :  { %v1110_v32 = vpop.f32.mrf.mxu0  ;;  %v1181_v40 = vpop.f32.mrf.mxu1 }
 0x43c   :  { %v1186_v34 = vadd.f32 %v1110_v32, %v6697_v33  ;;  %v1188_v46 = vadd.f32 %v1181_v40, %v6700_v45  ;;  %v5130_v32 = vld [vmem:[#allocation12 + $0xf8] sm:$0xff]  ;;  %v5133_v33 = vld [vmem:[#allocation12 + $0xe0] sm:$0xff]  ;;  %v5151_v40 = vld [vmem:[#allocation12 + $0xa8] sm:$0xff] }
 0x43d   :  { %v1112_v35 = vpop.f32.mrf.mxu0  ;;  %v1183_v42 = vpop.f32.mrf.mxu1  ;;  %v5166_v45 = vld [vmem:[#allocation12 + $0x98] sm:$0xff] }
 0x43e   :  { %v3776_v36 = vmul.f32 -1.442695, %v1186_v34  ;;  %v1187_v39 = vadd.f32 %v1112_v35, %v6698_v37  ;;  %v1189_v44 = vadd.f32 %v1183_v42, %v6699_v43  ;;  %v5136_v34 = vld [vmem:[#allocation12 + $0xf0] sm:$0xff]  ;;  %v5139_v35 = vld [vmem:[#allocation12 + $0xc8] sm:$0xff]  ;;  %v5145_v37 = vld [vmem:[#allocation12 + $0xc0] sm:$0xff] }
 0x43f   :  { %v5157_v42 = vld [vmem:[#allocation12 + $0xa0] sm:$0xff]  ;;  %v5160_v43 = vld [vmem:[#allocation12 + $0xb0] sm:$0xff] }
 0x440   :  { %3876 = vpow2.f32 %v3776_v36  ;;  %v3777_v41 = vmul.f32 -1.442695, %v1187_v39  ;;  %v3778_v48 = vmul.f32 -1.442695, %v1189_v44  ;;  %v5142_v36 = vld [vmem:[#allocation12 + $0xd8] sm:$0xff]  ;;  %v5148_v39 = vld [vmem:[#allocation12 + $0xd0] sm:$0xff] }
 0x441   :  { %v5163_v44 = vld [vmem:[#allocation12 + $0x88] sm:$0xff] }
 0x442   :  { %3878 = vpow2.f32 %v3777_v41  ;;  %v5154_v41 = vld [vmem:[#allocation12 + $0xb8] sm:$0xff] }
 0x443   :  { %3880 = vtanh.f32 %v1188_v46  ;;  %v5169_v46 = vld [vmem:[#allocation12 + $0x80] sm:$0xff] }
 0x444   :  { %3882 = vpow2.f32 %v3778_v48  ;;  %v5172_v48 = vld [vmem:[#allocation12 + $0x90] sm:$0xff] }
 0x445   :  { %6704 = vst [vmem:[#allocation46_spill] sm:$0xff] %v5172_v48 }
 0x44d   :  { %v3877_v49 = vpop.eup %3876 }
 0x44e   :  { %v1193_v50 = vadd.f32 1.0, %v3877_v49  ;;  %v5175_v49 = vld [vmem:[#allocation12 + $0x68] sm:$0xff] }
 0x44f   :  { %v3879_v2 = vpop.eup %3878  ;;  %6705 = vst [vmem:[#allocation44_spill] sm:$0xff] %v5175_v49 }
 0x450   :  { %3884 = vrcp.f32 %v1193_v50  ;;  %v1199_v62 = vadd.f32 1.0, %v3879_v2  ;;  %v3881_v54 = vpop.eup %3880  ;;  %v5178_v50 = vld [vmem:[#allocation12 + $0x78] sm:$0xff]  ;;  %v5181_v2 = vld [vmem:[#allocation12 + $0x60] sm:$0xff] }
 0x451   :  { %v3883_v53 = vpop.eup %3882  ;;  %6706 = vst [vmem:[#allocation26_spill] sm:$0xff] %v5178_v50  ;;  %6707 = vst [vmem:[#allocation27_spill] sm:$0xff] %v5181_v2 }
 0x452   :  { %3886 = vrcp.f32 %v1199_v62  ;;  %v1206_v8 = vadd.f32 1.0, %v3883_v53  ;;  %v5184_v62 = vld [vmem:[#allocation12 + $0x70] sm:$0xff]  ;;  %v5190_v53 = vld [vmem:[#allocation12 + $0x58] sm:$0xff] }
 0x453   :  { %6708 = vst [vmem:[#allocation28_spill] sm:$0xff] %v5184_v62  ;;  %6710 = vst [vmem:[#allocation30_spill] sm:$0xff] %v5190_v53 }
 0x454   :  { %3888 = vrcp.f32 %v1206_v8  ;;  %v5202_v8 = vld [vmem:[#allocation12 + $0x38] sm:$0xff] }
 0x455   :  { %6714 = vst [vmem:[#allocation34_spill] sm:$0xff] %v5202_v8 }
 0x45d   :  { %v3885_v5 = vpop.eup %3884 }
 0x45e   :  { %v1210_v6 = vmul.f32 %v3885_v5, %v3881_v54  ;;  %v5187_v54 = vld [vmem:[#allocation12 + $0x48] sm:$0xff]  ;;  %v5193_v5 = vld [vmem:[#allocation12 + $0x40] sm:$0xff] }
 0x45f   :  { %v3887_v7 = vpop.eup %3886  ;;  %6709 = vst [vmem:[#allocation29_spill] sm:$0xff] %v5187_v54  ;;  %6711 = vst [vmem:[#allocation31_spill] sm:$0xff] %v5193_v5 }
 0x460   :  { %v1209_v9 = vmul.f32 %v3887_v7, %v4952_v11  ;;  %v5127_v11 = vld [vmem:[#allocation12 + $0xe8] sm:$0xff] }
 0x461   :  { %v3889_v12 = vpop.eup %3888  ;;  %v5199_v7 = vld [vmem:[#allocation12 + $0x28] sm:$0xff] }
 0x462   :  { %v5078_v10 = vadd.f32 %v1210_v6, %v1209_v9  ;;  %v5196_v6 = vld [vmem:[#allocation12 + $0x50] sm:$0xff]  ;;  %6713 = vst [vmem:[#allocation33_spill] sm:$0xff] %v5199_v7  ;;  %v5205_v9 = vld [vmem:[#allocation12 + $0x20] sm:$0xff] }
 0x463   :  { %6712 = vst [vmem:[#allocation32_spill] sm:$0xff] %v5196_v6  ;;  %6715 = vst [vmem:[#allocation35_spill] sm:$0xff] %v5205_v9 }
 0x464   :  { %3890 = vtanh.f32 %v5078_v10 }
 0x471   :  { %v3891_v13 = vpop.eup %3890 }
 0x472   :  { %v5081_v14 = vmul.f32 %v3891_v13, %v3889_v12  ;;  %v5208_v12 = vld [vmem:[#allocation12 + $0x30] sm:$0xff]  ;;  %v5211_v13 = vld [vmem:[#allocation12 + $0x8] sm:$0xff] }
 0x473   :  { %6716 = vst [vmem:[#allocation36_spill] sm:$0xff] %v5208_v12  ;;  %6717 = vst [vmem:[#allocation37_spill] sm:$0xff] %v5211_v13 }
 0x474   :  { %6701 = vst [vmem:[#allocation45_spill] sm:$0xff] %v5081_v14  ;;  %1284 = vmatmul.mubr.f32.vlgmr.msra.gmra.mxu0 %v5081_v14  ;;  %1355 = vmatmul.mubr.f32.vlgmr.msra.gmra.mxu1 %v5081_v14  ;;  %v5214_v14 = vld [vmem:[#allocation12 + $0x18] sm:$0xff] }
 0x475   :  { %1395 = vmatpush1.msra.mxu0 %v4959_v29  ;;  %1466 = vmatpush1.msra.mxu1 %v4962_v0  ;;  %6718 = vst [vmem:[#allocation38_spill] sm:$0xff] %v5214_v14 }
 0x476   :  { %1396 = vmatprep.subr.mxu0 %v4965_v20  ;;  %1467 = vmatprep.subr.mxu1 %v4968_v59 }
 0x477   :  { %1397 = vmatpush1.msra.mxu0 %v4971_v57  ;;  %1468 = vmatpush1.msra.mxu1 %v4974_v56 }
 0x478   :  { %1398 = vmatprep.subr.mxu0 %v4977_v55  ;;  %1469 = vmatprep.subr.mxu1 %v4980_v60 }
 0x479   :  { %1399 = vmatpush1.msra.mxu0 %v4983_v61  ;;  %1470 = vmatpush1.msra.mxu1 %v4986_v1 }
 0x47a   :  { %1400 = vmatprep.subr.mxu0 %v4989_v58  ;;  %1471 = vmatprep.subr.mxu1 %v4992_v38 }
 0x47b   :  { %1401 = vmatpush1.msra.mxu0 %v4995_v47  ;;  %1472 = vmatpush1.msra.mxu1 %v4998_v27 }
 0x47c   :  { %1402 = vmatprep.subr.mxu0 %v5001_v28  ;;  %1473 = vmatprep.subr.mxu1 %v5004_v30 }
 0x47d   :  { %1403 = vmatpush1.msra.mxu0 %v6702_v15  ;;  %1474 = vmatpush1.msra.mxu1 %v6703_v16 }
 0x47e   :  { %1404 = vmatprep.subr.mxu0 %v5013_v63  ;;  %1475 = vmatprep.subr.mxu1 %v5016_v51 }
 0x47f   :  { %1405 = vmatpush1.msra.mxu0 %v5019_v4  ;;  %1476 = vmatpush1.msra.mxu1 %v5022_v52 }
 0x480   :  { %1406 = vmatprep.subr.mxu0 %v5025_v31  ;;  %1477 = vmatprep.subr.mxu1 %v5028_v3 }
 0x481   :  { %1407 = vmatpush1.msra.mxu0 %v5109_v17  ;;  %1478 = vmatpush1.msra.mxu1 %v5112_v18 }
 0x482   :  { %1408 = vmatprep.subr.mxu0 %v5115_v19  ;;  %1479 = vmatprep.subr.mxu1 %v5118_v21 }
 0x483   :  { %1409 = vmatpush1.msra.mxu0 %v5121_v22  ;;  %1480 = vmatpush1.msra.mxu1 %v5124_v24 }
 0x484   :  { %1410 = vmatprep.subr.mxu0 %v5127_v11  ;;  %1481 = vmatprep.subr.mxu1 %v5130_v32 }
 0x485   :  { %1411 = vmatpush1.msra.mxu0 %v5133_v33  ;;  %1482 = vmatpush1.msra.mxu1 %v5136_v34 }
 0x486   :  { %1412 = vmatprep.subr.mxu0 %v5139_v35  ;;  %1483 = vmatprep.subr.mxu1 %v5142_v36 }
 0x487   :  { %1413 = vmatpush1.msra.mxu0 %v5145_v37  ;;  %1484 = vmatpush1.msra.mxu1 %v5148_v39 }
 0x488   :  { %1414 = vmatprep.subr.mxu0 %v5151_v40  ;;  %1485 = vmatprep.subr.mxu1 %v5154_v41 }
 0x489   :  { %1415 = vmatpush1.msra.mxu0 %v5157_v42  ;;  %1486 = vmatpush1.msra.mxu1 %v5160_v43 }
 0x48a   :  { %1416 = vmatprep.subr.mxu0 %v5163_v44  ;;  %1487 = vmatprep.subr.mxu1 %v5166_v45 }
 0x48b   :  { %1417 = vmatpush1.msra.mxu0 %v5169_v46  ;;  %1488 = vmatpush1.msra.mxu1 %v5172_v48 }
 0x48c   :  { %1418 = vmatprep.subr.mxu0 %v5175_v49  ;;  %1489 = vmatprep.subr.mxu1 %v5178_v50  ;;  %v6724_v50 = vld [vmem:[#allocation56_spill] sm:$0xff] }
 0x48d   :  { %1419 = vmatpush1.msra.mxu0 %v5181_v2  ;;  %1490 = vmatpush1.msra.mxu1 %v5184_v62  ;;  %v6723_v2 = vld [vmem:[#allocation58_spill] sm:$0xff] }
 0x48e   :  { %1420 = vmatprep.subr.mxu0 %v5187_v54  ;;  %1491 = vmatprep.subr.mxu1 %v5190_v53 }
 0x48f   :  { %1421 = vmatpush1.msra.mxu0 %v5193_v5  ;;  %1492 = vmatpush1.msra.mxu1 %v5196_v6  ;;  %v6722_v5 = vld [vmem:[#allocation57_spill] sm:$0xff] }
 0x490   :  { %1422 = vmatprep.subr.mxu0 %v5199_v7  ;;  %1493 = vmatprep.subr.mxu1 %v5202_v8  ;;  %v5217_v7 = vld [vmem:[#allocation12] sm:$0xff]  ;;  %v5221_v8 = vld [vmem:[#allocation12 + $0x10] sm:$0xff] }
 0x491   :  { %1423 = vmatpush1.msra.mxu0 %v5205_v9  ;;  %1494 = vmatpush1.msra.mxu1 %v5208_v12  ;;  %6719 = vst [vmem:[#allocation39_spill] sm:$0xff] %v5217_v7  ;;  %6720 = vst [vmem:[#allocation40_spill] sm:$0xff] %v5221_v8  ;;  %v6721_v12 = vld [vmem:[#allocation55_spill] sm:$0xff] }
 0x492   :  { %1424 = vmatprep.subr.mxu0 %v5211_v13  ;;  %1495 = vmatprep.subr.mxu1 %v5214_v14 }
 0x493   :  { %1425 = vmatpush1.msra.mxu0 %v5217_v7  ;;  %1458 = vmatprep.mubr.f32.mxu0 %v6686_v23 }
 0x494   :  { %1496 = vmatpush1.msra.mxu1 %v5221_v8  ;;  %1529 = vmatprep.mubr.f32.mxu1 %v6686_v23 }
 0x495   :  { %1569 = vmatprep.subr.mxu0 %v4941_v25  ;;  %1640 = vmatprep.subr.mxu1 %v4944_v26 }
 0x534   :  { %v1285_v13 = vpop.f32.mrf.mxu0  ;;  %v1356_v7 = vpop.f32.mrf.mxu1 }
 0x535   :  { %v1361_v9 = vadd.f32 %v1285_v13, %v6721_v12  ;;  %v1363_v23 = vadd.f32 %v1356_v7, %v6724_v50  ;;  %v6731_v7 = vld [vmem:[#allocation29_spill] sm:$0xff] }
 0x536   :  { %v1287_v14 = vpop.f32.mrf.mxu0  ;;  %v1358_v62 = vpop.f32.mrf.mxu1 }
 0x537   :  { %v3779_v6 = vmul.f32 -1.442695, %v1361_v9  ;;  %v1362_v53 = vadd.f32 %v1287_v14, %v6722_v5  ;;  %v1364_v8 = vadd.f32 %v1358_v62, %v6723_v2  ;;  %v6730_v62 = vld [vmem:[#allocation28_spill] sm:$0xff] }
 0x539   :  { %3892 = vpow2.f32 %v3779_v6  ;;  %v3780_v54 = vmul.f32 -1.442695, %v1362_v53  ;;  %v3781_v49 = vmul.f32 -1.442695, %v1364_v8  ;;  %v6732_v8 = vld [vmem:[#allocation30_spill] sm:$0xff] }
 0x53b   :  { %3894 = vpow2.f32 %v3780_v54 }
 0x53c   :  { %3896 = vtanh.f32 %v1363_v23 }
 0x53d   :  { %3898 = vpow2.f32 %v3781_v49  ;;  %v6729_v49 = vld [vmem:[#allocation27_spill] sm:$0xff] }
 0x546   :  { %v3893_v25 = vpop.eup %3892 }
 0x547   :  { %v1368_v48 = vadd.f32 1.0, %v3893_v25 }
 0x548   :  { %v3895_v26 = vpop.eup %3894 }
 0x549   :  { %3900 = vrcp.f32 %v1368_v48  ;;  %v1374_v12 = vadd.f32 1.0, %v3895_v26  ;;  %v3897_v9 = vpop.eup %3896  ;;  %v6726_v26 = vld [vmem:[#allocation46_spill] sm:$0xff] }
 0x54a   :  { %v3899_v14 = vpop.eup %3898  ;;  %v6728_v48 = vld [vmem:[#allocation26_spill] sm:$0xff] }
 0x54b   :  { %3902 = vrcp.f32 %v1374_v12  ;;  %v1381_v54 = vadd.f32 1.0, %v3899_v14  ;;  %v6733_v12 = vld [vmem:[#allocation31_spill] sm:$0xff]  ;;  %v6735_v14 = vld [vmem:[#allocation33_spill] sm:$0xff] }
 0x54d   :  { %3904 = vrcp.f32 %v1381_v54  ;;  %v6739_v54 = vld [vmem:[#allocation37_spill] sm:$0xff] }
 0x556   :  { %v3901_v5 = vpop.eup %3900 }
 0x557   :  { %v1385_v6 = vmul.f32 %v3901_v5, %v3897_v9  ;;  %v6734_v9 = vld [vmem:[#allocation32_spill] sm:$0xff]  ;;  %v6736_v5 = vld [vmem:[#allocation34_spill] sm:$0xff] }
 0x558   :  { %v3903_v53 = vpop.eup %3902 }
 0x559   :  { %v1384_v13 = vmul.f32 %v3903_v53, %v5078_v10  ;;  %v6727_v10 = vld [vmem:[#allocation44_spill] sm:$0xff] }
 0x55a   :  { %v3905_v25 = vpop.eup %3904  ;;  %v6738_v53 = vld [vmem:[#allocation36_spill] sm:$0xff] }
 0x55b   :  { %v5232_v2 = vadd.f32 %v1385_v6, %v1384_v13  ;;  %v6737_v6 = vld [vmem:[#allocation35_spill] sm:$0xff]  ;;  %v6740_v13 = vld [vmem:[#allocation38_spill] sm:$0xff] }
 0x55d   :  { %3906 = vtanh.f32 %v5232_v2 }
 0x56a   :  { %v3907_v23 = vpop.eup %3906 }
 0x56b   :  { %v5235_v50 = vmul.f32 %v3907_v23, %v3905_v25  ;;  %v6741_v25 = vld [vmem:[#allocation39_spill] sm:$0xff]  ;;  %v6742_v23 = vmov 0.0  }
 0x56d   :  { %6725 = vst [vmem:[#allocation41_spill] sm:$0xff] %v5235_v50  ;;  %1459 = vmatmul.mubr.f32.vlgmr.msra.gmra.mxu0 %v5235_v50  ;;  %1530 = vmatmul.mubr.f32.vlgmr.msra.gmra.mxu1 %v5235_v50  ;;  %v6743_v50 = vld [vmem:[#allocation40_spill] sm:$0xff] }
 0x56e   :  { %1570 = vmatpush1.msra.mxu0 %v4959_v29  ;;  %1641 = vmatpush1.msra.mxu1 %v4962_v0 }
 0x56f   :  { %1571 = vmatprep.subr.mxu0 %v4965_v20  ;;  %1642 = vmatprep.subr.mxu1 %v4968_v59 }
 0x570   :  { %1572 = vmatpush1.msra.mxu0 %v4971_v57  ;;  %1643 = vmatpush1.msra.mxu1 %v4974_v56 }
 0x571   :  { %1573 = vmatprep.subr.mxu0 %v4977_v55  ;;  %1644 = vmatprep.subr.mxu1 %v4980_v60 }
 0x572   :  { %1574 = vmatpush1.msra.mxu0 %v4983_v61  ;;  %1645 = vmatpush1.msra.mxu1 %v4986_v1 }
 0x573   :  { %1575 = vmatprep.subr.mxu0 %v4989_v58  ;;  %1646 = vmatprep.subr.mxu1 %v4992_v38 }
 0x574   :  { %1576 = vmatpush1.msra.mxu0 %v4995_v47  ;;  %1647 = vmatpush1.msra.mxu1 %v4998_v27 }
 0x575   :  { %1577 = vmatprep.subr.mxu0 %v5001_v28  ;;  %1648 = vmatprep.subr.mxu1 %v5004_v30 }
 0x576   :  { %1578 = vmatpush1.msra.mxu0 %v6702_v15  ;;  %1649 = vmatpush1.msra.mxu1 %v6703_v16 }
 0x577   :  { %1579 = vmatprep.subr.mxu0 %v5013_v63  ;;  %1650 = vmatprep.subr.mxu1 %v5016_v51 }
 0x578   :  { %1580 = vmatpush1.msra.mxu0 %v5019_v4  ;;  %1651 = vmatpush1.msra.mxu1 %v5022_v52 }
 0x579   :  { %1581 = vmatprep.subr.mxu0 %v5025_v31  ;;  %1652 = vmatprep.subr.mxu1 %v5028_v3 }
 0x57a   :  { %1582 = vmatpush1.msra.mxu0 %v5109_v17  ;;  %1653 = vmatpush1.msra.mxu1 %v5112_v18 }
 0x57b   :  { %1583 = vmatprep.subr.mxu0 %v5115_v19  ;;  %1654 = vmatprep.subr.mxu1 %v5118_v21 }
 0x57c   :  { %1584 = vmatpush1.msra.mxu0 %v5121_v22  ;;  %1655 = vmatpush1.msra.mxu1 %v5124_v24 }
 0x57d   :  { %1585 = vmatprep.subr.mxu0 %v5127_v11  ;;  %1656 = vmatprep.subr.mxu1 %v5130_v32 }
 0x57e   :  { %1586 = vmatpush1.msra.mxu0 %v5133_v33  ;;  %1657 = vmatpush1.msra.mxu1 %v5136_v34 }
 0x57f   :  { %1587 = vmatprep.subr.mxu0 %v5139_v35  ;;  %1658 = vmatprep.subr.mxu1 %v5142_v36 }
 0x580   :  { %1588 = vmatpush1.msra.mxu0 %v5145_v37  ;;  %1659 = vmatpush1.msra.mxu1 %v5148_v39 }
 0x581   :  { %1589 = vmatprep.subr.mxu0 %v5151_v40  ;;  %1660 = vmatprep.subr.mxu1 %v5154_v41 }
 0x582   :  { %1590 = vmatpush1.msra.mxu0 %v5157_v42  ;;  %1661 = vmatpush1.msra.mxu1 %v5160_v43 }
 0x583   :  { %1591 = vmatprep.subr.mxu0 %v5163_v44  ;;  %1662 = vmatprep.subr.mxu1 %v5166_v45 }
 0x584   :  { %1592 = vmatpush1.msra.mxu0 %v5169_v46  ;;  %1663 = vmatpush1.msra.mxu1 %v6726_v26 }
 0x585   :  { %1593 = vmatprep.subr.mxu0 %v6727_v10  ;;  %1664 = vmatprep.subr.mxu1 %v6728_v48  ;;  %v6749_v48 = vld [vmem:[#allocation60_spill] sm:$0xff] }
 0x586   :  { %1594 = vmatpush1.msra.mxu0 %v6729_v49  ;;  %1665 = vmatpush1.msra.mxu1 %v6730_v62  ;;  %v6748_v49 = vld [vmem:[#allocation62_spill] sm:$0xff] }
 0x587   :  { %1595 = vmatprep.subr.mxu0 %v6731_v7  ;;  %1666 = vmatprep.subr.mxu1 %v6732_v8 }
 0x588   :  { %1596 = vmatpush1.msra.mxu0 %v6733_v12  ;;  %1667 = vmatpush1.msra.mxu1 %v6734_v9  ;;  %v6744_v9 = vld [vmem:[#allocation23_spill] sm:$0xff] }
 0x589   :  { %1597 = vmatprep.subr.mxu0 %v6735_v14  ;;  %1668 = vmatprep.subr.mxu1 %v6736_v5  ;;  %v6745_v14 = vld [vmem:[#allocation24_spill] sm:$0xff] }
 0x58a   :  { %1598 = vmatpush1.msra.mxu0 %v6737_v6  ;;  %1669 = vmatpush1.msra.mxu1 %v6738_v53  ;;  %v6746_v6 = vld [vmem:[#allocation59_spill] sm:$0xff] }
 0x58b   :  { %1599 = vmatprep.subr.mxu0 %v6739_v54  ;;  %1670 = vmatprep.subr.mxu1 %v6740_v13  ;;  %v6747_v54 = vld [vmem:[#allocation61_spill] sm:$0xff] }
 0x58c   :  { %1600 = vmatpush1.msra.mxu0 %v6741_v25  ;;  %1633 = vmatprep.mubr.f32.mxu0 %v6742_v23 }
 0x58d   :  { %1671 = vmatpush1.msra.mxu1 %v6743_v50  ;;  %1704 = vmatprep.mubr.f32.mxu1 %v6742_v23 }
 0x58e   :  { %1744 = vmatprep.subr.mxu0 %v6744_v9  ;;  %1815 = vmatprep.subr.mxu1 %v6745_v14 }
 0x62d   :  { %v1460_v5 = vpop.f32.mrf.mxu0  ;;  %v1531_v13 = vpop.f32.mrf.mxu1 }
 0x62e   :  { %v1536_v12 = vadd.f32 %v1460_v5, %v6746_v6  ;;  %v1538_v23 = vadd.f32 %v1531_v13, %v6749_v48 }
 0x62f   :  { %v1462_v53 = vpop.f32.mrf.mxu0  ;;  %v1533_v62 = vpop.f32.mrf.mxu1 }
 0x630   :  { %v3782_v8 = vmul.f32 -1.442695, %v1536_v12  ;;  %v1537_v7 = vadd.f32 %v1462_v53, %v6747_v54  ;;  %v1539_v50 = vadd.f32 %v1533_v62, %v6748_v49 }
 0x632   :  { %3908 = vpow2.f32 %v3782_v8  ;;  %v3783_v25 = vmul.f32 -1.442695, %v1537_v7  ;;  %v3784_v10 = vmul.f32 -1.442695, %v1539_v50 }
 0x634   :  { %3910 = vpow2.f32 %v3783_v25 }
 0x635   :  { %3912 = vtanh.f32 %v1538_v23 }
 0x636   :  { %3914 = vpow2.f32 %v3784_v10 }
 0x63f   :  { %v3909_v9 = vpop.eup %3908 }
 0x640   :  { %v1543_v26 = vadd.f32 1.0, %v3909_v9  ;;  %v1985_v9 = vld [vmem:[#allocation11 + $0x1e0] sm:$0xff] }
 0x641   :  { %v3911_v14 = vpop.eup %3910 }
 0x642   :  { %3916 = vrcp.f32 %v1543_v26  ;;  %v1549_v5 = vadd.f32 1.0, %v3911_v14  ;;  %v3913_v12 = vpop.eup %3912  ;;  %v1987_v14 = vld [vmem:[#allocation11 + $0x1f0] sm:$0xff] }
 0x643   :  { %v3915_v6 = vpop.eup %3914 }
 0x644   :  { %3918 = vrcp.f32 %v1549_v5  ;;  %v1556_v54 = vadd.f32 1.0, %v3915_v6  ;;  %v1982_v5 = vld [vmem:[#allocation11 + $0x1c8] sm:$0xff]  ;;  %v1981_v6 = vld [vmem:[#allocation11 + $0x1c0] sm:$0xff] }
 0x646   :  { %3920 = vrcp.f32 %v1556_v54  ;;  %v1977_v54 = vld [vmem:[#allocation11 + $0x1a0] sm:$0xff] }
 0x64f   :  { %v3917_v8 = vpop.eup %3916 }
 0x650   :  { %v1560_v53 = vmul.f32 %v3917_v8, %v3913_v12  ;;  %v1984_v12 = vld [vmem:[#allocation11 + $0x1d8] sm:$0xff]  ;;  %v1983_v8 = vld [vmem:[#allocation11 + $0x1d0] sm:$0xff] }
 0x651   :  { %v3919_v7 = vpop.eup %3918 }
 0x652   :  { %v1559_v25 = vmul.f32 %v3919_v7, %v5232_v2  ;;  %v1980_v7 = vld [vmem:[#allocation11 + $0x1b8] sm:$0xff] }
 0x653   :  { %v3921_v50 = vpop.eup %3920 }
 0x654   :  { %v5310_v49 = vadd.f32 %v1560_v53, %v1559_v25  ;;  %v1978_v53 = vld [vmem:[#allocation11 + $0x1a8] sm:$0xff]  ;;  %v1979_v25 = vld [vmem:[#allocation11 + $0x1b0] sm:$0xff] }
 0x656   :  { %3922 = vtanh.f32 %v5310_v49 }
 0x663   :  { %v3923_v48 = vpop.eup %3922 }
 0x664   :  { %v5313_v62 = vmul.f32 %v3923_v48, %v3921_v50  ;;  %v1976_v50 = vld [vmem:[#allocation11 + $0x198] sm:$0xff]  ;;  %v1973_v48 = vld [vmem:[#allocation11 + $0x180] sm:$0xff] }
 0x666   :  { %1634 = vmatmul.mubr.f32.vlgmr.msra.gmra.mxu0 %v5313_v62  ;;  %1705 = vmatmul.mubr.f32.vlgmr.msra.gmra.mxu1 %v5313_v62 }
 0x667   :  { %1745 = vmatpush1.msra.mxu0 %v4959_v29  ;;  %1816 = vmatpush1.msra.mxu1 %v4962_v0  ;;  %v6752_v29 = vld [vmem:[#allocation26_spill] sm:$0xff]  ;;  %v6753_v0 = vld [vmem:[#allocation27_spill] sm:$0xff] }
 0x668   :  { %1746 = vmatprep.subr.mxu0 %v4965_v20  ;;  %1817 = vmatprep.subr.mxu1 %v4968_v59  ;;  %v6754_v20 = vld [vmem:[#allocation28_spill] sm:$0xff]  ;;  %v6755_v59 = vld [vmem:[#allocation29_spill] sm:$0xff] }
 0x669   :  { %1747 = vmatpush1.msra.mxu0 %v4971_v57  ;;  %1818 = vmatpush1.msra.mxu1 %v4974_v56  ;;  %v6756_v57 = vld [vmem:[#allocation30_spill] sm:$0xff]  ;;  %v6757_v56 = vld [vmem:[#allocation31_spill] sm:$0xff] }
 0x66a   :  { %1748 = vmatprep.subr.mxu0 %v4977_v55  ;;  %1819 = vmatprep.subr.mxu1 %v4980_v60  ;;  %v6758_v55 = vld [vmem:[#allocation32_spill] sm:$0xff]  ;;  %v6759_v60 = vld [vmem:[#allocation33_spill] sm:$0xff] }
 0x66b   :  { %1749 = vmatpush1.msra.mxu0 %v4983_v61  ;;  %1820 = vmatpush1.msra.mxu1 %v4986_v1  ;;  %v6760_v61 = vld [vmem:[#allocation34_spill] sm:$0xff]  ;;  %v6761_v1 = vld [vmem:[#allocation35_spill] sm:$0xff] }
 0x66c   :  { %1750 = vmatprep.subr.mxu0 %v4989_v58  ;;  %1821 = vmatprep.subr.mxu1 %v4992_v38  ;;  %v6762_v58 = vld [vmem:[#allocation36_spill] sm:$0xff]  ;;  %v6763_v38 = vld [vmem:[#allocation37_spill] sm:$0xff] }
 0x66d   :  { %1751 = vmatpush1.msra.mxu0 %v4995_v47  ;;  %1822 = vmatpush1.msra.mxu1 %v4998_v27  ;;  %v6764_v47 = vld [vmem:[#allocation38_spill] sm:$0xff]  ;;  %v6765_v27 = vld [vmem:[#allocation39_spill] sm:$0xff] }
 0x66e   :  { %1752 = vmatprep.subr.mxu0 %v5001_v28  ;;  %1823 = vmatprep.subr.mxu1 %v5004_v30  ;;  %v6766_v28 = vld [vmem:[#allocation40_spill] sm:$0xff]  ;;  %v6767_v30 = vmov 0.0  }
 0x66f   :  { %1753 = vmatpush1.msra.mxu0 %v6702_v15  ;;  %1824 = vmatpush1.msra.mxu1 %v6703_v16 }
 0x670   :  { %1754 = vmatprep.subr.mxu0 %v5013_v63  ;;  %1825 = vmatprep.subr.mxu1 %v5016_v51  ;;  %v6768_v51 = vld [vmem:[#allocation63_spill] sm:$0xff] }
 0x671   :  { %1755 = vmatpush1.msra.mxu0 %v5019_v4  ;;  %1826 = vmatpush1.msra.mxu1 %v5022_v52  ;;  %v6750_v52 = vld [vmem:[#allocation46_spill] sm:$0xff]  ;;  %v6751_v4 = vld [vmem:[#allocation44_spill] sm:$0xff] }
 0x672   :  { %1756 = vmatprep.subr.mxu0 %v5025_v31  ;;  %1827 = vmatprep.subr.mxu1 %v5028_v3  ;;  %v1986_v31 = vld [vmem:[#allocation11 + $0x1e8] sm:$0xff]  ;;  %v1988_v3 = vld [vmem:[#allocation11 + $0x1f8] sm:$0xff] }
 0x673   :  { %1757 = vmatpush1.msra.mxu0 %v5109_v17  ;;  %1828 = vmatpush1.msra.mxu1 %v5112_v18  ;;  %v6769_v18 = vld [vmem:[#allocation65_spill] sm:$0xff] }
 0x674   :  { %1758 = vmatprep.subr.mxu0 %v5115_v19  ;;  %1829 = vmatprep.subr.mxu1 %v5118_v21 }
 0x675   :  { %1759 = vmatpush1.msra.mxu0 %v5121_v22  ;;  %1830 = vmatpush1.msra.mxu1 %v5124_v24 }
 0x676   :  { %1760 = vmatprep.subr.mxu0 %v5127_v11  ;;  %1831 = vmatprep.subr.mxu1 %v5130_v32  ;;  %v6770_v11 = vld [vmem:[#allocation66_spill] sm:$0xff] }
 0x677   :  { %1761 = vmatpush1.msra.mxu0 %v5133_v33  ;;  %1832 = vmatpush1.msra.mxu1 %v5136_v34  ;;  %v6771_v33 = vld [vmem:[#allocation64_spill] sm:$0xff] }
 0x678   :  { %1762 = vmatprep.subr.mxu0 %v5139_v35  ;;  %1833 = vmatprep.subr.mxu1 %v5142_v36 }
 0x679   :  { %1763 = vmatpush1.msra.mxu0 %v5145_v37  ;;  %1834 = vmatpush1.msra.mxu1 %v5148_v39 }
 0x67a   :  { %1764 = vmatprep.subr.mxu0 %v5151_v40  ;;  %1835 = vmatprep.subr.mxu1 %v5154_v41 }
 0x67b   :  { %1765 = vmatpush1.msra.mxu0 %v5157_v42  ;;  %1836 = vmatpush1.msra.mxu1 %v5160_v43 }
 0x67c   :  { %1766 = vmatprep.subr.mxu0 %v5163_v44  ;;  %1837 = vmatprep.subr.mxu1 %v5166_v45 }
 0x67d   :  { %1767 = vmatpush1.msra.mxu0 %v5169_v46  ;;  %1838 = vmatpush1.msra.mxu1 %v6750_v52  ;;  %v1975_v52 = vld [vmem:[#allocation11 + $0x190] sm:$0xff] }
 0x67e   :  { %1768 = vmatprep.subr.mxu0 %v6751_v4  ;;  %1839 = vmatprep.subr.mxu1 %v6752_v29  ;;  %v1970_v4 = vld [vmem:[#allocation11 + $0x168] sm:$0xff]  ;;  %v1972_v29 = vld [vmem:[#allocation11 + $0x178] sm:$0xff] }
 0x67f   :  { %1769 = vmatpush1.msra.mxu0 %v6753_v0  ;;  %1840 = vmatpush1.msra.mxu1 %v6754_v20  ;;  %v1969_v0 = vld [vmem:[#allocation11 + $0x160] sm:$0xff]  ;;  %v1971_v20 = vld [vmem:[#allocation11 + $0x170] sm:$0xff] }
 0x680   :  { %1770 = vmatprep.subr.mxu0 %v6755_v59  ;;  %1841 = vmatprep.subr.mxu1 %v6756_v57  ;;  %v1966_v59 = vld [vmem:[#allocation11 + $0x148] sm:$0xff]  ;;  %v1968_v57 = vld [vmem:[#allocation11 + $0x158] sm:$0xff] }
 0x681   :  { %1771 = vmatpush1.msra.mxu0 %v6757_v56  ;;  %1842 = vmatpush1.msra.mxu1 %v6758_v55  ;;  %v1965_v56 = vld [vmem:[#allocation11 + $0x140] sm:$0xff]  ;;  %v1967_v55 = vld [vmem:[#allocation11 + $0x150] sm:$0xff] }
 0x682   :  { %1772 = vmatprep.subr.mxu0 %v6759_v60  ;;  %1843 = vmatprep.subr.mxu1 %v6760_v61  ;;  %v1962_v60 = vld [vmem:[#allocation11 + $0x128] sm:$0xff]  ;;  %v1964_v61 = vld [vmem:[#allocation11 + $0x138] sm:$0xff] }
 0x683   :  { %1773 = vmatpush1.msra.mxu0 %v6761_v1  ;;  %1844 = vmatpush1.msra.mxu1 %v6762_v58  ;;  %v1961_v1 = vld [vmem:[#allocation11 + $0x120] sm:$0xff]  ;;  %v1963_v58 = vld [vmem:[#allocation11 + $0x130] sm:$0xff] }
 0x684   :  { %1774 = vmatprep.subr.mxu0 %v6763_v38  ;;  %1845 = vmatprep.subr.mxu1 %v6764_v47  ;;  %v1958_v38 = vld [vmem:[#allocation11 + $0x108] sm:$0xff]  ;;  %v1960_v47 = vld [vmem:[#allocation11 + $0x118] sm:$0xff] }
 0x685   :  { %1775 = vmatpush1.msra.mxu0 %v6765_v27  ;;  %1846 = vmatpush1.msra.mxu1 %v6766_v28  ;;  %v1957_v27 = vld [vmem:[#allocation11 + $0x100] sm:$0xff]  ;;  %v1959_v28 = vld [vmem:[#allocation11 + $0x110] sm:$0xff] }
 0x686   :  { %1808 = vmatprep.mubr.f32.mxu0 %v6767_v30  ;;  %1879 = vmatprep.mubr.f32.mxu1 %v6767_v30 }
 0x687   :  { %2012 = vmatprep.subr.mxu0 %v1986_v31  ;;  %2125 = vmatprep.subr.mxu1 %v1988_v3  ;;  %v1954_v31 = vld [vmem:[#allocation11 + $0xe8] sm:$0xff]  ;;  %v1956_v3 = vld [vmem:[#allocation11 + $0xf8] sm:$0xff] }
 0x726   :  { %v1635_v63 = vpop.f32.mrf.mxu0  ;;  %v1706_v21 = vpop.f32.mrf.mxu1 }
 0x727   :  { %v1711_v15 = vadd.f32 %v1635_v63, %v6768_v51  ;;  %v1713_v34 = vadd.f32 %v1706_v21, %v6771_v33  ;;  %v1953_v63 = vld [vmem:[#allocation11 + $0xe0] sm:$0xff]  ;;  %v1955_v51 = vld [vmem:[#allocation11 + $0xf0] sm:$0xff]  ;;  %v1948_v21 = vld [vmem:[#allocation11 + $0xb8] sm:$0xff] }
 0x728   :  { %v1637_v16 = vpop.f32.mrf.mxu0  ;;  %v1708_v24 = vpop.f32.mrf.mxu1  ;;  %v1941_v33 = vld [vmem:[#allocation11 + $0x80] sm:$0xff] }
 0x729   :  { %v3785_v17 = vmul.f32 -1.442695, %v1711_v15  ;;  %v1712_v19 = vadd.f32 %v1637_v16, %v6769_v18  ;;  %v1714_v32 = vadd.f32 %v1708_v24, %v6770_v11  ;;  %v1950_v15 = vld [vmem:[#allocation11 + $0xc8] sm:$0xff]  ;;  %v1952_v16 = vld [vmem:[#allocation11 + $0xd8] sm:$0xff]  ;;  %v1951_v18 = vld [vmem:[#allocation11 + $0xd0] sm:$0xff] }
 0x72a   :  { %v1947_v24 = vld [vmem:[#allocation11 + $0xb0] sm:$0xff]  ;;  %v1942_v11 = vld [vmem:[#allocation11 + $0x88] sm:$0xff] }
 0x72b   :  { %3924 = vpow2.f32 %v3785_v17  ;;  %v3786_v22 = vmul.f32 -1.442695, %v1712_v19  ;;  %v3787_v35 = vmul.f32 -1.442695, %v1714_v32  ;;  %v1949_v17 = vld [vmem:[#allocation11 + $0xc0] sm:$0xff]  ;;  %v1946_v19 = vld [vmem:[#allocation11 + $0xa8] sm:$0xff] }
 0x72c   :  { %v1944_v32 = vld [vmem:[#allocation11 + $0x98] sm:$0xff] }
 0x72d   :  { %3926 = vpow2.f32 %v3786_v22  ;;  %v1945_v22 = vld [vmem:[#allocation11 + $0xa0] sm:$0xff] }
 0x72e   :  { %3928 = vtanh.f32 %v1713_v34  ;;  %v1943_v34 = vld [vmem:[#allocation11 + $0x90] sm:$0xff] }
 0x72f   :  { %3930 = vpow2.f32 %v3787_v35  ;;  %v1938_v35 = vld [vmem:[#allocation11 + $0x68] sm:$0xff] }
 0x738   :  { %v3925_v36 = vpop.eup %3924 }
 0x739   :  { %v1718_v37 = vadd.f32 1.0, %v3925_v36  ;;  %v1940_v36 = vld [vmem:[#allocation11 + $0x78] sm:$0xff] }
 0x73a   :  { %v3927_v39 = vpop.eup %3926 }
 0x73b   :  { %3932 = vrcp.f32 %v1718_v37  ;;  %v1724_v40 = vadd.f32 1.0, %v3927_v39  ;;  %v3929_v41 = vpop.eup %3928  ;;  %v1937_v37 = vld [vmem:[#allocation11 + $0x60] sm:$0xff]  ;;  %v1939_v39 = vld [vmem:[#allocation11 + $0x70] sm:$0xff] }
 0x73c   :  { %v3931_v42 = vpop.eup %3930 }
 0x73d   :  { %3934 = vrcp.f32 %v1724_v40  ;;  %v1731_v46 = vadd.f32 1.0, %v3931_v42  ;;  %v1934_v40 = vld [vmem:[#allocation11 + $0x48] sm:$0xff]  ;;  %v1933_v42 = vld [vmem:[#allocation11 + $0x40] sm:$0xff] }
 0x73f   :  { %3936 = vrcp.f32 %v1731_v46  ;;  %v1929_v46 = vld [vmem:[#allocation11 + $0x20] sm:$0xff] }
 0x748   :  { %v3933_v43 = vpop.eup %3932 }
 0x749   :  { %v1735_v44 = vmul.f32 %v3933_v43, %v3929_v41  ;;  %v1936_v41 = vld [vmem:[#allocation11 + $0x58] sm:$0xff]  ;;  %v1935_v43 = vld [vmem:[#allocation11 + $0x50] sm:$0xff] }
 0x74a   :  { %v3935_v45 = vpop.eup %3934 }
 0x74b   :  { %v1734_v2 = vmul.f32 %v3935_v45, %v5310_v49  ;;  %v1974_v49 = vld [vmem:[#allocation11 + $0x188] sm:$0xff]  ;;  %v1932_v45 = vld [vmem:[#allocation11 + $0x38] sm:$0xff] }
 0x74c   :  { %v3937_v10 = vpop.eup %3936 }
 0x74d   :  { %v5386_v26 = vadd.f32 %v1735_v44, %v1734_v2  ;;  %v1930_v44 = vld [vmem:[#allocation11 + $0x28] sm:$0xff]  ;;  %v1931_v2 = vld [vmem:[#allocation11 + $0x30] sm:$0xff] }
 0x74f   :  { %3938 = vtanh.f32 %v5386_v26 }
 0x75c   :  { %v3939_v13 = vpop.eup %3938 }
 0x75d   :  { %v5389_v23 = vmul.f32 %v3939_v13, %v3937_v10  ;;  %v1926_v10 = vld [vmem:[#allocation11 + $0x8] sm:$0xff]  ;;  %v1928_v13 = vld [vmem:[#allocation11 + $0x18] sm:$0xff] }
 0x75f   :  { %1809 = vmatmul.mubr.f32.vlgmr.msra.gmra.mxu0 %v5389_v23  ;;  %1880 = vmatmul.mubr.f32.vlgmr.msra.gmra.mxu1 %v5389_v23 }
 0x760   :  { %2013 = vmatpush1.msra.mxu0 %v1985_v9  ;;  %2126 = vmatpush1.msra.mxu1 %v1987_v14  ;;  %v1925_v9 = vld [vmem:[#allocation11] sm:$0xff]  ;;  %v1927_v14 = vld [vmem:[#allocation11 + $0x10] sm:$0xff] }
 0x761   :  { %2014 = vmatprep.subr.mxu0 %v1982_v5  ;;  %2127 = vmatprep.subr.mxu1 %v1984_v12  ;;  %v6772_v5 = vld [vmem:[#allocation71_spill] sm:$0xff]  ;;  %v6773_v12 = vld [vmem:[#allocation22_spill] sm:$0xff] }
 0x762   :  { %2015 = vmatpush1.msra.mxu0 %v1981_v6  ;;  %2128 = vmatpush1.msra.mxu1 %v1983_v8  ;;  %v6774_v6 = vld [vmem:[#allocation25_spill] sm:$0xff] }
 0x763   :  { %2016 = vmatprep.subr.mxu0 %v1978_v53  ;;  %2129 = vmatprep.subr.mxu1 %v1980_v7  ;;  %v6775_v8 = vld [vmem:[#allocation45_spill] sm:$0xff]  ;;  %v5423_v7 = vld [vmem:[#allocation12 + $0x3e8] sm:$0xff] }
 0x764   :  { %2017 = vmatpush1.msra.mxu0 %v1977_v54  ;;  %2130 = vmatpush1.msra.mxu1 %v1979_v25  ;;  %v6776_v53 = vld [vmem:[#allocation41_spill] sm:$0xff]  ;;  %6777 = vst [vmem:[#allocation42_spill] sm:$0xff] %v5423_v7  ;;  %v5425_v54 = vld [vmem:[#allocation12 + $0x3f8] sm:$0xff] }
 0x765   :  { %2018 = vmatprep.subr.mxu0 %v1974_v49  ;;  %2131 = vmatprep.subr.mxu1 %v1976_v50  ;;  %6778 = vst [vmem:[#allocation47_spill] sm:$0xff] %v5425_v54  ;;  %v5431_v25 = vld [vmem:[#allocation12 + $0x3f0] sm:$0xff]  ;;  %v5437_v49 = vld [vmem:[#allocation12 + $0x3d8] sm:$0xff]  ;;  %v5441_v50 = vld [vmem:[#allocation12 + $0x3c0] sm:$0xff] }
 0x766   :  { %2019 = vmatpush1.msra.mxu0 %v1973_v48  ;;  %2132 = vmatpush1.msra.mxu1 %v1975_v52  ;;  %v5443_v48 = vld [vmem:[#allocation12 + $0x3d0] sm:$0xff]  ;;  %v5447_v52 = vld [vmem:[#allocation12 + $0x3a8] sm:$0xff] }
 0x767   :  { %2020 = vmatprep.subr.mxu0 %v1970_v4  ;;  %2133 = vmatprep.subr.mxu1 %v1972_v29  ;;  %v5449_v4 = vld [vmem:[#allocation12 + $0x3b8] sm:$0xff]  ;;  %v5453_v29 = vld [vmem:[#allocation12 + $0x3a0] sm:$0xff] }
 0x768   :  { %2021 = vmatpush1.msra.mxu0 %v1969_v0  ;;  %2134 = vmatpush1.msra.mxu1 %v1971_v20  ;;  %v5455_v0 = vld [vmem:[#allocation12 + $0x3b0] sm:$0xff]  ;;  %v5459_v20 = vld [vmem:[#allocation12 + $0x388] sm:$0xff] }
 0x769   :  { %2022 = vmatprep.subr.mxu0 %v1966_v59  ;;  %2135 = vmatprep.subr.mxu1 %v1968_v57  ;;  %v5461_v59 = vld [vmem:[#allocation12 + $0x398] sm:$0xff]  ;;  %v5465_v57 = vld [vmem:[#allocation12 + $0x380] sm:$0xff] }
 0x76a   :  { %2023 = vmatpush1.msra.mxu0 %v1965_v56  ;;  %2136 = vmatpush1.msra.mxu1 %v1967_v55  ;;  %v5467_v56 = vld [vmem:[#allocation12 + $0x390] sm:$0xff]  ;;  %v5471_v55 = vld [vmem:[#allocation12 + $0x368] sm:$0xff] }
 0x76b   :  { %2024 = vmatprep.subr.mxu0 %v1962_v60  ;;  %2137 = vmatprep.subr.mxu1 %v1964_v61  ;;  %v5473_v60 = vld [vmem:[#allocation12 + $0x378] sm:$0xff]  ;;  %v5477_v61 = vld [vmem:[#allocation12 + $0x360] sm:$0xff] }
 0x76c   :  { %2025 = vmatpush1.msra.mxu0 %v1961_v1  ;;  %2138 = vmatpush1.msra.mxu1 %v1963_v58  ;;  %v5479_v1 = vld [vmem:[#allocation12 + $0x370] sm:$0xff]  ;;  %v5483_v58 = vld [vmem:[#allocation12 + $0x348] sm:$0xff] }
 0x76d   :  { %2026 = vmatprep.subr.mxu0 %v1958_v38  ;;  %2139 = vmatprep.subr.mxu1 %v1960_v47  ;;  %v5485_v38 = vld [vmem:[#allocation12 + $0x358] sm:$0xff]  ;;  %v5489_v47 = vld [vmem:[#allocation12 + $0x340] sm:$0xff] }
 0x76e   :  { %2027 = vmatpush1.msra.mxu0 %v1957_v27  ;;  %2140 = vmatpush1.msra.mxu1 %v1959_v28  ;;  %v5491_v27 = vld [vmem:[#allocation12 + $0x350] sm:$0xff]  ;;  %v5495_v28 = vld [vmem:[#allocation12 + $0x328] sm:$0xff] }
 0x76f   :  { %2028 = vmatprep.subr.mxu0 %v1954_v31  ;;  %2141 = vmatprep.subr.mxu1 %v1956_v3  ;;  %v5497_v31 = vld [vmem:[#allocation12 + $0x338] sm:$0xff]  ;;  %v5501_v3 = vld [vmem:[#allocation12 + $0x320] sm:$0xff] }
 0x770   :  { %2029 = vmatpush1.msra.mxu0 %v1953_v63  ;;  %2142 = vmatpush1.msra.mxu1 %v1955_v51  ;;  %v5503_v63 = vld [vmem:[#allocation12 + $0x330] sm:$0xff]  ;;  %v5507_v51 = vld [vmem:[#allocation12 + $0x308] sm:$0xff] }
 0x771   :  { %2030 = vmatprep.subr.mxu0 %v1950_v15  ;;  %2143 = vmatprep.subr.mxu1 %v1952_v16  ;;  %v5509_v15 = vld [vmem:[#allocation12 + $0x318] sm:$0xff]  ;;  %v5513_v16 = vld [vmem:[#allocation12 + $0x300] sm:$0xff] }
 0x772   :  { %2031 = vmatpush1.msra.mxu0 %v1949_v17  ;;  %2144 = vmatpush1.msra.mxu1 %v1951_v18  ;;  %v5515_v17 = vld [vmem:[#allocation12 + $0x310] sm:$0xff]  ;;  %v5519_v18 = vld [vmem:[#allocation12 + $0x2e8] sm:$0xff] }
 0x773   :  { %2032 = vmatprep.subr.mxu0 %v1946_v19  ;;  %2145 = vmatprep.subr.mxu1 %v1948_v21  ;;  %v5521_v19 = vld [vmem:[#allocation12 + $0x2f8] sm:$0xff]  ;;  %v5525_v21 = vld [vmem:[#allocation12 + $0x2e0] sm:$0xff] }
 0x774   :  { %2033 = vmatpush1.msra.mxu0 %v1945_v22  ;;  %2146 = vmatpush1.msra.mxu1 %v1947_v24  ;;  %v5527_v22 = vld [vmem:[#allocation12 + $0x2f0] sm:$0xff]  ;;  %v5531_v24 = vld [vmem:[#allocation12 + $0x2c8] sm:$0xff] }
 0x775   :  { %2034 = vmatprep.subr.mxu0 %v1942_v11  ;;  %2147 = vmatprep.subr.mxu1 %v1944_v32  ;;  %v5533_v11 = vld [vmem:[#allocation12 + $0x2d8] sm:$0xff]  ;;  %v5537_v32 = vld [vmem:[#allocation12 + $0x2c0] sm:$0xff] }
 0x776   :  { %2035 = vmatpush1.msra.mxu0 %v1941_v33  ;;  %2148 = vmatpush1.msra.mxu1 %v1943_v34  ;;  %v5539_v33 = vld [vmem:[#allocation12 + $0x2d0] sm:$0xff]  ;;  %v5543_v34 = vld [vmem:[#allocation12 + $0x2a8] sm:$0xff] }
 0x777   :  { %2036 = vmatprep.subr.mxu0 %v1938_v35  ;;  %2149 = vmatprep.subr.mxu1 %v1940_v36  ;;  %v5545_v35 = vld [vmem:[#allocation12 + $0x2b8] sm:$0xff]  ;;  %v5549_v36 = vld [vmem:[#allocation12 + $0x2a0] sm:$0xff] }
 0x778   :  { %2037 = vmatpush1.msra.mxu0 %v1937_v37  ;;  %2150 = vmatpush1.msra.mxu1 %v1939_v39  ;;  %v5551_v37 = vld [vmem:[#allocation12 + $0x2b0] sm:$0xff]  ;;  %v5555_v39 = vld [vmem:[#allocation12 + $0x288] sm:$0xff] }
 0x779   :  { %2038 = vmatprep.subr.mxu0 %v1934_v40  ;;  %2151 = vmatprep.subr.mxu1 %v1936_v41  ;;  %6779 = vst [vmem:[#allocation49_spill] sm:$0xff] %v5551_v37  ;;  %6780 = vst [vmem:[#allocation50_spill] sm:$0xff] %v5555_v39  ;;  %v5557_v40 = vld [vmem:[#allocation12 + $0x298] sm:$0xff]  ;;  %v5561_v41 = vld [vmem:[#allocation12 + $0x280] sm:$0xff] }
 0x77a   :  { %2039 = vmatpush1.msra.mxu0 %v1933_v42  ;;  %2152 = vmatpush1.msra.mxu1 %v1935_v43  ;;  %6781 = vst [vmem:[#allocation48_spill] sm:$0xff] %v5557_v40  ;;  %6782 = vst [vmem:[#allocation51_spill] sm:$0xff] %v5561_v41  ;;  %v5563_v42 = vld [vmem:[#allocation12 + $0x290] sm:$0xff]  ;;  %v5567_v43 = vld [vmem:[#allocation12 + $0x268] sm:$0xff] }
 0x77b   :  { %2040 = vmatprep.subr.mxu0 %v1930_v44  ;;  %2153 = vmatprep.subr.mxu1 %v1932_v45  ;;  %6783 = vst [vmem:[#allocation53_spill] sm:$0xff] %v5563_v42  ;;  %6784 = vst [vmem:[#allocation54_spill] sm:$0xff] %v5567_v43  ;;  %v5569_v44 = vld [vmem:[#allocation12 + $0x278] sm:$0xff]  ;;  %v5573_v45 = vld [vmem:[#allocation12 + $0x260] sm:$0xff] }
 0x77c   :  { %2041 = vmatpush1.msra.mxu0 %v1929_v46  ;;  %2154 = vmatpush1.msra.mxu1 %v1931_v2  ;;  %6785 = vst [vmem:[#allocation52_spill] sm:$0xff] %v5569_v44  ;;  %6786 = vst [vmem:[#allocation20_spill] sm:$0xff] %v5573_v45  ;;  %v5575_v46 = vld [vmem:[#allocation12 + $0x270] sm:$0xff]  ;;  %v5579_v2 = vld [vmem:[#allocation12 + $0x248] sm:$0xff] }
 0x77d   :  { %2042 = vmatprep.subr.mxu0 %v1926_v10  ;;  %2155 = vmatprep.subr.mxu1 %v1928_v13  ;;  %6787 = vst [vmem:[#allocation21_spill] sm:$0xff] %v5575_v46  ;;  %6788 = vst [vmem:[#allocation55_spill] sm:$0xff] %v5579_v2  ;;  %v5581_v10 = vld [vmem:[#allocation12 + $0x258] sm:$0xff]  ;;  %v5585_v13 = vld [vmem:[#allocation12 + $0x240] sm:$0xff] }
 0x77e   :  { %2043 = vmatpush1.msra.mxu0 %v1925_v9  ;;  %2076 = vmatprep.mubr.f32.mxu0 %v6767_v30  ;;  %6789 = vst [vmem:[#allocation57_spill] sm:$0xff] %v5581_v10  ;;  %6790 = vst [vmem:[#allocation58_spill] sm:$0xff] %v5585_v13  ;;  %v5587_v9 = vld [vmem:[#allocation12 + $0x250] sm:$0xff] }
 0x77f   :  { %2156 = vmatpush1.msra.mxu1 %v1927_v14  ;;  %2189 = vmatprep.mubr.f32.mxu1 %v6767_v30  ;;  %6791 = vst [vmem:[#allocation56_spill] sm:$0xff] %v5587_v9  ;;  %v5591_v14 = vld [vmem:[#allocation12 + $0x228] sm:$0xff] }
 0x780   :  { %2077 = vmatmul.mubr.f32.vlgmr.msra.gmra.mxu0 %v6772_v5  ;;  %2190 = vmatmul.mubr.f32.vlgmr.msra.gmra.mxu1 %v6772_v5  ;;  %6792 = vst [vmem:[#allocation23_spill] sm:$0xff] %v5591_v14  ;;  %v5593_v5 = vld [vmem:[#allocation12 + $0x238] sm:$0xff] }
 0x781   :  { %2082 = vmatprep.mubr.f32.mxu0 %v6767_v30  ;;  %2195 = vmatprep.mubr.f32.mxu1 %v6767_v30  ;;  %6793 = vst [vmem:[#allocation24_spill] sm:$0xff] %v5593_v5 }
 0x782   :  { %2343 = vmatprep.subr.mxu0 %v5423_v7  ;;  %2414 = vmatprep.subr.mxu1 %v5425_v54 }
 0x783   :  { %2415 = vmatpush1.msra.mxu1 %v5431_v25 }
 0x784   :  { %2083 = vmatmul.mubr.f32.gmra.mxu0 %v6773_v12  ;;  %2196 = vmatmul.mubr.f32.gmra.mxu1 %v6773_v12  ;;  %v5597_v12 = vld [vmem:[#allocation12 + $0x220] sm:$0xff] }
 0x785   :  { %2088 = vmatprep.mubr.f32.mxu0 %v6767_v30  ;;  %2201 = vmatprep.mubr.f32.mxu1 %v6767_v30  ;;  %6794 = vst [vmem:[#allocation59_spill] sm:$0xff] %v5597_v12 }
 0x786   :  { %2416 = vmatprep.subr.mxu1 %v5437_v49 }
 0x787   :  { %2417 = vmatpush1.msra.mxu1 %v5443_v48 }
 0x788   :  { %2089 = vmatmul.mubr.f32.gmra.mxu0 %v6774_v6  ;;  %2202 = vmatmul.mubr.f32.gmra.mxu1 %v6774_v6  ;;  %v5599_v6 = vld [vmem:[#allocation12 + $0x230] sm:$0xff] }
 0x789   :  { %2094 = vmatprep.mubr.f32.mxu0 %v6767_v30  ;;  %2207 = vmatprep.mubr.f32.mxu1 %v6767_v30  ;;  %6795 = vst [vmem:[#allocation61_spill] sm:$0xff] %v5599_v6 }
 0x78a   :  { %2418 = vmatprep.subr.mxu1 %v5449_v4 }
 0x78b   :  { %2419 = vmatpush1.msra.mxu1 %v5455_v0 }
 0x78c   :  { %2095 = vmatmul.mubr.f32.gmra.mxu0 %v6775_v8  ;;  %2208 = vmatmul.mubr.f32.gmra.mxu1 %v6775_v8  ;;  %v5603_v8 = vld [vmem:[#allocation12 + $0x208] sm:$0xff] }
 0x78d   :  { %2100 = vmatprep.mubr.f32.mxu0 %v6767_v30  ;;  %2213 = vmatprep.mubr.f32.mxu1 %v6767_v30  ;;  %6796 = vst [vmem:[#allocation62_spill] sm:$0xff] %v5603_v8 }
 0x78e   :  { %2420 = vmatprep.subr.mxu1 %v5461_v59 }
 0x78f   :  { %2421 = vmatpush1.msra.mxu1 %v5467_v56 }
 0x790   :  { %2101 = vmatmul.mubr.f32.gmra.mxu0 %v6776_v53  ;;  %2214 = vmatmul.mubr.f32.gmra.mxu1 %v6776_v53  ;;  %v5605_v53 = vld [vmem:[#allocation12 + $0x218] sm:$0xff] }
 0x791   :  { %2106 = vmatprep.mubr.f32.mxu0 %v6767_v30  ;;  %2219 = vmatprep.mubr.f32.mxu1 %v6767_v30  ;;  %6797 = vst [vmem:[#allocation60_spill] sm:$0xff] %v5605_v53 }
 0x792   :  { %2422 = vmatprep.subr.mxu1 %v5473_v60 }
 0x793   :  { %2423 = vmatpush1.msra.mxu1 %v5479_v1 }
 0x794   :  { %2107 = vmatmul.mubr.f32.gmra.mxu0 %v5313_v62  ;;  %2220 = vmatmul.mubr.f32.gmra.mxu1 %v5313_v62  ;;  %v5429_v62 = vld [vmem:[#allocation12 + $0x3e0] sm:$0xff] }
 0x795   :  { %2112 = vmatprep.mubr.f32.mxu0 %v6767_v30  ;;  %2225 = vmatprep.mubr.f32.mxu1 %v6767_v30 }
 0x796   :  { %2344 = vmatpush1.msra.mxu0 %v5429_v62  ;;  %2424 = vmatprep.subr.mxu1 %v5485_v38 }
 0x797   :  { %2425 = vmatpush1.msra.mxu1 %v5491_v27 }
 0x798   :  { %2113 = vmatmul.mubr.f32.gmra.mxu0 %v5389_v23  ;;  %2226 = vmatmul.mubr.f32.gmra.mxu1 %v5389_v23  ;;  %v5435_v23 = vld [vmem:[#allocation12 + $0x3c8] sm:$0xff] }
 0x799   :  { %2118 = vmatprep.mubr.f32.mxu0 %v6767_v30  ;;  %2231 = vmatprep.mubr.f32.mxu1 %v6767_v30 }
 0x79a   :  { %2345 = vmatprep.subr.mxu0 %v5435_v23  ;;  %2426 = vmatprep.subr.mxu1 %v5497_v31 }
 0x79b   :  { %2346 = vmatpush1.msra.mxu0 %v5441_v50  ;;  %2427 = vmatpush1.msra.mxu1 %v5503_v63 }
 0x79c   :  { %2347 = vmatprep.subr.mxu0 %v5447_v52  ;;  %2428 = vmatprep.subr.mxu1 %v5509_v15 }
 0x79d   :  { %2348 = vmatpush1.msra.mxu0 %v5453_v29  ;;  %2429 = vmatpush1.msra.mxu1 %v5515_v17 }
 0x79e   :  { %2349 = vmatprep.subr.mxu0 %v5459_v20  ;;  %2430 = vmatprep.subr.mxu1 %v5521_v19 }
 0x79f   :  { %2350 = vmatpush1.msra.mxu0 %v5465_v57  ;;  %2431 = vmatpush1.msra.mxu1 %v5527_v22 }
 0x7a0   :  { %2351 = vmatprep.subr.mxu0 %v5471_v55  ;;  %2432 = vmatprep.subr.mxu1 %v5533_v11 }
 0x7a1   :  { %2352 = vmatpush1.msra.mxu0 %v5477_v61  ;;  %2433 = vmatpush1.msra.mxu1 %v5539_v33 }
 0x7a2   :  { %2353 = vmatprep.subr.mxu0 %v5483_v58  ;;  %2434 = vmatprep.subr.mxu1 %v5545_v35 }
 0x7a3   :  { %2354 = vmatpush1.msra.mxu0 %v5489_v47  ;;  %2435 = vmatpush1.msra.mxu1 %v5551_v37 }
 0x7a4   :  { %2355 = vmatprep.subr.mxu0 %v5495_v28  ;;  %2436 = vmatprep.subr.mxu1 %v5557_v40 }
 0x7a5   :  { %2356 = vmatpush1.msra.mxu0 %v5501_v3  ;;  %2437 = vmatpush1.msra.mxu1 %v5563_v42 }
 0x7a6   :  { %2357 = vmatprep.subr.mxu0 %v5507_v51  ;;  %2438 = vmatprep.subr.mxu1 %v5569_v44  ;;  %v6802_v44 = vld [vmem:[#allocation70_spill] sm:$0xff] }
 0x7a7   :  { %2358 = vmatpush1.msra.mxu0 %v5513_v16  ;;  %2439 = vmatpush1.msra.mxu1 %v5575_v46 }
 0x7a8   :  { %2359 = vmatprep.subr.mxu0 %v5519_v18  ;;  %2440 = vmatprep.subr.mxu1 %v5581_v10 }
 0x7a9   :  { %2360 = vmatpush1.msra.mxu0 %v5525_v21  ;;  %2441 = vmatpush1.msra.mxu1 %v5587_v9  ;;  %v5607_v9 = vld [vmem:[#allocation12 + $0x200] sm:$0xff] }
 0x7aa   :  { %2361 = vmatprep.subr.mxu0 %v5531_v24  ;;  %2442 = vmatprep.subr.mxu1 %v5593_v5  ;;  %6798 = vst [vmem:[#allocation46_spill] sm:$0xff] %v5607_v9 }
 0x7ab   :  { %2362 = vmatpush1.msra.mxu0 %v5537_v32  ;;  %2443 = vmatpush1.msra.mxu1 %v5599_v6 }
 0x7ac   :  { %2363 = vmatprep.subr.mxu0 %v5543_v34  ;;  %2444 = vmatprep.subr.mxu1 %v5605_v53 }
 0x7ad   :  { %2364 = vmatpush1.msra.mxu0 %v5549_v36 }
 0x7ae   :  { %2365 = vmatprep.subr.mxu0 %v5555_v39 }
 0x7af   :  { %2366 = vmatpush1.msra.mxu0 %v5561_v41 }
 0x7b0   :  { %2367 = vmatprep.subr.mxu0 %v5567_v43  ;;  %v6803_v43 = vld [vmem:[#allocation68_spill] sm:$0xff] }
 0x7b1   :  { %2368 = vmatpush1.msra.mxu0 %v5573_v45 }
 0x7b2   :  { %2369 = vmatprep.subr.mxu0 %v5579_v2  ;;  %v6801_v2 = vld [vmem:[#allocation69_spill] sm:$0xff] }
 0x7b3   :  { %2370 = vmatpush1.msra.mxu0 %v5585_v13 }
 0x7b4   :  { %2371 = vmatprep.subr.mxu0 %v5591_v14  ;;  %v5611_v14 = vld [vmem:[#allocation12 + $0x210] sm:$0xff] }
 0x7b5   :  { %2372 = vmatpush1.msra.mxu0 %v5597_v12  ;;  %6799 = vst [vmem:[#allocation44_spill] sm:$0xff] %v5611_v14  ;;  %2445 = vmatpush1.msra.mxu1 %v5611_v14  ;;  %v6800_v12 = vld [vmem:[#allocation67_spill] sm:$0xff] }
 0x7b6   :  { %2373 = vmatprep.subr.mxu0 %v5603_v8  ;;  %2589 = vmatprep.subr.mxu1 %v5425_v54 }
 0x7b7   :  { %2374 = vmatpush1.msra.mxu0 %v5607_v9 }
 0x7b8   :  { %2518 = vmatprep.subr.mxu0 %v5423_v7 }
 0x81f   :  { %v1810_v6 = vpop.f32.mrf.mxu0  ;;  %v1881_v8 = vpop.f32.mrf.mxu1 }
 0x820   :  { %v1886_v5 = vadd.f32 %v1810_v6, %v6800_v12  ;;  %v1888_v14 = vadd.f32 %v1881_v8, %v6803_v43  ;;  %v6810_v8 = vld [vmem:[#allocation55_spill] sm:$0xff] }
 0x821   :  { %v1812_v13 = vpop.f32.mrf.mxu0  ;;  %v1883_v45 = vpop.f32.mrf.mxu1 }
 0x822   :  { %v3788_v10 = vmul.f32 -1.442695, %v1886_v5  ;;  %v1887_v46 = vadd.f32 %v1812_v13, %v6801_v2  ;;  %v1889_v9 = vadd.f32 %v1883_v45, %v6802_v44 }
 0x824   :  { %3940 = vpow2.f32 %v3788_v10  ;;  %v3789_v53 = vmul.f32 -1.442695, %v1887_v46  ;;  %v3790_v42 = vmul.f32 -1.442695, %v1889_v9  ;;  %v6808_v9 = vld [vmem:[#allocation20_spill] sm:$0xff] }
 0x826   :  { %3942 = vpow2.f32 %v3789_v53 }
 0x827   :  { %3944 = vtanh.f32 %v1888_v14  ;;  %v6809_v14 = vld [vmem:[#allocation21_spill] sm:$0xff] }
 0x828   :  { %3946 = vpow2.f32 %v3790_v42  ;;  %v6807_v42 = vld [vmem:[#allocation52_spill] sm:$0xff] }
 0x831   :  { %v3941_v7 = vpop.eup %3940 }
 0x832   :  { %v1893_v41 = vadd.f32 1.0, %v3941_v7 }
 0x833   :  { %v3943_v54 = vpop.eup %3942 }
 0x834   :  { %3948 = vrcp.f32 %v1893_v41  ;;  %v1899_v12 = vadd.f32 1.0, %v3943_v54  ;;  %v3945_v5 = vpop.eup %3944  ;;  %v6805_v54 = vld [vmem:[#allocation53_spill] sm:$0xff]  ;;  %v6806_v41 = vld [vmem:[#allocation54_spill] sm:$0xff] }
 0x835   :  { %v3947_v2 = vpop.eup %3946 }
 0x836   :  { %3950 = vrcp.f32 %v1899_v12  ;;  %v1906_v6 = vadd.f32 1.0, %v3947_v2  ;;  %v6811_v12 = vld [vmem:[#allocation57_spill] sm:$0xff]  ;;  %v6813_v2 = vld [vmem:[#allocation56_spill] sm:$0xff] }
 0x838   :  { %3952 = vrcp.f32 %v1906_v6  ;;  %v6817_v6 = vld [vmem:[#allocation61_spill] sm:$0xff] }
 0x841   :  { %v3949_v10 = vpop.eup %3948 }
 0x842   :  { %v1910_v13 = vmul.f32 %v3949_v10, %v3945_v5  ;;  %v6812_v5 = vld [vmem:[#allocation58_spill] sm:$0xff]  ;;  %v6814_v10 = vld [vmem:[#allocation23_spill] sm:$0xff] }
 0x843   :  { %v3951_v46 = vpop.eup %3950 }
 0x844   :  { %v1909_v53 = vmul.f32 %v3951_v46, %v5386_v26  ;;  %v6804_v26 = vld [vmem:[#allocation51_spill] sm:$0xff] }
 0x845   :  { %v3953_v43 = vpop.eup %3952  ;;  %v6816_v46 = vld [vmem:[#allocation59_spill] sm:$0xff] }
 0x846   :  { %v1911_v44 = vadd.f32 %v1910_v13, %v1909_v53  ;;  %v6815_v13 = vld [vmem:[#allocation24_spill] sm:$0xff]  ;;  %v6818_v53 = vld [vmem:[#allocation62_spill] sm:$0xff] }
 0x848   :  { %3954 = vtanh.f32 %v1911_v44  ;;  %v6819_v44 = vld [vmem:[#allocation60_spill] sm:$0xff] }
 0x855   :  { %v3955_v45 = vpop.eup %3954 }
 0x856   :  { %v1913_v7 = vmul.f32 %v3955_v45, %v3953_v43  ;;  %v6820_v43 = vld [vmem:[#allocation46_spill] sm:$0xff]  ;;  %v6821_v45 = vld [vmem:[#allocation44_spill] sm:$0xff] }
 0x858   :  { %2119 = vmatmul.mubr.f32.gmra.mxu0 %v1913_v7  ;;  %2232 = vmatmul.mubr.f32.gmra.mxu1 %v1913_v7  ;;  %v6822_v7 = vld [vmem:[#allocation42_spill] sm:$0xff] }
 0x859   :  { %2407 = vmatprep.mubr.f32.mxu0 %v6767_v30  ;;  %2478 = vmatprep.mubr.f32.mxu1 %v6767_v30 }
 0x85c   :  { %2408 = vmatmul.mubr.f32.vlgmr.msra.gmra.mxu0 %v6767_v30  ;;  %2479 = vmatmul.mubr.f32.vlgmr.msra.gmra.mxu1 %v6767_v30 }
 0x85d   :  { %2519 = vmatpush1.msra.mxu0 %v5429_v62  ;;  %2590 = vmatpush1.msra.mxu1 %v5431_v25 }
 0x85e   :  { %2520 = vmatprep.subr.mxu0 %v5435_v23  ;;  %2591 = vmatprep.subr.mxu1 %v5437_v49 }
 0x85f   :  { %2521 = vmatpush1.msra.mxu0 %v5441_v50  ;;  %2592 = vmatpush1.msra.mxu1 %v5443_v48 }
 0x860   :  { %2522 = vmatprep.subr.mxu0 %v5447_v52  ;;  %2593 = vmatprep.subr.mxu1 %v5449_v4 }
 0x861   :  { %2523 = vmatpush1.msra.mxu0 %v5453_v29  ;;  %2594 = vmatpush1.msra.mxu1 %v5455_v0 }
 0x862   :  { %2524 = vmatprep.subr.mxu0 %v5459_v20  ;;  %2595 = vmatprep.subr.mxu1 %v5461_v59 }
 0x863   :  { %2525 = vmatpush1.msra.mxu0 %v5465_v57  ;;  %2596 = vmatpush1.msra.mxu1 %v5467_v56 }
 0x864   :  { %2526 = vmatprep.subr.mxu0 %v5471_v55  ;;  %2597 = vmatprep.subr.mxu1 %v5473_v60 }
 0x865   :  { %2527 = vmatpush1.msra.mxu0 %v5477_v61  ;;  %2598 = vmatpush1.msra.mxu1 %v5479_v1 }
 0x866   :  { %2528 = vmatprep.subr.mxu0 %v5483_v58  ;;  %2599 = vmatprep.subr.mxu1 %v5485_v38 }
 0x867   :  { %2529 = vmatpush1.msra.mxu0 %v5489_v47  ;;  %2600 = vmatpush1.msra.mxu1 %v5491_v27 }
 0x868   :  { %2530 = vmatprep.subr.mxu0 %v5495_v28  ;;  %2601 = vmatprep.subr.mxu1 %v5497_v31 }
 0x869   :  { %2531 = vmatpush1.msra.mxu0 %v5501_v3  ;;  %2602 = vmatpush1.msra.mxu1 %v5503_v63 }
 0x86a   :  { %2532 = vmatprep.subr.mxu0 %v5507_v51  ;;  %2603 = vmatprep.subr.mxu1 %v5509_v15 }
 0x86b   :  { %2533 = vmatpush1.msra.mxu0 %v5513_v16  ;;  %2604 = vmatpush1.msra.mxu1 %v5515_v17 }
 0x86c   :  { %2534 = vmatprep.subr.mxu0 %v5519_v18  ;;  %2605 = vmatprep.subr.mxu1 %v5521_v19 }
 0x86d   :  { %2535 = vmatpush1.msra.mxu0 %v5525_v21  ;;  %2606 = vmatpush1.msra.mxu1 %v5527_v22 }
 0x86e   :  { %2536 = vmatprep.subr.mxu0 %v5531_v24  ;;  %2607 = vmatprep.subr.mxu1 %v5533_v11 }
 0x86f   :  { %2537 = vmatpush1.msra.mxu0 %v5537_v32  ;;  %2608 = vmatpush1.msra.mxu1 %v5539_v33 }
 0x870   :  { %2538 = vmatprep.subr.mxu0 %v5543_v34  ;;  %2609 = vmatprep.subr.mxu1 %v5545_v35 }
 0x871   :  { %2539 = vmatpush1.msra.mxu0 %v5549_v36  ;;  %2610 = vmatpush1.msra.mxu1 %v5551_v37 }
 0x872   :  { %2540 = vmatprep.subr.mxu0 %v5555_v39  ;;  %2611 = vmatprep.subr.mxu1 %v5557_v40 }
 0x873   :  { %2541 = vmatpush1.msra.mxu0 %v6804_v26  ;;  %2612 = vmatpush1.msra.mxu1 %v6805_v54 }
 0x874   :  { %2542 = vmatprep.subr.mxu0 %v6806_v41  ;;  %2613 = vmatprep.subr.mxu1 %v6807_v42 }
 0x875   :  { %2543 = vmatpush1.msra.mxu0 %v6808_v9  ;;  %2614 = vmatpush1.msra.mxu1 %v6809_v14 }
 0x876   :  { %2544 = vmatprep.subr.mxu0 %v6810_v8  ;;  %2615 = vmatprep.subr.mxu1 %v6811_v12 }
 0x877   :  { %2545 = vmatpush1.msra.mxu0 %v6812_v5  ;;  %2616 = vmatpush1.msra.mxu1 %v6813_v2 }
 0x878   :  { %2546 = vmatprep.subr.mxu0 %v6814_v10  ;;  %2617 = vmatprep.subr.mxu1 %v6815_v13  ;;  %v6823_v10 = vld [vmem:[#allocation47_spill] sm:$0xff]  ;;  %v2078_v13 = vpop.f32.mrf.mxu0 }
 0x879   :  { %2547 = vmatpush1.msra.mxu0 %v6816_v46  ;;  %2618 = vmatpush1.msra.mxu1 %v6817_v6  ;;  %v2191_v46 = vpop.f32.mrf.mxu1 }
 0x87a   :  { %2548 = vmatprep.subr.mxu0 %v6818_v53  ;;  %2619 = vmatprep.subr.mxu1 %v6819_v44  ;;  %v2080_v2 = vpop.f32.mrf.mxu0 }
 0x87b   :  { %2549 = vmatpush1.msra.mxu0 %v6820_v43  ;;  %2582 = vmatprep.mubr.f32.mxu0 %v6767_v30  ;;  %v2193_v6 = vpop.f32.mrf.mxu1 }
 0x87c   :  { %2620 = vmatpush1.msra.mxu1 %v6821_v45  ;;  %2653 = vmatprep.mubr.f32.mxu1 %v6767_v30  ;;  %v5692_v5 = vpop.f32.mrf.mxu0 }
 0x87d   :  { %2694 = vmatprep.subr.mxu0 %v6822_v7  ;;  %2765 = vmatprep.subr.mxu1 %v6823_v10  ;;  %6824 = vst [vmem:[#allocation26_spill] sm:$0xff] %v5692_v5  ;;  %v5694_v53 = vpop.f32.mrf.mxu1 }
 0x87e   :  { %6825 = vst [vmem:[#allocation27_spill] sm:$0xff] %v5694_v53  ;;  %v5696_v44 = vpop.f32.mrf.mxu0 }
 0x87f   :  { %6826 = vst [vmem:[#allocation28_spill] sm:$0xff] %v5696_v44  ;;  %v5698_v43 = vpop.f32.mrf.mxu1 }
 0x880   :  { %6827 = vst [vmem:[#allocation29_spill] sm:$0xff] %v5698_v43  ;;  %v5700_v12 = vpop.f32.mrf.mxu0 }
 0x881   :  { %6828 = vst [vmem:[#allocation30_spill] sm:$0xff] %v5700_v12  ;;  %v5702_v45 = vpop.f32.mrf.mxu1 }
 0x882   :  { %6829 = vst [vmem:[#allocation31_spill] sm:$0xff] %v5702_v45  ;;  %v5704_v30 = vpop.f32.mrf.mxu0 }
 0x883   :  { %6830 = vst [vmem:[#allocation32_spill] sm:$0xff] %v5704_v30  ;;  %v5706_v7 = vpop.f32.mrf.mxu1 }
 0x884   :  { %6831 = vst [vmem:[#allocation33_spill] sm:$0xff] %v5706_v7  ;;  %v5708_v10 = vpop.f32.mrf.mxu0 }
 0x885   :  { %6832 = vst [vmem:[#allocation34_spill] sm:$0xff] %v5708_v10  ;;  %v5710_v8 = vpop.f32.mrf.mxu1 }
 0x886   :  { %6833 = vst [vmem:[#allocation35_spill] sm:$0xff] %v5710_v8  ;;  %v5712_v14 = vpop.f32.mrf.mxu0 }
 0x887   :  { %6834 = vst [vmem:[#allocation36_spill] sm:$0xff] %v5712_v14  ;;  %v5714_v5 = vpop.f32.mrf.mxu1 }
 0x888   :  { %6835 = vst [vmem:[#allocation37_spill] sm:$0xff] %v5714_v5  ;;  %v5716_v53 = vpop.f32.mrf.mxu0  ;;  %v1990_v5 = vld [vmem:[#allocation14 + $0x4] sm:$0xf] }
 0x889   :  { %6836 = vst [vmem:[#allocation38_spill] sm:$0xff] %v5716_v53  ;;  %v5718_v44 = vpop.f32.mrf.mxu1 }
 0x88a   :  { %6837 = vst [vmem:[#allocation39_spill] sm:$0xff] %v5718_v44  ;;  %v5720_v43 = vpop.f32.mrf.mxu0  ;;  %v6847_v44 = vld [vmem:[#allocation43_spill] sm:$0xff] }
 0x88b   :  { %6838 = vst [vmem:[#allocation40_spill] sm:$0xff] %v5720_v43  ;;  %v5722_v12 = vpop.f32.mrf.mxu1  ;;  %v6848_v9 = vsub.s32 0, %v6847_v44 }
 0x88c   :  { %6839 = vst [vmem:[#allocation63_spill] sm:$0xff] %v5722_v12  ;;  %v5724_v45 = vpop.f32.mrf.mxu0 }
 0x88d   :  { %6840 = vst [vmem:[#allocation65_spill] sm:$0xff] %v5724_v45  ;;  %v5726_v30 = vpop.f32.mrf.mxu1  ;;  %v5740_v43 = vrot.slane %v1990_v5, %v6848_v9 }
 0x88e   :  { %6841 = vst [vmem:[#allocation66_spill] sm:$0xff] %v5726_v30  ;;  %v5728_v7 = vpop.f32.mrf.mxu0  ;;  %v6852_v30 = vsub.s32 1, %v6847_v44 }
 0x88f   :  { %6842 = vst [vmem:[#allocation64_spill] sm:$0xff] %v5728_v7  ;;  %v5730_v10 = vpop.f32.mrf.mxu1  ;;  %6849 = vst [vmem:[#allocation41_spill] sm:$0xff] %v5740_v43 }
 0x890   :  { %6843 = vst [vmem:[#allocation71_spill] sm:$0xff] %v5730_v10  ;;  %v5732_v8 = vpop.f32.mrf.mxu0  ;;  %v5748_v7 = vrot.slane %v1990_v5, %v6852_v30  ;;  %v6856_v30 = vsub.s32 3, %v6847_v44 }
 0x891   :  { %6844 = vst [vmem:[#allocation22_spill] sm:$0xff] %v5732_v8  ;;  %v5734_v14 = vpop.f32.mrf.mxu1 }
 0x892   :  { %6845 = vst [vmem:[#allocation25_spill] sm:$0xff] %v5734_v14  ;;  %v5736_v53 = vpop.f32.mrf.mxu0  ;;  %v2079_v14 = vadd.f32 %v2078_v13, %v5740_v43  ;;  %v5760_v39 = vrot.slane %v1990_v5, %v6856_v30 }
 0x893   :  { %6846 = vst [vmem:[#allocation45_spill] sm:$0xff] %v5736_v53  ;;  %v5742_v12 = vpop.f32.mrf.mxu1  ;;  %v2081_v53 = vadd.f32 %v2080_v2, %v5748_v7 }
 0x894   :  { %6850 = vst [vmem:[#allocation67_spill] sm:$0xff] %v5742_v12  ;;  %6857 = vst [vmem:[#allocation72_spill] sm:$0xff] %v5760_v39  ;;  %v2194_v13 = vadd.f32 %v2193_v6, %v5760_v39 }
 0x918   :  { %v5744_v45 = vpop.f32.mrf.mxu0  ;;  %v5750_v10 = vpop.f32.mrf.mxu1 }
 0x919   :  { %6851 = vst [vmem:[#allocation69_spill] sm:$0xff] %v5744_v45  ;;  %6853 = vst [vmem:[#allocation70_spill] sm:$0xff] %v5750_v10 }
 0x91a   :  { %v5752_v8 = vpop.f32.mrf.mxu0  ;;  %v5756_v41 = vpop.f32.mrf.mxu1 }
 0x91b   :  { %6854 = vst [vmem:[#allocation68_spill] sm:$0xff] %v5752_v8  ;;  %6855 = vst [vmem:[#allocation43_spill] sm:$0xff] %v5756_v41  ;;  %v6858_v8 = vsub.s32 2, %v6847_v44 }
 0x91c   :  { %v2409_v42 = vpop.f32.mrf.mxu0  ;;  %v2480_v45 = vpop.f32.mrf.mxu1 }
 0x91d   :  { %v2485_v9 = vadd.f32 %v2409_v42, %v2079_v14  ;;  %v5765_v2 = vrot.slane %v1990_v5, %v6858_v8 }
 0x91e   :  { %v2411_v54 = vpop.f32.mrf.mxu0  ;;  %v2482_v10 = vpop.f32.mrf.mxu1 }
 0x91f   :  { %v3791_v12 = vmul.f32 -1.442695, %v2485_v9  ;;  %v2486_v26 = vadd.f32 %v2411_v54, %v2081_v53  ;;  %v2488_v41 = vadd.f32 %v2482_v10, %v2194_v13  ;;  %v2192_v42 = vadd.f32 %v2191_v46, %v5765_v2  ;;  %v6860_v13 = vld [vmem:[#allocation48_spill] sm:$0xff] }
 0x921   :  { %3956 = vpow2.f32 %v3791_v12  ;;  %v3792_v40 = vmul.f32 -1.442695, %v2486_v26  ;;  %v3793_v14 = vmul.f32 -1.442695, %v2488_v41  ;;  %v2487_v12 = vadd.f32 %v2480_v45, %v2192_v42  ;;  %v6861_v42 = vld [vmem:[#allocation51_spill] sm:$0xff] }
 0x923   :  { %3958 = vpow2.f32 %v3792_v40 }
 0x924   :  { %3960 = vpow2.f32 %v3793_v14  ;;  %v6862_v14 = vld [vmem:[#allocation53_spill] sm:$0xff] }
 0x92e   :  { %v3957_v54 = vpop.eup %3956 }
 0x92f   :  { %v2492_v53 = vadd.f32 1.0, %v3957_v54  ;;  %v6863_v54 = vld [vmem:[#allocation54_spill] sm:$0xff] }
 0x930   :  { %v3959_v26 = vpop.eup %3958 }
 0x931   :  { %3962 = vrcp.f32 %v2492_v53  ;;  %v2498_v9 = vadd.f32 1.0, %v3959_v26  ;;  %v3961_v40 = vpop.eup %3960  ;;  %v6865_v53 = vld [vmem:[#allocation20_spill] sm:$0xff]  ;;  %v6866_v26 = vld [vmem:[#allocation21_spill] sm:$0xff] }
 0x932   :  { %3964 = vtanh.f32 %v2487_v12  ;;  %v2505_v44 = vadd.f32 1.0, %v3961_v40  ;;  %v6864_v12 = vld [vmem:[#allocation52_spill] sm:$0xff]  ;;  %v6868_v40 = vld [vmem:[#allocation57_spill] sm:$0xff] }
 0x933   :  { %3966 = vrcp.f32 %v2498_v9  ;;  %v6867_v9 = vld [vmem:[#allocation55_spill] sm:$0xff] }
 0x934   :  { %3968 = vrcp.f32 %v2505_v44  ;;  %v6871_v44 = vld [vmem:[#allocation23_spill] sm:$0xff] }
 0x93e   :  { %v3963_v30 = vpop.eup %3962 }
 0x93f   :  { %v3965_v6 = vpop.eup %3964 }
 0x940   :  { %v3967_v39 = vpop.eup %3966  ;;  %v2509_v5 = vmul.f32 %v3965_v6, %v3963_v30  ;;  %v6869_v30 = vld [vmem:[#allocation58_spill] sm:$0xff]  ;;  %v6870_v6 = vld [vmem:[#allocation56_spill] sm:$0xff] }
 0x941   :  { %v2508_v8 = vmul.f32 0.0, %v3967_v39  ;;  %v3969_v41 = vpop.eup %3968  ;;  %v6859_v39 = vld [vmem:[#allocation50_spill] sm:$0xff] }
 0x943   :  { %v5768_v10 = vadd.f32 %v2509_v5, %v2508_v8  ;;  %v6872_v8 = vld [vmem:[#allocation24_spill] sm:$0xff]  ;;  %v6873_v5 = vld [vmem:[#allocation59_spill] sm:$0xff] }
 0x945   :  { %3970 = vtanh.f32 %v5768_v10 }
 0x952   :  { %v3971_v46 = vpop.eup %3970 }
 0x953   :  { %v2512_v45 = vmul.f32 %v3971_v46, %v3969_v41  ;;  %v6874_v41 = vld [vmem:[#allocation61_spill] sm:$0xff]  ;;  %v6875_v46 = vld [vmem:[#allocation62_spill] sm:$0xff] }
 0x955   :  { %2513 = vst [vmem:[#allocation15] sm:$0xff] %v2512_v45  ;;  %2583 = vmatmul.mubr.f32.vlgmr.msra.gmra.mxu0 %v2512_v45  ;;  %2654 = vmatmul.mubr.f32.vlgmr.msra.gmra.mxu1 %v2512_v45  ;;  %v6876_v45 = vld [vmem:[#allocation60_spill] sm:$0xff] }
 0x956   :  { %2695 = vmatpush1.msra.mxu0 %v5429_v62  ;;  %2766 = vmatpush1.msra.mxu1 %v5431_v25 }
 0x957   :  { %2696 = vmatprep.subr.mxu0 %v5435_v23  ;;  %2767 = vmatprep.subr.mxu1 %v5437_v49 }
 0x958   :  { %2697 = vmatpush1.msra.mxu0 %v5441_v50  ;;  %2768 = vmatpush1.msra.mxu1 %v5443_v48 }
 0x959   :  { %2698 = vmatprep.subr.mxu0 %v5447_v52  ;;  %2769 = vmatprep.subr.mxu1 %v5449_v4 }
 0x95a   :  { %2699 = vmatpush1.msra.mxu0 %v5453_v29  ;;  %2770 = vmatpush1.msra.mxu1 %v5455_v0 }
 0x95b   :  { %2700 = vmatprep.subr.mxu0 %v5459_v20  ;;  %2771 = vmatprep.subr.mxu1 %v5461_v59 }
 0x95c   :  { %2701 = vmatpush1.msra.mxu0 %v5465_v57  ;;  %2772 = vmatpush1.msra.mxu1 %v5467_v56 }
 0x95d   :  { %2702 = vmatprep.subr.mxu0 %v5471_v55  ;;  %2773 = vmatprep.subr.mxu1 %v5473_v60 }
 0x95e   :  { %2703 = vmatpush1.msra.mxu0 %v5477_v61  ;;  %2774 = vmatpush1.msra.mxu1 %v5479_v1 }
 0x95f   :  { %2704 = vmatprep.subr.mxu0 %v5483_v58  ;;  %2775 = vmatprep.subr.mxu1 %v5485_v38 }
 0x960   :  { %2705 = vmatpush1.msra.mxu0 %v5489_v47  ;;  %2776 = vmatpush1.msra.mxu1 %v5491_v27 }
 0x961   :  { %2706 = vmatprep.subr.mxu0 %v5495_v28  ;;  %2777 = vmatprep.subr.mxu1 %v5497_v31 }
 0x962   :  { %2707 = vmatpush1.msra.mxu0 %v5501_v3  ;;  %2778 = vmatpush1.msra.mxu1 %v5503_v63 }
 0x963   :  { %2708 = vmatprep.subr.mxu0 %v5507_v51  ;;  %2779 = vmatprep.subr.mxu1 %v5509_v15 }
 0x964   :  { %2709 = vmatpush1.msra.mxu0 %v5513_v16  ;;  %2780 = vmatpush1.msra.mxu1 %v5515_v17 }
 0x965   :  { %2710 = vmatprep.subr.mxu0 %v5519_v18  ;;  %2781 = vmatprep.subr.mxu1 %v5521_v19 }
 0x966   :  { %2711 = vmatpush1.msra.mxu0 %v5525_v21  ;;  %2782 = vmatpush1.msra.mxu1 %v5527_v22 }
 0x967   :  { %2712 = vmatprep.subr.mxu0 %v5531_v24  ;;  %2783 = vmatprep.subr.mxu1 %v5533_v11 }
 0x968   :  { %2713 = vmatpush1.msra.mxu0 %v5537_v32  ;;  %2784 = vmatpush1.msra.mxu1 %v5539_v33 }
 0x969   :  { %2714 = vmatprep.subr.mxu0 %v5543_v34  ;;  %2785 = vmatprep.subr.mxu1 %v5545_v35 }
 0x96a   :  { %2715 = vmatpush1.msra.mxu0 %v5549_v36  ;;  %2786 = vmatpush1.msra.mxu1 %v5551_v37 }
 0x96b   :  { %2716 = vmatprep.subr.mxu0 %v6859_v39  ;;  %2787 = vmatprep.subr.mxu1 %v6860_v13  ;;  %v6886_v13 = vld [vmem:[#allocation27_spill] sm:$0xff] }
 0x96c   :  { %2717 = vmatpush1.msra.mxu0 %v6861_v42  ;;  %2788 = vmatpush1.msra.mxu1 %v6862_v14  ;;  %v6884_v14 = vld [vmem:[#allocation72_spill] sm:$0xff] }
 0x96d   :  { %2718 = vmatprep.subr.mxu0 %v6863_v54  ;;  %2789 = vmatprep.subr.mxu1 %v6864_v12 }
 0x96e   :  { %2719 = vmatpush1.msra.mxu0 %v6865_v53  ;;  %2790 = vmatpush1.msra.mxu1 %v6866_v26  ;;  %v6877_v26 = vld [vmem:[#allocation46_spill] sm:$0xff] }
 0x96f   :  { %2720 = vmatprep.subr.mxu0 %v6867_v9  ;;  %2791 = vmatprep.subr.mxu1 %v6868_v40  ;;  %v6878_v9 = vmov 0.0   ;;  %v6879_v40 = vld [vmem:[#allocation44_spill] sm:$0xff] }
 0x970   :  { %2721 = vmatpush1.msra.mxu0 %v6869_v30  ;;  %2792 = vmatpush1.msra.mxu1 %v6870_v6  ;;  %v6880_v6 = vld [vmem:[#allocation42_spill] sm:$0xff] }
 0x971   :  { %2722 = vmatprep.subr.mxu0 %v6871_v44  ;;  %2793 = vmatprep.subr.mxu1 %v6872_v8  ;;  %v6881_v44 = vld [vmem:[#allocation47_spill] sm:$0xff] }
 0x972   :  { %2723 = vmatpush1.msra.mxu0 %v6873_v5  ;;  %2794 = vmatpush1.msra.mxu1 %v6874_v41  ;;  %v6882_v5 = vld [vmem:[#allocation26_spill] sm:$0xff] }
 0x973   :  { %2724 = vmatprep.subr.mxu0 %v6875_v46  ;;  %2795 = vmatprep.subr.mxu1 %v6876_v45  ;;  %v2085_v8 = vadd.f32 %v6882_v5, %v5740_v43  ;;  %v6883_v46 = vld [vmem:[#allocation28_spill] sm:$0xff]  ;;  %v2198_v5 = vadd.f32 %v6886_v13, %v5765_v2 }
 0x974   :  { %2725 = vmatpush1.msra.mxu0 %v6877_v26  ;;  %2758 = vmatprep.mubr.f32.mxu0 %v6878_v9  ;;  %v2087_v30 = vadd.f32 %v6883_v46, %v5748_v7 }
 0x975   :  { %2796 = vmatpush1.msra.mxu1 %v6879_v40  ;;  %2829 = vmatprep.mubr.f32.mxu1 %v6878_v9 }
 0x976   :  { %2870 = vmatprep.subr.mxu0 %v6880_v6  ;;  %2941 = vmatprep.subr.mxu1 %v6881_v44  ;;  %v6885_v6 = vld [vmem:[#allocation29_spill] sm:$0xff] }
 0x977   :  { %v2200_v42 = vadd.f32 %v6885_v6, %v6884_v14 }
 0xa15   :  { %v2584_v41 = vpop.f32.mrf.mxu0  ;;  %v2655_v54 = vpop.f32.mrf.mxu1 }
 0xa16   :  { %v2660_v45 = vadd.f32 %v2584_v41, %v2085_v8  ;;  %v2662_v43 = vadd.f32 %v2655_v54, %v2198_v5  ;;  %v6903_v54 = vld [vmem:[#allocation61_spill] sm:$0xff]  ;;  %v6906_v5 = vld [vmem:[#allocation46_spill] sm:$0xff] }
 0xa17   :  { %v2586_v53 = vpop.f32.mrf.mxu0  ;;  %v2657_v9 = vpop.f32.mrf.mxu1 }
 0xa18   :  { %v3794_v26 = vmul.f32 -1.442695, %v2660_v45  ;;  %v2661_v12 = vadd.f32 %v2586_v53, %v2087_v30  ;;  %v2663_v44 = vadd.f32 %v2657_v9, %v2200_v42  ;;  %v6905_v45 = vld [vmem:[#allocation60_spill] sm:$0xff] }
 0xa1a   :  { %3972 = vpow2.f32 %v3794_v26  ;;  %v3795_v40 = vmul.f32 -1.442695, %v2661_v12  ;;  %v3796_v39 = vmul.f32 -1.442695, %v2663_v44  ;;  %v6904_v44 = vld [vmem:[#allocation62_spill] sm:$0xff] }
 0xa1c   :  { %3974 = vpow2.f32 %v3795_v40 }
 0xa1d   :  { %3976 = vtanh.f32 %v2662_v43 }
 0xa1e   :  { %3978 = vpow2.f32 %v3796_v39  ;;  %v6902_v39 = vld [vmem:[#allocation59_spill] sm:$0xff] }
 0xa27   :  { %v3973_v37 = vpop.eup %3972 }
 0xa28   :  { %v2667_v46 = vadd.f32 1.0, %v3973_v37 }
 0xa29   :  { %v3975_v8 = vpop.eup %3974 }
 0xa2a   :  { %3980 = vrcp.f32 %v2667_v46  ;;  %v2673_v53 = vadd.f32 1.0, %v3975_v8  ;;  %v3977_v12 = vpop.eup %3976  ;;  %v6907_v46 = vmov 0.0   ;;  %v6908_v8 = vld [vmem:[#allocation44_spill] sm:$0xff] }
 0xa2b   :  { %v3979_v26 = vpop.eup %3978 }
 0xa2c   :  { %3982 = vrcp.f32 %v2673_v53  ;;  %v2680_v6 = vadd.f32 1.0, %v3979_v26  ;;  %v6909_v53 = vld [vmem:[#allocation42_spill] sm:$0xff]  ;;  %v6911_v26 = vld [vmem:[#allocation41_spill] sm:$0xff] }
 0xa2e   :  { %3984 = vrcp.f32 %v2680_v6  ;;  %v6913_v6 = vld [vmem:[#allocation32_spill] sm:$0xff] }
 0xa37   :  { %v3981_v40 = vpop.eup %3980 }
 0xa38   :  { %v2684_v30 = vmul.f32 %v3981_v40, %v3977_v12  ;;  %v6910_v12 = vld [vmem:[#allocation47_spill] sm:$0xff]  ;;  %v6912_v40 = vld [vmem:[#allocation30_spill] sm:$0xff] }
 0xa39   :  { %v3983_v41 = vpop.eup %3982 }
 0xa3a   :  { %v2683_v42 = vmul.f32 %v3983_v41, %v5768_v10  ;;  %v6901_v10 = vld [vmem:[#allocation24_spill] sm:$0xff] }
 0xa3b   :  { %v3985_v37 = vpop.eup %3984 }
 0xa3c   :  { %v5846_v9 = vadd.f32 %v2684_v30, %v2683_v42  ;;  %v2091_v30 = vadd.f32 %v6912_v40, %v6911_v26  ;;  %v2093_v42 = vadd.f32 %v6913_v6, %v5748_v7 }
 0xa3e   :  { %3986 = vtanh.f32 %v5846_v9 }
 0xa4b   :  { %v3987_v43 = vpop.eup %3986 }
 0xa4c   :  { %v2687_v13 = vmul.f32 %v3987_v43, %v3985_v37 }
 0xa4e   :  { %2689 = vst [vmem:[#allocation15 + $0x8] sm:$0xff] %v2687_v13  ;;  %2759 = vmatmul.mubr.f32.vlgmr.msra.gmra.mxu0 %v2687_v13  ;;  %2830 = vmatmul.mubr.f32.vlgmr.msra.gmra.mxu1 %v2687_v13 }
 0xa4f   :  { %2871 = vmatpush1.msra.mxu0 %v5429_v62  ;;  %2942 = vmatpush1.msra.mxu1 %v5431_v25  ;;  %v6887_v62 = vld [vmem:[#allocation49_spill] sm:$0xff]  ;;  %v6888_v25 = vld [vmem:[#allocation50_spill] sm:$0xff] }
 0xa50   :  { %2872 = vmatprep.subr.mxu0 %v5435_v23  ;;  %2943 = vmatprep.subr.mxu1 %v5437_v49  ;;  %v6889_v23 = vld [vmem:[#allocation48_spill] sm:$0xff]  ;;  %v6890_v49 = vld [vmem:[#allocation51_spill] sm:$0xff] }
 0xa51   :  { %2873 = vmatpush1.msra.mxu0 %v5441_v50  ;;  %2944 = vmatpush1.msra.mxu1 %v5443_v48  ;;  %v6891_v50 = vld [vmem:[#allocation53_spill] sm:$0xff]  ;;  %v6892_v48 = vld [vmem:[#allocation54_spill] sm:$0xff] }
 0xa52   :  { %2874 = vmatprep.subr.mxu0 %v5447_v52  ;;  %2945 = vmatprep.subr.mxu1 %v5449_v4  ;;  %v6893_v52 = vld [vmem:[#allocation52_spill] sm:$0xff] }
 0xa53   :  { %2875 = vmatpush1.msra.mxu0 %v5453_v29  ;;  %2946 = vmatpush1.msra.mxu1 %v5455_v0  ;;  %v6894_v4 = vld [vmem:[#allocation20_spill] sm:$0xff]  ;;  %v6895_v29 = vld [vmem:[#allocation21_spill] sm:$0xff]  ;;  %v6896_v0 = vld [vmem:[#allocation55_spill] sm:$0xff] }
 0xa54   :  { %2876 = vmatprep.subr.mxu0 %v5459_v20  ;;  %2947 = vmatprep.subr.mxu1 %v5461_v59  ;;  %v6897_v20 = vld [vmem:[#allocation57_spill] sm:$0xff]  ;;  %v6898_v59 = vld [vmem:[#allocation58_spill] sm:$0xff] }
 0xa55   :  { %2877 = vmatpush1.msra.mxu0 %v5465_v57  ;;  %2948 = vmatpush1.msra.mxu1 %v5467_v56  ;;  %v6899_v57 = vld [vmem:[#allocation56_spill] sm:$0xff]  ;;  %v6900_v56 = vld [vmem:[#allocation23_spill] sm:$0xff] }
 0xa56   :  { %2878 = vmatprep.subr.mxu0 %v5471_v55  ;;  %2949 = vmatprep.subr.mxu1 %v5473_v60 }
 0xa57   :  { %2879 = vmatpush1.msra.mxu0 %v5477_v61  ;;  %2950 = vmatpush1.msra.mxu1 %v5479_v1 }
 0xa58   :  { %2880 = vmatprep.subr.mxu0 %v5483_v58  ;;  %2951 = vmatprep.subr.mxu1 %v5485_v38 }
 0xa59   :  { %2881 = vmatpush1.msra.mxu0 %v5489_v47  ;;  %2952 = vmatpush1.msra.mxu1 %v5491_v27 }
 0xa5a   :  { %2882 = vmatprep.subr.mxu0 %v5495_v28  ;;  %2953 = vmatprep.subr.mxu1 %v5497_v31 }
 0xa5b   :  { %2883 = vmatpush1.msra.mxu0 %v5501_v3  ;;  %2954 = vmatpush1.msra.mxu1 %v5503_v63 }
 0xa5c   :  { %2884 = vmatprep.subr.mxu0 %v5507_v51  ;;  %2955 = vmatprep.subr.mxu1 %v5509_v15 }
 0xa5d   :  { %2885 = vmatpush1.msra.mxu0 %v5513_v16  ;;  %2956 = vmatpush1.msra.mxu1 %v5515_v17 }
 0xa5e   :  { %2886 = vmatprep.subr.mxu0 %v5519_v18  ;;  %2957 = vmatprep.subr.mxu1 %v5521_v19 }
 0xa5f   :  { %2887 = vmatpush1.msra.mxu0 %v5525_v21  ;;  %2958 = vmatpush1.msra.mxu1 %v5527_v22 }
 0xa60   :  { %2888 = vmatprep.subr.mxu0 %v5531_v24  ;;  %2959 = vmatprep.subr.mxu1 %v5533_v11 }
 0xa61   :  { %2889 = vmatpush1.msra.mxu0 %v5537_v32  ;;  %2960 = vmatpush1.msra.mxu1 %v5539_v33 }
 0xa62   :  { %2890 = vmatprep.subr.mxu0 %v5543_v34  ;;  %2961 = vmatprep.subr.mxu1 %v5545_v35 }
 0xa63   :  { %2891 = vmatpush1.msra.mxu0 %v5549_v36  ;;  %2962 = vmatpush1.msra.mxu1 %v6887_v62 }
 0xa64   :  { %2892 = vmatprep.subr.mxu0 %v6888_v25  ;;  %2963 = vmatprep.subr.mxu1 %v6889_v23 }
 0xa65   :  { %2893 = vmatpush1.msra.mxu0 %v6890_v49  ;;  %2964 = vmatpush1.msra.mxu1 %v6891_v50 }
 0xa66   :  { %2894 = vmatprep.subr.mxu0 %v6892_v48  ;;  %2965 = vmatprep.subr.mxu1 %v6893_v52 }
 0xa67   :  { %2895 = vmatpush1.msra.mxu0 %v6894_v4  ;;  %2966 = vmatpush1.msra.mxu1 %v6895_v29 }
 0xa68   :  { %2896 = vmatprep.subr.mxu0 %v6896_v0  ;;  %2967 = vmatprep.subr.mxu1 %v6897_v20 }
 0xa69   :  { %2897 = vmatpush1.msra.mxu0 %v6898_v59  ;;  %2968 = vmatpush1.msra.mxu1 %v6899_v57 }
 0xa6a   :  { %2898 = vmatprep.subr.mxu0 %v6900_v56  ;;  %2969 = vmatprep.subr.mxu1 %v6901_v10 }
 0xa6b   :  { %2899 = vmatpush1.msra.mxu0 %v6902_v39  ;;  %2970 = vmatpush1.msra.mxu1 %v6903_v54  ;;  %v6915_v54 = vld [vmem:[#allocation31_spill] sm:$0xff] }
 0xa6c   :  { %2900 = vmatprep.subr.mxu0 %v6904_v44  ;;  %2971 = vmatprep.subr.mxu1 %v6905_v45  ;;  %v2204_v40 = vadd.f32 %v6915_v54, %v5765_v2 }
 0xa6d   :  { %2901 = vmatpush1.msra.mxu0 %v6906_v5  ;;  %2934 = vmatprep.mubr.f32.mxu0 %v6907_v46 }
 0xa6e   :  { %2972 = vmatpush1.msra.mxu1 %v6908_v8  ;;  %3005 = vmatprep.mubr.f32.mxu1 %v6907_v46 }
 0xa6f   :  { %3046 = vmatprep.subr.mxu0 %v6909_v53  ;;  %3117 = vmatprep.subr.mxu1 %v6910_v12  ;;  %v6914_v53 = vld [vmem:[#allocation33_spill] sm:$0xff] }
 0xa70   :  { %v2206_v44 = vadd.f32 %v6914_v53, %v6884_v14  ;;  %v5936_v53 = vld [vmem:[#allocation12 + $0x3d8] sm:$0xff] }
 0xb0e   :  { %v2760_v41 = vpop.f32.mrf.mxu0  ;;  %v2831_v45 = vpop.f32.mrf.mxu1 }
 0xb0f   :  { %v2836_v37 = vadd.f32 %v2760_v41, %v2091_v30  ;;  %v2838_v26 = vadd.f32 %v2831_v45, %v2204_v40  ;;  %v5942_v40 = vld [vmem:[#allocation12 + $0x3d0] sm:$0xff] }
 0xb10   :  { %v2762_v43 = vpop.f32.mrf.mxu0  ;;  %v2833_v46 = vpop.f32.mrf.mxu1 }
 0xb11   :  { %v3797_v13 = vmul.f32 -1.442695, %v2836_v37  ;;  %v2837_v5 = vadd.f32 %v2762_v43, %v2093_v42  ;;  %v2839_v12 = vadd.f32 %v2833_v46, %v2206_v44 }
 0xb13   :  { %3988 = vpow2.f32 %v3797_v13  ;;  %v3798_v8 = vmul.f32 -1.442695, %v2837_v5  ;;  %v3799_v39 = vmul.f32 -1.442695, %v2839_v12  ;;  %v5939_v12 = vld [vmem:[#allocation12 + $0x3c0] sm:$0xff] }
 0xb15   :  { %3990 = vpow2.f32 %v3798_v8 }
 0xb16   :  { %3992 = vtanh.f32 %v2838_v26  ;;  %v5930_v26 = vld [vmem:[#allocation12 + $0x3f0] sm:$0xff] }
 0xb17   :  { %3994 = vpow2.f32 %v3799_v39  ;;  %v5927_v39 = vld [vmem:[#allocation12 + $0x3e0] sm:$0xff] }
 0xb20   :  { %v3989_v10 = vpop.eup %3988 }
 0xb21   :  { %v2843_v6 = vadd.f32 1.0, %v3989_v10 }
 0xb22   :  { %v3991_v30 = vpop.eup %3990 }
 0xb23   :  { %3996 = vrcp.f32 %v2843_v6  ;;  %v2849_v41 = vadd.f32 1.0, %v3991_v30  ;;  %v3993_v5 = vpop.eup %3992  ;;  %v5945_v6 = vld [vmem:[#allocation12 + $0x3a8] sm:$0xff]  ;;  %v5948_v30 = vld [vmem:[#allocation12 + $0x3b8] sm:$0xff] }
 0xb24   :  { %v3995_v8 = vpop.eup %3994 }
 0xb25   :  { %3998 = vrcp.f32 %v2849_v41  ;;  %v2856_v13 = vadd.f32 1.0, %v3995_v8  ;;  %v5951_v41 = vld [vmem:[#allocation12 + $0x3a0] sm:$0xff]  ;;  %v5957_v8 = vld [vmem:[#allocation12 + $0x388] sm:$0xff] }
 0xb27   :  { %4000 = vrcp.f32 %v2856_v13 }
 0xb30   :  { %v3997_v42 = vpop.eup %3996 }
 0xb31   :  { %v2860_v37 = vmul.f32 %v3997_v42, %v3993_v5  ;;  %v5954_v5 = vld [vmem:[#allocation12 + $0x3b0] sm:$0xff]  ;;  %v5960_v42 = vld [vmem:[#allocation12 + $0x398] sm:$0xff] }
 0xb32   :  { %v3999_v43 = vpop.eup %3998 }
 0xb33   :  { %v2859_v44 = vmul.f32 %v3999_v43, %v5846_v9  ;;  %v5933_v9 = vld [vmem:[#allocation12 + $0x3c8] sm:$0xff]  ;;  %v5966_v43 = vld [vmem:[#allocation12 + $0x390] sm:$0xff] }
 0xb34   :  { %v4001_v10 = vpop.eup %4000 }
 0xb35   :  { %v5924_v46 = vadd.f32 %v2860_v37, %v2859_v44  ;;  %v5963_v37 = vld [vmem:[#allocation12 + $0x380] sm:$0xff] }
 0xb37   :  { %4002 = vtanh.f32 %v5924_v46 }
 0xb44   :  { %v4003_v54 = vpop.eup %4002 }
 0xb45   :  { %v2863_v45 = vmul.f32 %v4003_v54, %v4001_v10 }
 0xb47   :  { %2865 = vst [vmem:[#allocation15 + $0x10] sm:$0xff] %v2863_v45  ;;  %2935 = vmatmul.mubr.f32.vlgmr.msra.gmra.mxu0 %v2863_v45  ;;  %3006 = vmatmul.mubr.f32.vlgmr.msra.gmra.mxu1 %v2863_v45  ;;  %v6054_v45 = vld [vmem:[#allocation12 + $0x378] sm:$0xff] }
 0xb48   :  { %3047 = vmatpush1.msra.mxu0 %v5927_v39  ;;  %3118 = vmatpush1.msra.mxu1 %v5930_v26 }
 0xb49   :  { %3048 = vmatprep.subr.mxu0 %v5933_v9  ;;  %3119 = vmatprep.subr.mxu1 %v5936_v53 }
 0xb4a   :  { %3049 = vmatpush1.msra.mxu0 %v5939_v12  ;;  %3120 = vmatpush1.msra.mxu1 %v5942_v40 }
 0xb4b   :  { %3050 = vmatprep.subr.mxu0 %v5945_v6  ;;  %3121 = vmatprep.subr.mxu1 %v5948_v30 }
 0xb4c   :  { %3051 = vmatpush1.msra.mxu0 %v5951_v41  ;;  %3122 = vmatpush1.msra.mxu1 %v5954_v5 }
 0xb4d   :  { %3052 = vmatprep.subr.mxu0 %v5957_v8  ;;  %3123 = vmatprep.subr.mxu1 %v5960_v42 }
 0xb4e   :  { %3053 = vmatpush1.msra.mxu0 %v5963_v37  ;;  %3124 = vmatpush1.msra.mxu1 %v5966_v43 }
 0xb4f   :  { %3054 = vmatprep.subr.mxu0 %v5471_v55  ;;  %3125 = vmatprep.subr.mxu1 %v5473_v60  ;;  %v6916_v55 = vld [vmem:[#allocation24_spill] sm:$0xff]  ;;  %v6917_v60 = vld [vmem:[#allocation59_spill] sm:$0xff] }
 0xb50   :  { %3055 = vmatpush1.msra.mxu0 %v5477_v61  ;;  %3126 = vmatpush1.msra.mxu1 %v5479_v1  ;;  %v6918_v61 = vld [vmem:[#allocation61_spill] sm:$0xff]  ;;  %v6919_v1 = vld [vmem:[#allocation62_spill] sm:$0xff] }
 0xb51   :  { %3056 = vmatprep.subr.mxu0 %v5483_v58  ;;  %3127 = vmatprep.subr.mxu1 %v5485_v38  ;;  %v6920_v58 = vld [vmem:[#allocation60_spill] sm:$0xff]  ;;  %v6921_v38 = vld [vmem:[#allocation46_spill] sm:$0xff] }
 0xb52   :  { %3057 = vmatpush1.msra.mxu0 %v5489_v47  ;;  %3128 = vmatpush1.msra.mxu1 %v5491_v27  ;;  %v6922_v47 = vmov 0.0   ;;  %v6923_v27 = vld [vmem:[#allocation44_spill] sm:$0xff] }
 0xb53   :  { %3058 = vmatprep.subr.mxu0 %v5495_v28  ;;  %3129 = vmatprep.subr.mxu1 %v5497_v31  ;;  %v6019_v28 = vld [vmem:[#allocation12 + $0x3e8] sm:$0xff]  ;;  %v6022_v31 = vld [vmem:[#allocation12 + $0x3f8] sm:$0xff] }
 0xb54   :  { %3059 = vmatpush1.msra.mxu0 %v5501_v3  ;;  %3130 = vmatpush1.msra.mxu1 %v5503_v63  ;;  %6924 = vst [vmem:[#allocation26_spill] sm:$0xff] %v6019_v28  ;;  %6925 = vst [vmem:[#allocation28_spill] sm:$0xff] %v6022_v31  ;;  %v6926_v3 = vld [vmem:[#allocation41_spill] sm:$0xff]  ;;  %v6927_v63 = vld [vmem:[#allocation34_spill] sm:$0xff] }
 0xb55   :  { %3060 = vmatprep.subr.mxu0 %v5507_v51  ;;  %3131 = vmatprep.subr.mxu1 %v5509_v15  ;;  %v2097_v51 = vadd.f32 %v6927_v63, %v6926_v3  ;;  %v6078_v63 = vld [vmem:[#allocation12 + $0x338] sm:$0xff] }
 0xb56   :  { %3061 = vmatpush1.msra.mxu0 %v5513_v16  ;;  %3132 = vmatpush1.msra.mxu1 %v5515_v17  ;;  %v6928_v16 = vld [vmem:[#allocation36_spill] sm:$0xff] }
 0xb57   :  { %3062 = vmatprep.subr.mxu0 %v5519_v18  ;;  %3133 = vmatprep.subr.mxu1 %v5521_v19  ;;  %v2099_v17 = vadd.f32 %v6928_v16, %v5748_v7  ;;  %v6087_v16 = vld [vmem:[#allocation12 + $0x308] sm:$0xff] }
 0xb58   :  { %3063 = vmatpush1.msra.mxu0 %v5525_v21  ;;  %3134 = vmatpush1.msra.mxu1 %v5527_v22 }
 0xb59   :  { %3064 = vmatprep.subr.mxu0 %v5531_v24  ;;  %3135 = vmatprep.subr.mxu1 %v5533_v11 }
 0xb5a   :  { %3065 = vmatpush1.msra.mxu0 %v5537_v32  ;;  %3136 = vmatpush1.msra.mxu1 %v5539_v33  ;;  %v6929_v33 = vld [vmem:[#allocation37_spill] sm:$0xff] }
 0xb5b   :  { %3066 = vmatprep.subr.mxu0 %v5543_v34  ;;  %3137 = vmatprep.subr.mxu1 %v5545_v35  ;;  %v2212_v34 = vadd.f32 %v6929_v33, %v6884_v14  ;;  %v6114_v33 = vld [vmem:[#allocation12 + $0x2d8] sm:$0xff] }
 0xb5c   :  { %3067 = vmatpush1.msra.mxu0 %v5549_v36  ;;  %3138 = vmatpush1.msra.mxu1 %v6887_v62  ;;  %v6930_v36 = vld [vmem:[#allocation35_spill] sm:$0xff] }
 0xb5d   :  { %3068 = vmatprep.subr.mxu0 %v6888_v25  ;;  %3139 = vmatprep.subr.mxu1 %v6889_v23  ;;  %v2210_v62 = vadd.f32 %v6930_v36, %v5765_v2  ;;  %v6123_v36 = vld [vmem:[#allocation12 + $0x2a8] sm:$0xff] }
 0xb5e   :  { %3069 = vmatpush1.msra.mxu0 %v6890_v49  ;;  %3140 = vmatpush1.msra.mxu1 %v6891_v50 }
 0xb5f   :  { %3070 = vmatprep.subr.mxu0 %v6892_v48  ;;  %3141 = vmatprep.subr.mxu1 %v6893_v52 }
 0xb60   :  { %3071 = vmatpush1.msra.mxu0 %v6894_v4  ;;  %3142 = vmatpush1.msra.mxu1 %v6895_v29 }
 0xb61   :  { %3072 = vmatprep.subr.mxu0 %v6896_v0  ;;  %3143 = vmatprep.subr.mxu1 %v6897_v20 }
 0xb62   :  { %3073 = vmatpush1.msra.mxu0 %v6898_v59  ;;  %3144 = vmatpush1.msra.mxu1 %v6899_v57 }
 0xb63   :  { %3074 = vmatprep.subr.mxu0 %v6900_v56  ;;  %3145 = vmatprep.subr.mxu1 %v6916_v55  ;;  %v6057_v55 = vld [vmem:[#allocation12 + $0x360] sm:$0xff] }
 0xb64   :  { %3075 = vmatpush1.msra.mxu0 %v6917_v60  ;;  %3146 = vmatpush1.msra.mxu1 %v6918_v61  ;;  %v6060_v60 = vld [vmem:[#allocation12 + $0x370] sm:$0xff]  ;;  %v6063_v61 = vld [vmem:[#allocation12 + $0x348] sm:$0xff] }
 0xb65   :  { %3076 = vmatprep.subr.mxu0 %v6919_v1  ;;  %3147 = vmatprep.subr.mxu1 %v6920_v58  ;;  %v6066_v1 = vld [vmem:[#allocation12 + $0x358] sm:$0xff]  ;;  %v6069_v58 = vld [vmem:[#allocation12 + $0x340] sm:$0xff] }
 0xb66   :  { %3077 = vmatpush1.msra.mxu0 %v6921_v38  ;;  %3110 = vmatprep.mubr.f32.mxu0 %v6922_v47  ;;  %v6072_v38 = vld [vmem:[#allocation12 + $0x350] sm:$0xff] }
 0xb67   :  { %3148 = vmatpush1.msra.mxu1 %v6923_v27  ;;  %3181 = vmatprep.mubr.f32.mxu1 %v6922_v47  ;;  %v6075_v27 = vld [vmem:[#allocation12 + $0x328] sm:$0xff] }
 0xb68   :  { %3222 = vmatprep.subr.mxu0 %v6019_v28  ;;  %3293 = vmatprep.subr.mxu1 %v6022_v31 }
 0xc07   :  { %v2936_v15 = vpop.f32.mrf.mxu0  ;;  %v3007_v24 = vpop.f32.mrf.mxu1 }
 0xc08   :  { %v3012_v18 = vadd.f32 %v2936_v15, %v2097_v51  ;;  %v3014_v25 = vadd.f32 %v3007_v24, %v2210_v62  ;;  %v6081_v51 = vld [vmem:[#allocation12 + $0x320] sm:$0xff]  ;;  %v6084_v15 = vld [vmem:[#allocation12 + $0x330] sm:$0xff]  ;;  %v6126_v62 = vld [vmem:[#allocation12 + $0x2b8] sm:$0xff] }
 0xc09   :  { %v2938_v19 = vpop.f32.mrf.mxu0  ;;  %v3009_v32 = vpop.f32.mrf.mxu1  ;;  %v6105_v24 = vld [vmem:[#allocation12 + $0x2e0] sm:$0xff] }
 0xc0a   :  { %v3800_v21 = vmul.f32 -1.442695, %v3012_v18  ;;  %v3013_v22 = vadd.f32 %v2938_v19, %v2099_v17  ;;  %v3015_v35 = vadd.f32 %v3009_v32, %v2212_v34  ;;  %v6090_v17 = vld [vmem:[#allocation12 + $0x318] sm:$0xff]  ;;  %v6093_v18 = vld [vmem:[#allocation12 + $0x300] sm:$0xff]  ;;  %v6096_v19 = vld [vmem:[#allocation12 + $0x310] sm:$0xff] }
 0xc0b   :  { %v6111_v32 = vld [vmem:[#allocation12 + $0x2c8] sm:$0xff]  ;;  %v6117_v34 = vld [vmem:[#allocation12 + $0x2c0] sm:$0xff] }
 0xc0c   :  { %4004 = vpow2.f32 %v3800_v21  ;;  %v3801_v11 = vmul.f32 -1.442695, %v3013_v22  ;;  %v3802_v23 = vmul.f32 -1.442695, %v3015_v35  ;;  %v6099_v21 = vld [vmem:[#allocation12 + $0x2e8] sm:$0xff]  ;;  %v6102_v22 = vld [vmem:[#allocation12 + $0x2f8] sm:$0xff] }
 0xc0d   :  { %v6120_v35 = vld [vmem:[#allocation12 + $0x2d0] sm:$0xff] }
 0xc0e   :  { %4006 = vpow2.f32 %v3801_v11  ;;  %v6108_v11 = vld [vmem:[#allocation12 + $0x2f0] sm:$0xff] }
 0xc0f   :  { %4008 = vtanh.f32 %v3014_v25  ;;  %v6129_v25 = vld [vmem:[#allocation12 + $0x2a0] sm:$0xff] }
 0xc10   :  { %4010 = vpow2.f32 %v3802_v23  ;;  %v6132_v23 = vld [vmem:[#allocation12 + $0x2b0] sm:$0xff] }
 0xc11   :  { %6931 = vst [vmem:[#allocation72_spill] sm:$0xff] %v6132_v23 }
 0xc19   :  { %v4005_v49 = vpop.eup %4004 }
 0xc1a   :  { %v3019_v50 = vadd.f32 1.0, %v4005_v49  ;;  %v6135_v49 = vld [vmem:[#allocation12 + $0x288] sm:$0xff] }
 0xc1b   :  { %v4007_v48 = vpop.eup %4006  ;;  %6932 = vst [vmem:[#allocation29_spill] sm:$0xff] %v6135_v49 }
 0xc1c   :  { %4012 = vrcp.f32 %v3019_v50  ;;  %v3025_v52 = vadd.f32 1.0, %v4007_v48  ;;  %v4009_v4 = vpop.eup %4008  ;;  %v6138_v50 = vld [vmem:[#allocation12 + $0x298] sm:$0xff]  ;;  %v6141_v48 = vld [vmem:[#allocation12 + $0x280] sm:$0xff] }
 0xc1d   :  { %v4011_v29 = vpop.eup %4010  ;;  %6933 = vst [vmem:[#allocation27_spill] sm:$0xff] %v6138_v50  ;;  %6934 = vst [vmem:[#allocation49_spill] sm:$0xff] %v6141_v48 }
 0xc1e   :  { %4014 = vrcp.f32 %v3025_v52  ;;  %v3032_v57 = vadd.f32 1.0, %v4011_v29  ;;  %v6144_v52 = vld [vmem:[#allocation12 + $0x290] sm:$0xff]  ;;  %v6150_v29 = vld [vmem:[#allocation12 + $0x278] sm:$0xff] }
 0xc1f   :  { %6935 = vst [vmem:[#allocation50_spill] sm:$0xff] %v6144_v52  ;;  %6937 = vst [vmem:[#allocation51_spill] sm:$0xff] %v6150_v29 }
 0xc20   :  { %4016 = vrcp.f32 %v3032_v57  ;;  %v6162_v57 = vld [vmem:[#allocation12 + $0x258] sm:$0xff] }
 0xc21   :  { %6941 = vst [vmem:[#allocation20_spill] sm:$0xff] %v6162_v57 }
 0xc29   :  { %v4013_v0 = vpop.eup %4012 }
 0xc2a   :  { %v3036_v20 = vmul.f32 %v4013_v0, %v4009_v4  ;;  %v6147_v4 = vld [vmem:[#allocation12 + $0x268] sm:$0xff]  ;;  %v6153_v0 = vld [vmem:[#allocation12 + $0x260] sm:$0xff] }
 0xc2b   :  { %v4015_v59 = vpop.eup %4014  ;;  %6936 = vst [vmem:[#allocation48_spill] sm:$0xff] %v6147_v4  ;;  %6938 = vst [vmem:[#allocation53_spill] sm:$0xff] %v6153_v0 }
 0xc2c   :  { %v3035_v56 = vmul.f32 %v4015_v59, %v5924_v46  ;;  %v6051_v46 = vld [vmem:[#allocation12 + $0x368] sm:$0xff] }
 0xc2d   :  { %v4017_v44 = vpop.eup %4016  ;;  %v6159_v59 = vld [vmem:[#allocation12 + $0x248] sm:$0xff] }
 0xc2e   :  { %v6034_v13 = vadd.f32 %v3036_v20, %v3035_v56  ;;  %v6156_v20 = vld [vmem:[#allocation12 + $0x270] sm:$0xff]  ;;  %6940 = vst [vmem:[#allocation52_spill] sm:$0xff] %v6159_v59  ;;  %v6165_v56 = vld [vmem:[#allocation12 + $0x240] sm:$0xff] }
 0xc2f   :  { %6939 = vst [vmem:[#allocation54_spill] sm:$0xff] %v6156_v20  ;;  %6942 = vst [vmem:[#allocation21_spill] sm:$0xff] %v6165_v56 }
 0xc30   :  { %4018 = vtanh.f32 %v6034_v13 }
 0xc3d   :  { %v4019_v10 = vpop.eup %4018 }
 0xc3e   :  { %v3039_v54 = vmul.f32 %v4019_v10, %v4017_v44  ;;  %v6168_v44 = vld [vmem:[#allocation12 + $0x250] sm:$0xff]  ;;  %v6171_v10 = vld [vmem:[#allocation12 + $0x228] sm:$0xff] }
 0xc3f   :  { %6943 = vst [vmem:[#allocation55_spill] sm:$0xff] %v6168_v44  ;;  %6944 = vst [vmem:[#allocation57_spill] sm:$0xff] %v6171_v10 }
 0xc40   :  { %3041 = vst [vmem:[#allocation15 + $0x18] sm:$0xff] %v3039_v54  ;;  %3111 = vmatmul.mubr.f32.vlgmr.msra.gmra.mxu0 %v3039_v54  ;;  %3182 = vmatmul.mubr.f32.vlgmr.msra.gmra.mxu1 %v3039_v54  ;;  %v6174_v54 = vld [vmem:[#allocation12 + $0x238] sm:$0xff] }
 0xc41   :  { %3223 = vmatpush1.msra.mxu0 %v5927_v39  ;;  %3294 = vmatpush1.msra.mxu1 %v5930_v26  ;;  %6945 = vst [vmem:[#allocation58_spill] sm:$0xff] %v6174_v54 }
 0xc42   :  { %3224 = vmatprep.subr.mxu0 %v5933_v9  ;;  %3295 = vmatprep.subr.mxu1 %v5936_v53 }
 0xc43   :  { %3225 = vmatpush1.msra.mxu0 %v5939_v12  ;;  %3296 = vmatpush1.msra.mxu1 %v5942_v40 }
 0xc44   :  { %3226 = vmatprep.subr.mxu0 %v5945_v6  ;;  %3297 = vmatprep.subr.mxu1 %v5948_v30 }
 0xc45   :  { %3227 = vmatpush1.msra.mxu0 %v5951_v41  ;;  %3298 = vmatpush1.msra.mxu1 %v5954_v5 }
 0xc46   :  { %3228 = vmatprep.subr.mxu0 %v5957_v8  ;;  %3299 = vmatprep.subr.mxu1 %v5960_v42 }
 0xc47   :  { %3229 = vmatpush1.msra.mxu0 %v5963_v37  ;;  %3300 = vmatpush1.msra.mxu1 %v5966_v43 }
 0xc48   :  { %3230 = vmatprep.subr.mxu0 %v6051_v46  ;;  %3301 = vmatprep.subr.mxu1 %v6054_v45 }
 0xc49   :  { %3231 = vmatpush1.msra.mxu0 %v6057_v55  ;;  %3302 = vmatpush1.msra.mxu1 %v6060_v60 }
 0xc4a   :  { %3232 = vmatprep.subr.mxu0 %v6063_v61  ;;  %3303 = vmatprep.subr.mxu1 %v6066_v1 }
 0xc4b   :  { %3233 = vmatpush1.msra.mxu0 %v6069_v58  ;;  %3304 = vmatpush1.msra.mxu1 %v6072_v38 }
 0xc4c   :  { %3234 = vmatprep.subr.mxu0 %v6075_v27  ;;  %3305 = vmatprep.subr.mxu1 %v6078_v63 }
 0xc4d   :  { %3235 = vmatpush1.msra.mxu0 %v6081_v51  ;;  %3306 = vmatpush1.msra.mxu1 %v6084_v15 }
 0xc4e   :  { %3236 = vmatprep.subr.mxu0 %v6087_v16  ;;  %3307 = vmatprep.subr.mxu1 %v6090_v17 }
 0xc4f   :  { %3237 = vmatpush1.msra.mxu0 %v6093_v18  ;;  %3308 = vmatpush1.msra.mxu1 %v6096_v19 }
 0xc50   :  { %3238 = vmatprep.subr.mxu0 %v6099_v21  ;;  %3309 = vmatprep.subr.mxu1 %v6102_v22 }
 0xc51   :  { %3239 = vmatpush1.msra.mxu0 %v6105_v24  ;;  %3310 = vmatpush1.msra.mxu1 %v6108_v11 }
 0xc52   :  { %3240 = vmatprep.subr.mxu0 %v6111_v32  ;;  %3311 = vmatprep.subr.mxu1 %v6114_v33 }
 0xc53   :  { %3241 = vmatpush1.msra.mxu0 %v6117_v34  ;;  %3312 = vmatpush1.msra.mxu1 %v6120_v35 }
 0xc54   :  { %3242 = vmatprep.subr.mxu0 %v6123_v36  ;;  %3313 = vmatprep.subr.mxu1 %v6126_v62 }
 0xc55   :  { %3243 = vmatpush1.msra.mxu0 %v6129_v25  ;;  %3314 = vmatpush1.msra.mxu1 %v6132_v23 }
 0xc56   :  { %3244 = vmatprep.subr.mxu0 %v6135_v49  ;;  %3315 = vmatprep.subr.mxu1 %v6138_v50  ;;  %v6955_v50 = vld [vmem:[#allocation39_spill] sm:$0xff] }
 0xc57   :  { %3245 = vmatpush1.msra.mxu0 %v6141_v48  ;;  %3316 = vmatpush1.msra.mxu1 %v6144_v52 }
 0xc58   :  { %3246 = vmatprep.subr.mxu0 %v6147_v4  ;;  %3317 = vmatprep.subr.mxu1 %v6150_v29 }
 0xc59   :  { %3247 = vmatpush1.msra.mxu0 %v6153_v0  ;;  %3318 = vmatpush1.msra.mxu1 %v6156_v20 }
 0xc5a   :  { %3248 = vmatprep.subr.mxu0 %v6159_v59  ;;  %3319 = vmatprep.subr.mxu1 %v6162_v57  ;;  %v6177_v59 = vld [vmem:[#allocation12 + $0x220] sm:$0xff]  ;;  %v6180_v57 = vld [vmem:[#allocation12 + $0x230] sm:$0xff] }
 0xc5b   :  { %3249 = vmatpush1.msra.mxu0 %v6165_v56  ;;  %3320 = vmatpush1.msra.mxu1 %v6168_v44  ;;  %6946 = vst [vmem:[#allocation56_spill] sm:$0xff] %v6177_v59  ;;  %6947 = vst [vmem:[#allocation23_spill] sm:$0xff] %v6180_v57  ;;  %v6183_v56 = vld [vmem:[#allocation12 + $0x208] sm:$0xff]  ;;  %v6186_v44 = vld [vmem:[#allocation12 + $0x218] sm:$0xff] }
 0xc5c   :  { %3250 = vmatprep.subr.mxu0 %v6171_v10  ;;  %3321 = vmatprep.subr.mxu1 %v6174_v54  ;;  %6948 = vst [vmem:[#allocation42_spill] sm:$0xff] %v6183_v56  ;;  %6949 = vst [vmem:[#allocation47_spill] sm:$0xff] %v6186_v44  ;;  %v6189_v10 = vld [vmem:[#allocation12 + $0x200] sm:$0xff]  ;;  %v6193_v54 = vld [vmem:[#allocation12 + $0x210] sm:$0xff] }
 0xc5d   :  { %3251 = vmatpush1.msra.mxu0 %v6177_v59  ;;  %3322 = vmatpush1.msra.mxu1 %v6180_v57  ;;  %6950 = vst [vmem:[#allocation30_spill] sm:$0xff] %v6189_v10  ;;  %6951 = vst [vmem:[#allocation32_spill] sm:$0xff] %v6193_v54  ;;  %v6953_v59 = vld [vmem:[#allocation40_spill] sm:$0xff] }
 0xc5e   :  { %3252 = vmatprep.subr.mxu0 %v6183_v56  ;;  %3323 = vmatprep.subr.mxu1 %v6186_v44  ;;  %v6952_v56 = vld [vmem:[#allocation38_spill] sm:$0xff]  ;;  %v2105_v20 = vadd.f32 %v6953_v59, %v5748_v7 }
 0xc5f   :  { %3253 = vmatpush1.msra.mxu0 %v6189_v10  ;;  %3286 = vmatprep.mubr.f32.mxu0 %v6922_v47  ;;  %v2103_v57 = vadd.f32 %v6952_v56, %v6926_v3  ;;  %v2216_v56 = vadd.f32 %v6955_v50, %v5765_v2  ;;  %v6958_v50 = vld [vmem:[#allocation27_spill] sm:$0xff] }
 0xc60   :  { %3324 = vmatpush1.msra.mxu1 %v6193_v54  ;;  %3357 = vmatprep.mubr.f32.mxu1 %v6922_v47 }
 0xc61   :  { %3398 = vmatprep.subr.mxu0 %v6019_v28  ;;  %3469 = vmatprep.subr.mxu1 %v6022_v31  ;;  %v6954_v28 = vld [vmem:[#allocation63_spill] sm:$0xff] }
 0xc62   :  { %v2218_v48 = vadd.f32 %v6954_v28, %v6884_v14 }
 0xd00   :  { %v3112_v44 = vpop.f32.mrf.mxu0  ;;  %v3183_v52 = vpop.f32.mrf.mxu1 }
 0xd01   :  { %v3188_v10 = vadd.f32 %v3112_v44, %v2103_v57  ;;  %v3190_v3 = vadd.f32 %v3183_v52, %v2216_v56  ;;  %v6959_v52 = vld [vmem:[#allocation49_spill] sm:$0xff]  ;;  %v6961_v56 = vld [vmem:[#allocation48_spill] sm:$0xff] }
 0xd02   :  { %v3114_v0 = vpop.f32.mrf.mxu0  ;;  %v3185_v47 = vpop.f32.mrf.mxu1 }
 0xd03   :  { %v3803_v29 = vmul.f32 -1.442695, %v3188_v10  ;;  %v3189_v4 = vadd.f32 %v3114_v0, %v2105_v20  ;;  %v3191_v31 = vadd.f32 %v3185_v47, %v2218_v48 }
 0xd05   :  { %4020 = vpow2.f32 %v3803_v29  ;;  %v3804_v54 = vmul.f32 -1.442695, %v3189_v4  ;;  %v3805_v49 = vmul.f32 -1.442695, %v3191_v31 }
 0xd07   :  { %4022 = vpow2.f32 %v3804_v54  ;;  %v6960_v54 = vld [vmem:[#allocation50_spill] sm:$0xff] }
 0xd08   :  { %4024 = vtanh.f32 %v3190_v3 }
 0xd09   :  { %4026 = vpow2.f32 %v3805_v49  ;;  %v6957_v49 = vld [vmem:[#allocation29_spill] sm:$0xff] }
 0xd12   :  { %v4021_v23 = vpop.eup %4020 }
 0xd13   :  { %v3195_v59 = vadd.f32 1.0, %v4021_v23 }
 0xd14   :  { %v4023_v57 = vpop.eup %4022 }
 0xd15   :  { %4028 = vrcp.f32 %v3195_v59  ;;  %v3201_v29 = vadd.f32 1.0, %v4023_v57  ;;  %v4025_v4 = vpop.eup %4024  ;;  %v6962_v59 = vld [vmem:[#allocation51_spill] sm:$0xff]  ;;  %v6963_v57 = vld [vmem:[#allocation53_spill] sm:$0xff] }
 0xd16   :  { %v4027_v0 = vpop.eup %4026 }
 0xd17   :  { %4030 = vrcp.f32 %v3201_v29  ;;  %v3208_v28 = vadd.f32 1.0, %v4027_v0  ;;  %v6964_v29 = vld [vmem:[#allocation54_spill] sm:$0xff]  ;;  %v6966_v0 = vld [vmem:[#allocation20_spill] sm:$0xff] }
 0xd19   :  { %4032 = vrcp.f32 %v3208_v28  ;;  %v6970_v28 = vld [vmem:[#allocation58_spill] sm:$0xff] }
 0xd22   :  { %v4029_v20 = vpop.eup %4028 }
 0xd23   :  { %v3212_v44 = vmul.f32 %v4029_v20, %v4025_v4  ;;  %v6965_v4 = vld [vmem:[#allocation52_spill] sm:$0xff]  ;;  %v6967_v20 = vld [vmem:[#allocation21_spill] sm:$0xff] }
 0xd24   :  { %v4031_v10 = vpop.eup %4030 }
 0xd25   :  { %v3211_v47 = vmul.f32 %v4031_v10, %v6034_v13  ;;  %v6956_v13 = vld [vmem:[#allocation72_spill] sm:$0xff]  ;;  %v6969_v10 = vld [vmem:[#allocation57_spill] sm:$0xff] }
 0xd26   :  { %v4033_v31 = vpop.eup %4032 }
 0xd27   :  { %v6208_v48 = vadd.f32 %v3212_v44, %v3211_v47  ;;  %v6968_v44 = vld [vmem:[#allocation55_spill] sm:$0xff]  ;;  %v6971_v47 = vld [vmem:[#allocation56_spill] sm:$0xff] }
 0xd29   :  { %4034 = vtanh.f32 %v6208_v48 }
 0xd36   :  { %v4035_v3 = vpop.eup %4034 }
 0xd37   :  { %v3215_v23 = vmul.f32 %v4035_v3, %v4033_v31  ;;  %v6972_v31 = vld [vmem:[#allocation23_spill] sm:$0xff]  ;;  %v6973_v3 = vld [vmem:[#allocation42_spill] sm:$0xff] }
 0xd39   :  { %3217 = vst [vmem:[#allocation15 + $0x20] sm:$0xff] %v3215_v23  ;;  %3287 = vmatmul.mubr.f32.vlgmr.msra.gmra.mxu0 %v3215_v23  ;;  %3358 = vmatmul.mubr.f32.vlgmr.msra.gmra.mxu1 %v3215_v23  ;;  %v6974_v23 = vld [vmem:[#allocation47_spill] sm:$0xff] }
 0xd3a   :  { %3399 = vmatpush1.msra.mxu0 %v5927_v39  ;;  %3470 = vmatpush1.msra.mxu1 %v5930_v26 }
 0xd3b   :  { %3400 = vmatprep.subr.mxu0 %v5933_v9  ;;  %3471 = vmatprep.subr.mxu1 %v5936_v53 }
 0xd3c   :  { %3401 = vmatpush1.msra.mxu0 %v5939_v12  ;;  %3472 = vmatpush1.msra.mxu1 %v5942_v40 }
 0xd3d   :  { %3402 = vmatprep.subr.mxu0 %v5945_v6  ;;  %3473 = vmatprep.subr.mxu1 %v5948_v30 }
 0xd3e   :  { %3403 = vmatpush1.msra.mxu0 %v5951_v41  ;;  %3474 = vmatpush1.msra.mxu1 %v5954_v5 }
 0xd3f   :  { %3404 = vmatprep.subr.mxu0 %v5957_v8  ;;  %3475 = vmatprep.subr.mxu1 %v5960_v42 }
 0xd40   :  { %3405 = vmatpush1.msra.mxu0 %v5963_v37  ;;  %3476 = vmatpush1.msra.mxu1 %v5966_v43 }
 0xd41   :  { %3406 = vmatprep.subr.mxu0 %v6051_v46  ;;  %3477 = vmatprep.subr.mxu1 %v6054_v45 }
 0xd42   :  { %3407 = vmatpush1.msra.mxu0 %v6057_v55  ;;  %3478 = vmatpush1.msra.mxu1 %v6060_v60 }
 0xd43   :  { %3408 = vmatprep.subr.mxu0 %v6063_v61  ;;  %3479 = vmatprep.subr.mxu1 %v6066_v1 }
 0xd44   :  { %3409 = vmatpush1.msra.mxu0 %v6069_v58  ;;  %3480 = vmatpush1.msra.mxu1 %v6072_v38 }
 0xd45   :  { %3410 = vmatprep.subr.mxu0 %v6075_v27  ;;  %3481 = vmatprep.subr.mxu1 %v6078_v63 }
 0xd46   :  { %3411 = vmatpush1.msra.mxu0 %v6081_v51  ;;  %3482 = vmatpush1.msra.mxu1 %v6084_v15 }
 0xd47   :  { %3412 = vmatprep.subr.mxu0 %v6087_v16  ;;  %3483 = vmatprep.subr.mxu1 %v6090_v17 }
 0xd48   :  { %3413 = vmatpush1.msra.mxu0 %v6093_v18  ;;  %3484 = vmatpush1.msra.mxu1 %v6096_v19 }
 0xd49   :  { %3414 = vmatprep.subr.mxu0 %v6099_v21  ;;  %3485 = vmatprep.subr.mxu1 %v6102_v22 }
 0xd4a   :  { %3415 = vmatpush1.msra.mxu0 %v6105_v24  ;;  %3486 = vmatpush1.msra.mxu1 %v6108_v11 }
 0xd4b   :  { %3416 = vmatprep.subr.mxu0 %v6111_v32  ;;  %3487 = vmatprep.subr.mxu1 %v6114_v33 }
 0xd4c   :  { %3417 = vmatpush1.msra.mxu0 %v6117_v34  ;;  %3488 = vmatpush1.msra.mxu1 %v6120_v35 }
 0xd4d   :  { %3418 = vmatprep.subr.mxu0 %v6123_v36  ;;  %3489 = vmatprep.subr.mxu1 %v6126_v62 }
 0xd4e   :  { %3419 = vmatpush1.msra.mxu0 %v6129_v25  ;;  %3490 = vmatpush1.msra.mxu1 %v6956_v13 }
 0xd4f   :  { %3420 = vmatprep.subr.mxu0 %v6957_v49  ;;  %3491 = vmatprep.subr.mxu1 %v6958_v50  ;;  %v6984_v50 = vld [vmem:[#allocation66_spill] sm:$0xff] }
 0xd50   :  { %3421 = vmatpush1.msra.mxu0 %v6959_v52  ;;  %3492 = vmatpush1.msra.mxu1 %v6960_v54 }
 0xd51   :  { %3422 = vmatprep.subr.mxu0 %v6961_v56  ;;  %3493 = vmatprep.subr.mxu1 %v6962_v59 }
 0xd52   :  { %3423 = vmatpush1.msra.mxu0 %v6963_v57  ;;  %3494 = vmatpush1.msra.mxu1 %v6964_v29  ;;  %v6975_v29 = vld [vmem:[#allocation30_spill] sm:$0xff] }
 0xd53   :  { %3424 = vmatprep.subr.mxu0 %v6965_v4  ;;  %3495 = vmatprep.subr.mxu1 %v6966_v0  ;;  %v6976_v4 = vmov 0.0   ;;  %v6977_v0 = vld [vmem:[#allocation32_spill] sm:$0xff] }
 0xd54   :  { %3425 = vmatpush1.msra.mxu0 %v6967_v20  ;;  %3496 = vmatpush1.msra.mxu1 %v6968_v44  ;;  %v6978_v44 = vld [vmem:[#allocation26_spill] sm:$0xff] }
 0xd55   :  { %3426 = vmatprep.subr.mxu0 %v6969_v10  ;;  %3497 = vmatprep.subr.mxu1 %v6970_v28  ;;  %v6979_v10 = vld [vmem:[#allocation28_spill] sm:$0xff]  ;;  %v6980_v28 = vld [vmem:[#allocation41_spill] sm:$0xff] }
 0xd56   :  { %3427 = vmatpush1.msra.mxu0 %v6971_v47  ;;  %3498 = vmatpush1.msra.mxu1 %v6972_v31  ;;  %v6981_v47 = vld [vmem:[#allocation65_spill] sm:$0xff] }
 0xd57   :  { %3428 = vmatprep.subr.mxu0 %v6973_v3  ;;  %3499 = vmatprep.subr.mxu1 %v6974_v23  ;;  %v2109_v20 = vadd.f32 %v6981_v47, %v6980_v28  ;;  %v6982_v3 = vld [vmem:[#allocation64_spill] sm:$0xff]  ;;  %v2222_v47 = vadd.f32 %v6984_v50, %v5765_v2 }
 0xd58   :  { %3429 = vmatpush1.msra.mxu0 %v6975_v29  ;;  %3462 = vmatprep.mubr.f32.mxu0 %v6976_v4  ;;  %v2111_v57 = vadd.f32 %v6982_v3, %v5748_v7 }
 0xd59   :  { %3500 = vmatpush1.msra.mxu1 %v6977_v0  ;;  %3533 = vmatprep.mubr.f32.mxu1 %v6976_v4 }
 0xd5a   :  { %3574 = vmatprep.subr.mxu0 %v6978_v44  ;;  %3645 = vmatprep.subr.mxu1 %v6979_v10  ;;  %v6983_v44 = vld [vmem:[#allocation71_spill] sm:$0xff] }
 0xd5b   :  { %v2224_v52 = vadd.f32 %v6983_v44, %v6884_v14 }
 0xdf9   :  { %v3288_v31 = vpop.f32.mrf.mxu0  ;;  %v3359_v54 = vpop.f32.mrf.mxu1 }
 0xdfa   :  { %v3364_v23 = vadd.f32 %v3288_v31, %v2109_v20  ;;  %v3366_v28 = vadd.f32 %v3359_v54, %v2222_v47 }
 0xdfb   :  { %v3290_v59 = vpop.f32.mrf.mxu0  ;;  %v3361_v4 = vpop.f32.mrf.mxu1 }
 0xdfc   :  { %v3806_v29 = vmul.f32 -1.442695, %v3364_v23  ;;  %v3365_v56 = vadd.f32 %v3290_v59, %v2111_v57  ;;  %v3367_v10 = vadd.f32 %v3361_v4, %v2224_v52 }
 0xdfe   :  { %4036 = vpow2.f32 %v3806_v29  ;;  %v3807_v0 = vmul.f32 -1.442695, %v3365_v56  ;;  %v3808_v49 = vmul.f32 -1.442695, %v3367_v10 }
 0xe00   :  { %4038 = vpow2.f32 %v3807_v0 }
 0xe01   :  { %4040 = vtanh.f32 %v3366_v28 }
 0xe02   :  { %4042 = vpow2.f32 %v3808_v49 }
 0xe0b   :  { %v4037_v13 = vpop.eup %4036 }
 0xe0c   :  { %v3371_v3 = vadd.f32 1.0, %v4037_v13 }
 0xe0d   :  { %v4039_v20 = vpop.eup %4038 }
 0xe0e   :  { %4044 = vrcp.f32 %v3371_v3  ;;  %v3377_v59 = vadd.f32 1.0, %v4039_v20  ;;  %v4041_v56 = vpop.eup %4040 }
 0xe0f   :  { %v4043_v57 = vpop.eup %4042 }
 0xe10   :  { %4046 = vrcp.f32 %v3377_v59  ;;  %v3384_v23 = vadd.f32 1.0, %v4043_v57 }
 0xe12   :  { %4048 = vrcp.f32 %v3384_v23 }
 0xe1b   :  { %v4045_v29 = vpop.eup %4044 }
 0xe1c   :  { %v3388_v0 = vmul.f32 %v4045_v29, %v4041_v56 }
 0xe1d   :  { %v4047_v31 = vpop.eup %4046 }
 0xe1e   :  { %v3387_v52 = vmul.f32 %v4047_v31, %v6208_v48 }
 0xe1f   :  { %v4049_v13 = vpop.eup %4048 }
 0xe20   :  { %v6286_v4 = vadd.f32 %v3388_v0, %v3387_v52 }
 0xe22   :  { %4050 = vtanh.f32 %v6286_v4 }
 0xe2f   :  { %v4051_v50 = vpop.eup %4050 }
 0xe30   :  { %v3391_v54 = vmul.f32 %v4051_v50, %v4049_v13  ;;  %v7012_v13 = vld [vmem:[#allocation69_spill] sm:$0xff] }
 0xe32   :  { %3393 = vst [vmem:[#allocation15 + $0x28] sm:$0xff] %v3391_v54  ;;  %3463 = vmatmul.mubr.f32.vlgmr.msra.gmra.mxu0 %v3391_v54  ;;  %3534 = vmatmul.mubr.f32.vlgmr.msra.gmra.mxu1 %v3391_v54 }
 0xe33   :  { %3575 = vmatpush1.msra.mxu0 %v5927_v39  ;;  %3646 = vmatpush1.msra.mxu1 %v5930_v26  ;;  %v6985_v39 = vld [vmem:[#allocation72_spill] sm:$0xff]  ;;  %v6986_v26 = vld [vmem:[#allocation29_spill] sm:$0xff] }
 0xe34   :  { %3576 = vmatprep.subr.mxu0 %v5933_v9  ;;  %3647 = vmatprep.subr.mxu1 %v5936_v53  ;;  %v6987_v9 = vld [vmem:[#allocation27_spill] sm:$0xff]  ;;  %v6988_v53 = vld [vmem:[#allocation49_spill] sm:$0xff] }
 0xe35   :  { %3577 = vmatpush1.msra.mxu0 %v5939_v12  ;;  %3648 = vmatpush1.msra.mxu1 %v5942_v40  ;;  %v6989_v12 = vld [vmem:[#allocation50_spill] sm:$0xff]  ;;  %v6990_v40 = vld [vmem:[#allocation48_spill] sm:$0xff] }
 0xe36   :  { %3578 = vmatprep.subr.mxu0 %v5945_v6  ;;  %3649 = vmatprep.subr.mxu1 %v5948_v30  ;;  %v6991_v6 = vld [vmem:[#allocation51_spill] sm:$0xff]  ;;  %v6992_v30 = vld [vmem:[#allocation53_spill] sm:$0xff] }
 0xe37   :  { %3579 = vmatpush1.msra.mxu0 %v5951_v41  ;;  %3650 = vmatpush1.msra.mxu1 %v5954_v5  ;;  %v6993_v41 = vld [vmem:[#allocation54_spill] sm:$0xff]  ;;  %v6994_v5 = vld [vmem:[#allocation52_spill] sm:$0xff] }
 0xe38   :  { %3580 = vmatprep.subr.mxu0 %v5957_v8  ;;  %3651 = vmatprep.subr.mxu1 %v5960_v42  ;;  %v6995_v8 = vld [vmem:[#allocation20_spill] sm:$0xff]  ;;  %v6996_v42 = vld [vmem:[#allocation21_spill] sm:$0xff] }
 0xe39   :  { %3581 = vmatpush1.msra.mxu0 %v5963_v37  ;;  %3652 = vmatpush1.msra.mxu1 %v5966_v43  ;;  %v6997_v37 = vld [vmem:[#allocation55_spill] sm:$0xff]  ;;  %v6998_v43 = vld [vmem:[#allocation57_spill] sm:$0xff] }
 0xe3a   :  { %3582 = vmatprep.subr.mxu0 %v6051_v46  ;;  %3653 = vmatprep.subr.mxu1 %v6054_v45  ;;  %v6999_v46 = vld [vmem:[#allocation58_spill] sm:$0xff]  ;;  %v7000_v45 = vld [vmem:[#allocation56_spill] sm:$0xff] }
 0xe3b   :  { %3583 = vmatpush1.msra.mxu0 %v6057_v55  ;;  %3654 = vmatpush1.msra.mxu1 %v6060_v60  ;;  %v7001_v55 = vld [vmem:[#allocation23_spill] sm:$0xff]  ;;  %v7002_v60 = vld [vmem:[#allocation42_spill] sm:$0xff] }
 0xe3c   :  { %3584 = vmatprep.subr.mxu0 %v6063_v61  ;;  %3655 = vmatprep.subr.mxu1 %v6066_v1  ;;  %v7003_v61 = vld [vmem:[#allocation47_spill] sm:$0xff]  ;;  %v7004_v1 = vld [vmem:[#allocation30_spill] sm:$0xff] }
 0xe3d   :  { %3585 = vmatpush1.msra.mxu0 %v6069_v58  ;;  %3656 = vmatpush1.msra.mxu1 %v6072_v38  ;;  %v7005_v58 = vmov 0.0   ;;  %v7006_v38 = vld [vmem:[#allocation32_spill] sm:$0xff] }
 0xe3e   :  { %3586 = vmatprep.subr.mxu0 %v6075_v27  ;;  %3657 = vmatprep.subr.mxu1 %v6078_v63  ;;  %v7007_v27 = vld [vmem:[#allocation41_spill] sm:$0xff]  ;;  %v7008_v63 = vld [vmem:[#allocation22_spill] sm:$0xff] }
 0xe3f   :  { %3587 = vmatpush1.msra.mxu0 %v6081_v51  ;;  %3658 = vmatpush1.msra.mxu1 %v6084_v15  ;;  %v2115_v51 = vadd.f32 %v7008_v63, %v7007_v27  ;;  %v2121_v50 = vadd.f32 %v7012_v13, %v7007_v27 }
 0xe40   :  { %3588 = vmatprep.subr.mxu0 %v6087_v16  ;;  %3659 = vmatprep.subr.mxu1 %v6090_v17  ;;  %v7009_v16 = vld [vmem:[#allocation45_spill] sm:$0xff] }
 0xe41   :  { %3589 = vmatpush1.msra.mxu0 %v6093_v18  ;;  %3660 = vmatpush1.msra.mxu1 %v6096_v19  ;;  %v2117_v17 = vadd.f32 %v7009_v16, %v5748_v7 }
 0xe42   :  { %3590 = vmatprep.subr.mxu0 %v6099_v21  ;;  %3661 = vmatprep.subr.mxu1 %v6102_v22 }
 0xe43   :  { %3591 = vmatpush1.msra.mxu0 %v6105_v24  ;;  %3662 = vmatpush1.msra.mxu1 %v6108_v11 }
 0xe44   :  { %3592 = vmatprep.subr.mxu0 %v6111_v32  ;;  %3663 = vmatprep.subr.mxu1 %v6114_v33  ;;  %v7010_v33 = vld [vmem:[#allocation67_spill] sm:$0xff] }
 0xe45   :  { %3593 = vmatpush1.msra.mxu0 %v6117_v34  ;;  %3664 = vmatpush1.msra.mxu1 %v6120_v35  ;;  %v2230_v34 = vadd.f32 %v7010_v33, %v6884_v14 }
 0xe46   :  { %3594 = vmatprep.subr.mxu0 %v6123_v36  ;;  %3665 = vmatprep.subr.mxu1 %v6126_v62  ;;  %v7011_v36 = vld [vmem:[#allocation25_spill] sm:$0xff] }
 0xe47   :  { %3595 = vmatpush1.msra.mxu0 %v6129_v25  ;;  %3666 = vmatpush1.msra.mxu1 %v6985_v39  ;;  %v2228_v62 = vadd.f32 %v7011_v36, %v5765_v2  ;;  %v7013_v39 = vld [vmem:[#allocation68_spill] sm:$0xff] }
 0xe48   :  { %3596 = vmatprep.subr.mxu0 %v6986_v26  ;;  %3667 = vmatprep.subr.mxu1 %v6987_v9  ;;  %v2123_v26 = vadd.f32 %v7013_v39, %v5748_v7 }
 0xe49   :  { %3597 = vmatpush1.msra.mxu0 %v6988_v53  ;;  %3668 = vmatpush1.msra.mxu1 %v6989_v12 }
 0xe4a   :  { %3598 = vmatprep.subr.mxu0 %v6990_v40  ;;  %3669 = vmatprep.subr.mxu1 %v6991_v6 }
 0xe4b   :  { %3599 = vmatpush1.msra.mxu0 %v6992_v30  ;;  %3670 = vmatpush1.msra.mxu1 %v6993_v41  ;;  %v7014_v41 = vld [vmem:[#allocation43_spill] sm:$0xff] }
 0xe4c   :  { %3600 = vmatprep.subr.mxu0 %v6994_v5  ;;  %3671 = vmatprep.subr.mxu1 %v6995_v8  ;;  %v2236_v5 = vadd.f32 %v7014_v41, %v6884_v14 }
 0xe4d   :  { %3601 = vmatpush1.msra.mxu0 %v6996_v42  ;;  %3672 = vmatpush1.msra.mxu1 %v6997_v37  ;;  %v7015_v42 = vld [vmem:[#allocation70_spill] sm:$0xff] }
 0xe4e   :  { %3602 = vmatprep.subr.mxu0 %v6998_v43  ;;  %3673 = vmatprep.subr.mxu1 %v6999_v46  ;;  %v2234_v37 = vadd.f32 %v7015_v42, %v5765_v2 }
 0xe4f   :  { %3603 = vmatpush1.msra.mxu0 %v7000_v45  ;;  %3674 = vmatpush1.msra.mxu1 %v7001_v55 }
 0xe50   :  { %3604 = vmatprep.subr.mxu0 %v7002_v60  ;;  %3675 = vmatprep.subr.mxu1 %v7003_v61 }
 0xe51   :  { %3605 = vmatpush1.msra.mxu0 %v7004_v1  ;;  %3638 = vmatprep.mubr.f32.mxu0 %v7005_v58 }
 0xe52   :  { %3676 = vmatpush1.msra.mxu1 %v7006_v38  ;;  %3709 = vmatprep.mubr.f32.mxu1 %v7005_v58 }
 0xef2   :  { %v3464_v15 = vpop.f32.mrf.mxu0  ;;  %v3535_v24 = vpop.f32.mrf.mxu1 }
 0xef3   :  { %v3540_v18 = vadd.f32 %v3464_v15, %v2115_v51  ;;  %v3542_v25 = vadd.f32 %v3535_v24, %v2228_v62 }
 0xef4   :  { %v3466_v19 = vpop.f32.mrf.mxu0  ;;  %v3537_v32 = vpop.f32.mrf.mxu1 }
 0xef5   :  { %v3809_v21 = vmul.f32 -1.442695, %v3540_v18  ;;  %v3541_v22 = vadd.f32 %v3466_v19, %v2117_v17  ;;  %v3543_v35 = vadd.f32 %v3537_v32, %v2230_v34 }
 0xef7   :  { %4052 = vpow2.f32 %v3809_v21  ;;  %v3810_v11 = vmul.f32 -1.442695, %v3541_v22  ;;  %v3811_v48 = vmul.f32 -1.442695, %v3543_v35 }
 0xef9   :  { %4054 = vpow2.f32 %v3810_v11 }
 0xefa   :  { %4056 = vtanh.f32 %v3542_v25 }
 0xefb   :  { %4058 = vpow2.f32 %v3811_v48 }
 0xf04   :  { %v4053_v49 = vpop.eup %4052 }
 0xf05   :  { %v3547_v28 = vadd.f32 1.0, %v4053_v49 }
 0xf06   :  { %v4055_v44 = vpop.eup %4054 }
 0xf07   :  { %4060 = vrcp.f32 %v3547_v28  ;;  %v3553_v10 = vadd.f32 1.0, %v4055_v44  ;;  %v4057_v47 = vpop.eup %4056 }
 0xf08   :  { %v4059_v3 = vpop.eup %4058 }
 0xf09   :  { %4062 = vrcp.f32 %v3553_v10  ;;  %v3560_v57 = vadd.f32 1.0, %v4059_v3 }
 0xf0b   :  { %4064 = vrcp.f32 %v3560_v57 }
 0xf14   :  { %v4061_v20 = vpop.eup %4060 }
 0xf15   :  { %v3564_v59 = vmul.f32 %v4061_v20, %v4057_v47 }
 0xf16   :  { %v4063_v56 = vpop.eup %4062 }
 0xf17   :  { %v3563_v29 = vmul.f32 %v4063_v56, %v6286_v4 }
 0xf18   :  { %v4065_v31 = vpop.eup %4064 }
 0xf19   :  { %v3565_v0 = vadd.f32 %v3564_v59, %v3563_v29 }
 0xf1b   :  { %4066 = vtanh.f32 %v3565_v0 }
 0xf28   :  { %v4067_v23 = vpop.eup %4066 }
 0xf29   :  { %v3567_v52 = vmul.f32 %v4067_v23, %v4065_v31 }
 0xf2b   :  { %3569 = vst [vmem:[#allocation15 + $0x30] sm:$0xff] %v3567_v52  ;;  %3639 = vmatmul.mubr.f32.vlgmr.msra.gmra.mxu0 %v3567_v52  ;;  %3710 = vmatmul.mubr.f32.vlgmr.msra.gmra.mxu1 %v3567_v52 }
 0xfeb   :  { %v3640_v54 = vpop.f32.mrf.mxu0  ;;  %v3711_v40 = vpop.f32.mrf.mxu1 }
 0xfec   :  { %v3716_v9 = vadd.f32 %v3640_v54, %v2121_v50  ;;  %v3718_v43 = vadd.f32 %v3711_v40, %v2234_v37 }
 0xfed   :  { %v3642_v53 = vpop.f32.mrf.mxu0  ;;  %v3713_v30 = vpop.f32.mrf.mxu1 }
 0xfee   :  { %v3812_v12 = vmul.f32 -1.442695, %v3716_v9  ;;  %v3717_v4 = vadd.f32 %v3642_v53, %v2123_v26  ;;  %v3719_v8 = vadd.f32 %v3713_v30, %v2236_v5 }
 0xff0   :  { %4068 = vpow2.f32 %v3812_v12  ;;  %v3813_v6 = vmul.f32 -1.442695, %v3717_v4  ;;  %v3814_v46 = vmul.f32 -1.442695, %v3719_v8 }
 0xff2   :  { %4070 = vpow2.f32 %v3813_v6 }
 0xff3   :  { %4072 = vtanh.f32 %v3718_v43 }
 0xff4   :  { %4074 = vpow2.f32 %v3814_v46 }
 0xffd   :  { %v4069_v45 = vpop.eup %4068 }
 0xffe   :  { %v3723_v7 = vadd.f32 1.0, %v4069_v45 }
 0xfff   :  { %v4071_v55 = vpop.eup %4070 }
0x1000   :  { %4076 = vrcp.f32 %v3723_v7  ;;  %v3729_v60 = vadd.f32 1.0, %v4071_v55  ;;  %v4073_v61 = vpop.eup %4072 }
0x1001   :  { %v4075_v1 = vpop.eup %4074 }
0x1002   :  { %4078 = vrcp.f32 %v3729_v60  ;;  %v3736_v14 = vadd.f32 1.0, %v4075_v1 }
0x1004   :  { %4080 = vrcp.f32 %v3736_v14 }
0x100d   :  { %v4077_v58 = vpop.eup %4076 }
0x100e   :  { %v3740_v38 = vmul.f32 %v4077_v58, %v4073_v61 }
0x100f   :  { %v4079_v27 = vpop.eup %4078 }
0x1010   :  { %v3739_v63 = vmul.f32 %v4079_v27, %v3565_v0 }
0x1011   :  { %v4081_v2 = vpop.eup %4080 }
0x1012   :  { %v3741_v51 = vadd.f32 %v3740_v38, %v3739_v63 }
0x1014   :  { %4082 = vtanh.f32 %v3741_v51 }
0x1021   :  { %v4083_v15 = vpop.eup %4082 }
0x1022   :  { %v3743_v16 = vmul.f32 %v4083_v15, %v4081_v2 }
0x1024   :  { %3745 = vst [vmem:[#allocation15 + $0x38] sm:$0xff] %v3743_v16 }
0x1025   :  { %4323 = shalt.err (!%p4320_p1)
}
0x1026   :  { %3759 = dma.vmem_to_hbm [thread:$0]  %s3754_s4, 1024, %s6381_s5, [#allocation8], %s4345_s7, %s4345_s7, %s4346_s8  }
0x1027   :  { %4338 = dma.done.wait [#allocation8], 1024  }
0x1028   :  { %4339 = vsyncadd [#allocation8], 4294966272 }
0x1029   :  { %3763 = vsyncpa [#allocation7], 1 }
0x102a   :  { %3764 = vsyncpa [#allocation10], 1 }
0x102b   :  { %3765 = vsyncpa [#allocation13], 1 }
0x102c   :  { %3766 = vsyncpa [#allocation8], 1 }

</bundles_post_ra>
